<compile_context>
chip_gen: v5e
topology: v5e:2x2
jax: 0.10.0
libtpu: 0.0.40
codegen_flags: <defaults>
</compile_context>

<pallas_src>
import functools
import math

import jax
import jax.numpy as jnp
from jax.experimental import pallas as pl
from jax.experimental.pallas import tpu as pltpu


def _round_up(a, m):
    return ((a + m - 1) // m) * m


# ----------------------------- Pallas kernels -------------------------------

def _dft_kernel(fr_ref, m_ref, o_ref):
    # fr_ref: (TM, n_fft) f32   m_ref: (n_fft, 2*Fp) f32   o_ref: (TM, 2*Fp) f32
    o_ref[...] = jnp.dot(fr_ref[...], m_ref[...],
                         preferred_element_type=jnp.float32)


def _dft_matmul(frames2d, dft_mat, tm):
    mp, nfft = frames2d.shape
    two_fp = dft_mat.shape[1]
    return pl.pallas_call(
        _dft_kernel,
        out_shape=jax.ShapeDtypeStruct((mp, two_fp), jnp.float32),
        grid=(mp // tm,),
        in_specs=[
            pl.BlockSpec((tm, nfft), lambda i: (i, 0)),
            pl.BlockSpec((nfft, two_fp), lambda i: (0, 0)),
        ],
        out_specs=pl.BlockSpec((tm, two_fp), lambda i: (i, 0)),
        compiler_params=pltpu.CompilerParams(dimension_semantics=("parallel",)),
    )(frames2d, dft_mat)


def _conv_gemm_kernel(x_ref, w_ref, b_ref, o_ref, *, leaky):
    # x_ref: (1, TM, Kp) bf16   w_ref: (1, Kp, NL) bf16   b_ref: (1, 1, NL) f32
    # o_ref: (1, TM, NL) — NL = woc * cpad is lane-dense (multiple of 128).
    acc = jnp.dot(x_ref[0], w_ref[0], preferred_element_type=jnp.float32)
    acc = acc + b_ref[0]
    if leaky:
        acc = jnp.where(acc >= 0.0, acc, 0.1 * acc)      # fused leaky_relu(0.1)
    o_ref[0] = acc.astype(o_ref.dtype)


# --------------------------- banded-GEMM conv layer --------------------------

def conv_layer(x, widths, w, bias, *, kw, stride, pad_w, leaky,
               out_dtype=jnp.bfloat16, compute_dtype=jnp.bfloat16):
    """Conv2d over (time, freq) for all bands at once — one deep GEMM per grid step.

    x:    (nb, B, H, Wc, Cin), exactly zero beyond widths[band] along freq.
    w:    (nb, kh, kw, Cin, Cout)     bias: (nb, Cout)
    Returns (y, out_widths) with y: (nb, B, H, W_out_c, Cout); invalid freq columns
    are exactly zero (the validity mask is folded into the banded weight / bias).
    """
    nb, bsz, H, Wc, Cin = x.shape
    kh, Cout = w.shape[1], w.shape[4]
    out_widths = [(wd + 2 * pad_w - kw) // stride + 1 for wd in widths]
    max_out = max(out_widths)

    # Lane-dense output: nl = woc*cpad multiple of 128.  Pad a small Cout
    # (conv_post: 1 -> 8) so it does not force woc up to 128 (7x wasted MACs).
    cpad = Cout if (Cout >= 8 and 128 % Cout == 0) else _round_up(Cout, 8)
    lane_mult = 128 // math.gcd(cpad, 128)
    woc = _round_up(max_out, max(8, lane_mult))             # compute width (freq)
    nl = woc * cpad
    w_need = (woc - 1) * stride + kw                        # padded input freq columns
    K = kh * w_need * Cin
    Kp = _round_up(K, 128)                                  # aligned x-block loads

    # ---- glue: kh-shifted, freq-padded input; batch folded into the GEMM M ----
    right = max(w_need - pad_w - Wc, 0)
    xw = jnp.pad(x, ((0, 0), (0, 0), (0, 0), (pad_w, right), (0, 0)))[:, :, :, :w_need, :]
    xh = jnp.pad(xw, ((0, 0), (0, 0), (1, 1), (0, 0), (0, 0)))
    feat = jnp.stack([xh[:, :, dh:dh + H] for dh in range(kh)], axis=3)
    M = bsz * H
    tm = min(256, _round_up(M, 16))                         # M rows per grid step
    Mp = _round_up(M, tm)
    xk = feat.reshape(nb, M, K)
    xk = jnp.pad(xk, ((0, 0), (0, Mp - M), (0, Kp - K))).astype(compute_dtype)

    # ---- glue: banded (Toeplitz) weight; stride, zero-pad AND the per-band freq
    #      validity mask folded in (leaky(0) == 0 keeps next-layer padding exact) ----
    j = jnp.arange(woc)
    wi = jnp.arange(w_need)
    dw = wi[None, :] - j[:, None] * stride                  # (woc, w_need)
    valid = (dw >= 0) & (dw < kw)
    wg = jnp.take(w, jnp.clip(dw, 0, kw - 1), axis=2)       # (nb, kh, woc, w_need, Cin, Cout)
    wg = jnp.where(valid[None, None, :, :, None, None], wg, 0.0)
    col_ok = (j[None, :] < jnp.asarray(out_widths)[:, None]).astype(wg.dtype)  # (nb, woc)
    wg = wg * col_ok[:, None, :, None, None, None]
    if cpad != Cout:
        wg = jnp.pad(wg, ((0, 0),) * 5 + ((0, cpad - Cout),))
    wt = jnp.transpose(wg, (0, 1, 3, 4, 2, 5)).reshape(nb, K, nl)
    wt = jnp.pad(wt, ((0, 0), (0, Kp - K), (0, 0))).astype(compute_dtype)
    bpd = jnp.pad(bias, ((0, 0), (0, cpad - Cout))) if cpad != Cout else bias
    bt = (bpd[:, None, :] * col_ok[:, :, None]).reshape(nb, 1, nl).astype(jnp.float32)

    # ---- one pallas_call for all bands / batch / time tiles ----
    out_isz = jnp.dtype(out_dtype).itemsize
    need = 2 * (tm * Kp * 2 + Kp * nl * 2 + nl * 4 + tm * nl * out_isz)  # dbl-buffered
    vmem_limit = int(min(max(need + (8 << 20), 32 << 20), 56 << 20))
    kernel = functools.partial(_conv_gemm_kernel, leaky=leaky)
    out = pl.pallas_call(
        kernel,
        out_shape=jax.ShapeDtypeStruct((nb, Mp, nl), out_dtype),
        grid=(nb, Mp // tm),
        in_specs=[
            pl.BlockSpec((1, tm, Kp), lambda b, m: (b, m, 0)),
            pl.BlockSpec((1, Kp, nl), lambda b, m: (b, 0, 0)),   # per-band, M-resident
            pl.BlockSpec((1, 1, nl), lambda b, m: (b, 0, 0)),
        ],
        out_specs=pl.BlockSpec((1, tm, nl), lambda b, m: (b, m, 0)),
        compiler_params=pltpu.CompilerParams(
            dimension_semantics=("parallel", "parallel"),
            vmem_limit_bytes=vmem_limit),
    )(xk, wt, bt)

    # ---- glue: crop padded M rows, unflatten; no mask pass needed anymore ----
    y = out[:, :M].reshape(nb, bsz, H, woc, cpad)
    if cpad != Cout:
        y = y[..., :Cout]
    return y, out_widths


# ------------------------------- glue: STFT ----------------------------------

def spectrogram_bands(x, window_length, hop_factor, bands):
    """x: (B, T) -> (nb, B, TT, Wc, 2) band-stacked real/imag spectrogram + widths."""
    n_fft = window_length
    hop = int(window_length * hop_factor)
    F = n_fft // 2 + 1

    x = x - jnp.mean(x, axis=-1, keepdims=True)
    x = 0.8 * x / (jnp.max(jnp.abs(x), axis=-1, keepdims=True) + 1e-9)

    pad = n_fft // 2
    xp = jnp.pad(x, ((0, 0), (pad, pad)), mode="reflect")
    TT = (xp.shape[-1] - n_fft) // hop + 1
    idx = jnp.arange(TT)[:, None] * hop + jnp.arange(n_fft)[None, :]
    frames = xp[:, idx]                                        # (B, TT, n_fft)

    n = jnp.arange(n_fft, dtype=jnp.float32)
    win = 0.5 * (1.0 - jnp.cos(2.0 * jnp.pi * n / window_length))   # periodic Hann
    frames = frames * win[None, None, :]

    # DFT matrix [cos | -sin], each half padded to 128 lanes (lane-dense output).
    f = jnp.arange(F, dtype=jnp.float32)
    ang = 2.0 * jnp.pi * n[:, None] * f[None, :] / n_fft
    Fp = _round_up(F, 128)
    dft = jnp.concatenate([jnp.pad(jnp.cos(ang), ((0, 0), (0, Fp - F))),
                           jnp.pad(-jnp.sin(ang), ((0, 0), (0, Fp - F)))], axis=1)

    B = x.shape[0]
    M = B * TT
    tm = 256 if M >= 256 else _round_up(M, 8)
    Mp = _round_up(M, tm)
    fr2 = jnp.pad(frames.reshape(M, n_fft), ((0, Mp - M), (0, 0))).astype(jnp.float32)
    spec = _dft_matmul(fr2, dft.astype(jnp.float32), tm)        # (Mp, 2*Fp)

    real = spec[:M, :F].reshape(B, TT, F)
    imag = spec[:M, Fp:Fp + F].reshape(B, TT, F)
    xri = jnp.stack([real, imag], axis=-1)                      # (B, TT, F, 2)

    edges = [(int(b0 * F), int(b1 * F)) for (b0, b1) in bands]
    widths = [hi - lo for lo, hi in edges]
    Wc = max(widths)
    xb = jnp.stack(
        [jnp.pad(xri[:, :, lo:hi, :], ((0, 0), (0, 0), (0, Wc - (hi - lo)), (0, 0)))
         for lo, hi in edges], axis=0)                          # (nb, B, TT, Wc, 2)
    return xb, widths


# ------------------------------- parameters ----------------------------------

def _conv_init(key, nb, kh, kw, cin, cout):
    kw_, kb = jax.random.split(key)
    scale = 1.0 / math.sqrt(cin * kh * kw)
    w = jax.random.uniform(kw_, (nb, kh, kw, cin, cout), jnp.float32, -scale, scale)
    b = jax.random.uniform(kb, (nb, cout), jnp.float32, -scale, scale)
    return w, b
    # NOTE: weight_norm at PyTorch init is the identity reparametrization, so plain
    # weights reproduce the init-time forward exactly.


def init_params(key, channels, n_bands):
    keys = jax.random.split(key, 6)
    cfg = [(9, 2, channels), (9, channels, channels), (9, channels, channels),
           (9, channels, channels), (3, channels, channels)]
    band_convs = [_conv_init(k, n_bands, 3, kw, cin, cout)
                  for k, (kw, cin, cout) in zip(keys[:5], cfg)]
    conv_post = _conv_init(keys[5], 1, 3, 3, channels, 1)
    return {"band_convs": band_convs, "conv_post": conv_post}


# --------------------------------- forward -----------------------------------

# per-layer (kw, stride_w, pad_w) matching _build_block (kh=3, stride_h=1, pad_h=1)
_LAYER_CFG = [(9, 1, 4), (9, 2, 4), (9, 2, 4), (9, 2, 4), (3, 1, 1)]


def discriminator_b_forward(x, params, *, window_length, hop_factor, bands):
    """x: (B, 1, T). Returns (flat_logits, fmap) like the reference (is_san=False)."""
    nb = len(bands)
    xb, widths = spectrogram_bands(x[:, 0, :], window_length, hop_factor, bands)

    fmap_bands = [[] for _ in range(nb)]
    y = xb
    for li, ((w, b), (kw, sw, pw)) in enumerate(zip(params["band_convs"], _LAYER_CFG)):
        y, widths = conv_layer(y, widths, w, b, kw=kw, stride=sw, pad_w=pw, leaky=True)
        if li > 0:
            # batched fmap emission: one transpose + one f32 cast per layer
            yt = jnp.transpose(y, (0, 1, 4, 2, 3)).astype(jnp.float32)   # (nb,B,C,H,W)
            for bi in range(nb):
                fmap_bands[bi].append(yt[bi, :, :, :, :widths[bi]])

    # concatenate bands along freq (valid columns only), then conv_post (no leaky)
    cat = jnp.concatenate([y[bi, :, :, :widths[bi], :] for bi in range(nb)], axis=2)
    wp, bp = params["conv_post"]
    yp, wpost = conv_layer(cat[None], [cat.shape[2]], wp, bp, kw=3, stride=1, pad_w=1,
                           leaky=False, out_dtype=jnp.float32)
    post = yp[0, :, :, :wpost[0], :]                            # (B, TT, Wcat, 1) f32

    fmap = [fm for per_band in fmap_bands for fm in per_band]   # band-major order
    fmap.append(jnp.transpose(post, (0, 3, 1, 2)))              # conv_post output, NCHW
    flat = post.reshape(post.shape[0], -1)                      # torch.flatten(x, 1, -1)
    fmap.append(flat)                                           # reference appends it too
    return flat, fmap


if __name__ == "__main__":
    window_length = 128        # n_fft; F = 65 freq bins
    hop_factor = 0.25
    channels = 16
    bands = ((0.0, 0.1), (0.1, 0.25), (0.25, 0.5), (0.5, 0.75), (0.75, 1.0))

    key = jax.random.PRNGKey(0)
    kx, kp = jax.random.split(key)
    B, T = 2, 256
    x = jax.random.normal(kx, (B, 1, T), dtype=jnp.float32)
    params = init_params(kp, channels, len(bands))

    fwd = jax.jit(functools.partial(discriminator_b_forward,
                                    window_length=window_length,
                                    hop_factor=hop_factor,
                                    bands=bands))
    out, fmap = fwd(x, params)
    jax.block_until_ready(out)
    jax.block_until_ready(fmap)

    assert out.ndim == 2 and out.shape[0] == B
    assert len(fmap) == 4 * len(bands) + 2
    print("KERNEL_OK")
</pallas_src>

<mosaic_0001>
module attributes {stable_mosaic.version = 11 : i64} {
  func.func @_dft_kernel(%arg0: i32, %arg1: memref<24x128xf32, #tpu.memory_space<vmem>>, %arg2: memref<128x256xf32, #tpu.memory_space<vmem>>, %arg3: memref<24x256xf32, #tpu.memory_space<vmem>>) attributes {dimension_semantics = [#tpu.dimension_semantics<parallel>], iteration_bounds = array<i64: 1>, scalar_prefetch = 0 : i64, scratch_operands = 0 : i64, tpu.core_type = #tpu.core_type<tc>, window_params = [{transform_indices = @transform_0, window_bounds = array<i64: 24, 128>}, {pipeline_mode = #tpu.pipeline_mode<synchronous>, transform_indices = @transform_1, window_bounds = array<i64: 128, 256>}, {transform_indices = @transform_2, window_bounds = array<i64: 24, 256>}]} {
    %c0 = arith.constant 0 : index
    %c0_0 = arith.constant 0 : index
    %0 = vector.load %arg1[%c0, %c0_0] : memref<24x128xf32, #tpu.memory_space<vmem>>, vector<24x128xf32>
    %c0_1 = arith.constant 0 : index
    %c0_2 = arith.constant 0 : index
    %1 = vector.load %arg2[%c0_1, %c0_2] : memref<128x256xf32, #tpu.memory_space<vmem>>, vector<128x256xf32>
    %cst = arith.constant dense<0.000000e+00> : vector<24x256xf32>
    %2 = tpu.matmul %0, %1, %cst {dimension_numbers = #tpu.dot_dimension_numbers<[1], [0], [0], [1], [0, 0, 1, 1], [], []>} : vector<24x128xf32>, vector<128x256xf32>, vector<24x256xf32> -> vector<24x256xf32>
    %c0_3 = arith.constant 0 : index
    %c0_4 = arith.constant 0 : index
    %3 = vector.load %arg3[%c0_3, %c0_4] : memref<24x256xf32, #tpu.memory_space<vmem>>, vector<24x256xf32>
    tpu.vector_store %arg3[%c0_3, %c0_4], %2 {strides = array<i32>} : memref<24x256xf32, #tpu.memory_space<vmem>>, vector<24x256xf32>,
    return
  }
  func.func @transform_0(%arg0: i32) -> (i32, i32) {
    %c0_i32 = arith.constant 0 : i32
    %c0_i32_0 = arith.constant 0 : i32
    return %arg0, %c0_i32 : i32, i32
  }
  func.func @transform_1(%arg0: i32) -> (i32, i32) {
    %c0_i32 = arith.constant 0 : i32
    %c0_i32_0 = arith.constant 0 : i32
    %c0_i32_1 = arith.constant 0 : i32
    return %c0_i32, %c0_i32_0 : i32, i32
  }
  func.func @transform_2(%arg0: i32) -> (i32, i32) {
    %c0_i32 = arith.constant 0 : i32
    %c0_i32_0 = arith.constant 0 : i32
    return %arg0, %c0_i32 : i32, i32
  }
}

module attributes {stable_mosaic.version = 11 : i64} {
  func.func @_conv_gemm_kernel(%arg0: i32, %arg1: i32, %arg2: memref<1x32x256xbf16, #tpu.memory_space<vmem>>, %arg3: memref<1x256x384xbf16, #tpu.memory_space<vmem>>, %arg4: memref<1x1x384xf32, #tpu.memory_space<vmem>>, %arg5: memref<1x32x384xbf16, #tpu.memory_space<vmem>>) attributes {dimension_semantics = [#tpu.dimension_semantics<parallel>, #tpu.dimension_semantics<parallel>], iteration_bounds = array<i64: 5, 1>, scalar_prefetch = 0 : i64, scratch_operands = 0 : i64, tpu.core_type = #tpu.core_type<tc>, window_params = [{transform_indices = @transform_0, window_bounds = array<i64: 1, 32, 256>}, {transform_indices = @transform_1, window_bounds = array<i64: 1, 256, 384>}, {transform_indices = @transform_2, window_bounds = array<i64: 1, 1, 384>}, {transform_indices = @transform_3, window_bounds = array<i64: 1, 32, 384>}]} {
    %c0 = arith.constant 0 : index
    %c0_0 = arith.constant 0 : index
    %c0_1 = arith.constant 0 : index
    %0 = vector.load %arg2[%c0, %c0_0, %c0_1] : memref<1x32x256xbf16, #tpu.memory_space<vmem>>, vector<1x32x256xbf16>
    %1 = vector.shape_cast %0 : vector<1x32x256xbf16> to vector<32x256xbf16>
    %c0_2 = arith.constant 0 : index
    %c0_3 = arith.constant 0 : index
    %c0_4 = arith.constant 0 : index
    %2 = vector.load %arg3[%c0_2, %c0_3, %c0_4] : memref<1x256x384xbf16, #tpu.memory_space<vmem>>, vector<1x256x384xbf16>
    %3 = vector.shape_cast %2 : vector<1x256x384xbf16> to vector<256x384xbf16>
    %cst = arith.constant dense<0.000000e+00> : vector<32x384xf32>
    %4 = tpu.matmul %1, %3, %cst {dimension_numbers = #tpu.dot_dimension_numbers<[1], [0], [0], [1], [0, 0, 1, 1], [], []>} : vector<32x256xbf16>, vector<256x384xbf16>, vector<32x384xf32> -> vector<32x384xf32>
    %c0_5 = arith.constant 0 : index
    %c0_6 = arith.constant 0 : index
    %c0_7 = arith.constant 0 : index
    %5 = vector.load %arg4[%c0_5, %c0_6, %c0_7] : memref<1x1x384xf32, #tpu.memory_space<vmem>>, vector<1x1x384xf32>
    %6 = vector.shape_cast %5 : vector<1x1x384xf32> to vector<1x384xf32>
    %7 = vector.broadcast %6 : vector<1x384xf32> to vector<32x384xf32>
    %8 = arith.addf %4, %7 : vector<32x384xf32>
    %cst_8 = arith.constant 0.000000e+00 : f32
    %9 = vector.broadcast %cst_8 : f32 to vector<32x384xf32>
    %10 = arith.cmpf oge, %8, %9 : vector<32x384xf32>
    %cst_9 = arith.constant 1.000000e-01 : f32
    %11 = vector.broadcast %cst_9 : f32 to vector<32x384xf32>
    %12 = arith.mulf %11, %8 : vector<32x384xf32>
    %13 = arith.select %10, %8, %12 : vector<32x384xi1>, vector<32x384xf32>
    %14 = arith.truncf %13 : vector<32x384xf32> to vector<32x384xbf16>
    %c0_10 = arith.constant 0 : index
    %c0_11 = arith.constant 0 : index
    %c0_12 = arith.constant 0 : index
    %15 = vector.load %arg5[%c0_10, %c0_11, %c0_12] : memref<1x32x384xbf16, #tpu.memory_space<vmem>>, vector<1x32x384xbf16>
    %16 = vector.shape_cast %15 : vector<1x32x384xbf16> to vector<32x384xbf16>
    %17 = vector.shape_cast %14 : vector<32x384xbf16> to vector<1x32x384xbf16>
    tpu.vector_store %arg5[%c0_10, %c0_11, %c0_12], %17 {strides = array<i32>} : memref<1x32x384xbf16, #tpu.memory_space<vmem>>, vector<1x32x384xbf16>,
    return
  }
  func.func @transform_0(%arg0: i32, %arg1: i32) -> (i32, i32, i32) {
    %c0_i32 = arith.constant 0 : i32
    %c0_i32_0 = arith.constant 0 : i32
    return %arg0, %arg1, %c0_i32 : i32, i32, i32
  }
  func.func @transform_1(%arg0: i32, %arg1: i32) -> (i32, i32, i32) {
    %c0_i32 = arith.constant 0 : i32
    %c0_i32_0 = arith.constant 0 : i32
    %c0_i32_1 = arith.constant 0 : i32
    return %arg0, %c0_i32, %c0_i32_0 : i32, i32, i32
  }
  func.func @transform_2(%arg0: i32, %arg1: i32) -> (i32, i32, i32) {
    %c0_i32 = arith.constant 0 : i32
    %c0_i32_0 = arith.constant 0 : i32
    %c0_i32_1 = arith.constant 0 : i32
    return %arg0, %c0_i32, %c0_i32_0 : i32, i32, i32
  }
  func.func @transform_3(%arg0: i32, %arg1: i32) -> (i32, i32, i32) {
    %c0_i32 = arith.constant 0 : i32
    %c0_i32_0 = arith.constant 0 : i32
    return %arg0, %arg1, %c0_i32 : i32, i32, i32
  }
}

module attributes {stable_mosaic.version = 11 : i64} {
  func.func @_conv_gemm_kernel(%arg0: i32, %arg1: i32, %arg2: memref<1x32x1920xbf16, #tpu.memory_space<vmem>>, %arg3: memref<1x1920x256xbf16, #tpu.memory_space<vmem>>, %arg4: memref<1x1x256xf32, #tpu.memory_space<vmem>>, %arg5: memref<1x32x256xbf16, #tpu.memory_space<vmem>>) attributes {dimension_semantics = [#tpu.dimension_semantics<parallel>, #tpu.dimension_semantics<parallel>], iteration_bounds = array<i64: 5, 1>, scalar_prefetch = 0 : i64, scratch_operands = 0 : i64, tpu.core_type = #tpu.core_type<tc>, window_params = [{transform_indices = @transform_0, window_bounds = array<i64: 1, 32, 1920>}, {transform_indices = @transform_1, window_bounds = array<i64: 1, 1920, 256>}, {transform_indices = @transform_2, window_bounds = array<i64: 1, 1, 256>}, {transform_indices = @transform_3, window_bounds = array<i64: 1, 32, 256>}]} {
    %c0 = arith.constant 0 : index
    %c0_0 = arith.constant 0 : index
    %c0_1 = arith.constant 0 : index
    %0 = vector.load %arg2[%c0, %c0_0, %c0_1] : memref<1x32x1920xbf16, #tpu.memory_space<vmem>>, vector<1x32x1920xbf16>
    %1 = vector.shape_cast %0 : vector<1x32x1920xbf16> to vector<32x1920xbf16>
    %c0_2 = arith.constant 0 : index
    %c0_3 = arith.constant 0 : index
    %c0_4 = arith.constant 0 : index
    %2 = vector.load %arg3[%c0_2, %c0_3, %c0_4] : memref<1x1920x256xbf16, #tpu.memory_space<vmem>>, vector<1x1920x256xbf16>
    %3 = vector.shape_cast %2 : vector<1x1920x256xbf16> to vector<1920x256xbf16>
    %cst = arith.constant dense<0.000000e+00> : vector<32x256xf32>
    %4 = tpu.matmul %1, %3, %cst {dimension_numbers = #tpu.dot_dimension_numbers<[1], [0], [0], [1], [0, 0, 1, 1], [], []>} : vector<32x1920xbf16>, vector<1920x256xbf16>, vector<32x256xf32> -> vector<32x256xf32>
    %c0_5 = arith.constant 0 : index
    %c0_6 = arith.constant 0 : index
    %c0_7 = arith.constant 0 : index
    %5 = vector.load %arg4[%c0_5, %c0_6, %c0_7] : memref<1x1x256xf32, #tpu.memory_space<vmem>>, vector<1x1x256xf32>
    %6 = vector.shape_cast %5 : vector<1x1x256xf32> to vector<1x256xf32>
    %7 = vector.broadcast %6 : vector<1x256xf32> to vector<32x256xf32>
    %8 = arith.addf %4, %7 : vector<32x256xf32>
    %cst_8 = arith.constant 0.000000e+00 : f32
    %9 = vector.broadcast %cst_8 : f32 to vector<32x256xf32>
    %10 = arith.cmpf oge, %8, %9 : vector<32x256xf32>
    %cst_9 = arith.constant 1.000000e-01 : f32
    %11 = vector.broadcast %cst_9 : f32 to vector<32x256xf32>
    %12 = arith.mulf %11, %8 : vector<32x256xf32>
    %13 = arith.select %10, %8, %12 : vector<32x256xi1>, vector<32x256xf32>
    %14 = arith.truncf %13 : vector<32x256xf32> to vector<32x256xbf16>
    %c0_10 = arith.constant 0 : index
    %c0_11 = arith.constant 0 : index
    %c0_12 = arith.constant 0 : index
    %15 = vector.load %arg5[%c0_10, %c0_11, %c0_12] : memref<1x32x256xbf16, #tpu.memory_space<vmem>>, vector<1x32x256xbf16>
    %16 = vector.shape_cast %15 : vector<1x32x256xbf16> to vector<32x256xbf16>
    %17 = vector.shape_cast %14 : vector<32x256xbf16> to vector<1x32x256xbf16>
    tpu.vector_store %arg5[%c0_10, %c0_11, %c0_12], %17 {strides = array<i32>} : memref<1x32x256xbf16, #tpu.memory_space<vmem>>, vector<1x32x256xbf16>,
    return
  }
  func.func @transform_0(%arg0: i32, %arg1: i32) -> (i32, i32, i32) {
    %c0_i32 = arith.constant 0 : i32
    %c0_i32_0 = arith.constant 0 : i32
    return %arg0, %arg1, %c0_i32 : i32, i32, i32
  }
  func.func @transform_1(%arg0: i32, %arg1: i32) -> (i32, i32, i32) {
    %c0_i32 = arith.constant 0 : i32
    %c0_i32_0 = arith.constant 0 : i32
    %c0_i32_1 = arith.constant 0 : i32
    return %arg0, %c0_i32, %c0_i32_0 : i32, i32, i32
  }
  func.func @transform_2(%arg0: i32, %arg1: i32) -> (i32, i32, i32) {
    %c0_i32 = arith.constant 0 : i32
    %c0_i32_0 = arith.constant 0 : i32
    %c0_i32_1 = arith.constant 0 : i32
    return %arg0, %c0_i32, %c0_i32_0 : i32, i32, i32
  }
  func.func @transform_3(%arg0: i32, %arg1: i32) -> (i32, i32, i32) {
    %c0_i32 = arith.constant 0 : i32
    %c0_i32_0 = arith.constant 0 : i32
    return %arg0, %arg1, %c0_i32 : i32, i32, i32
  }
}

module attributes {stable_mosaic.version = 11 : i64} {
  func.func @_conv_gemm_kernel(%arg0: i32, %arg1: i32, %arg2: memref<1x32x1152xbf16, #tpu.memory_space<vmem>>, %arg3: memref<1x1152x128xbf16, #tpu.memory_space<vmem>>, %arg4: memref<1x1x128xf32, #tpu.memory_space<vmem>>, %arg5: memref<1x32x128xbf16, #tpu.memory_space<vmem>>) attributes {dimension_semantics = [#tpu.dimension_semantics<parallel>, #tpu.dimension_semantics<parallel>], iteration_bounds = array<i64: 5, 1>, scalar_prefetch = 0 : i64, scratch_operands = 0 : i64, tpu.core_type = #tpu.core_type<tc>, window_params = [{transform_indices = @transform_0, window_bounds = array<i64: 1, 32, 1152>}, {transform_indices = @transform_1, window_bounds = array<i64: 1, 1152, 128>}, {transform_indices = @transform_2, window_bounds = array<i64: 1, 1, 128>}, {transform_indices = @transform_3, window_bounds = array<i64: 1, 32, 128>}]} {
    %c0 = arith.constant 0 : index
    %c0_0 = arith.constant 0 : index
    %c0_1 = arith.constant 0 : index
    %0 = vector.load %arg2[%c0, %c0_0, %c0_1] : memref<1x32x1152xbf16, #tpu.memory_space<vmem>>, vector<1x32x1152xbf16>
    %1 = vector.shape_cast %0 : vector<1x32x1152xbf16> to vector<32x1152xbf16>
    %c0_2 = arith.constant 0 : index
    %c0_3 = arith.constant 0 : index
    %c0_4 = arith.constant 0 : index
    %2 = vector.load %arg3[%c0_2, %c0_3, %c0_4] : memref<1x1152x128xbf16, #tpu.memory_space<vmem>>, vector<1x1152x128xbf16>
    %3 = vector.shape_cast %2 : vector<1x1152x128xbf16> to vector<1152x128xbf16>
    %cst = arith.constant dense<0.000000e+00> : vector<32x128xf32>
    %4 = tpu.matmul %1, %3, %cst {dimension_numbers = #tpu.dot_dimension_numbers<[1], [0], [0], [1], [0, 0, 1, 1], [], []>} : vector<32x1152xbf16>, vector<1152x128xbf16>, vector<32x128xf32> -> vector<32x128xf32>
    %c0_5 = arith.constant 0 : index
    %c0_6 = arith.constant 0 : index
    %c0_7 = arith.constant 0 : index
    %5 = vector.load %arg4[%c0_5, %c0_6, %c0_7] : memref<1x1x128xf32, #tpu.memory_space<vmem>>, vector<1x1x128xf32>
    %6 = vector.shape_cast %5 : vector<1x1x128xf32> to vector<1x128xf32>
    %7 = vector.broadcast %6 : vector<1x128xf32> to vector<32x128xf32>
    %8 = arith.addf %4, %7 : vector<32x128xf32>
    %cst_8 = arith.constant 0.000000e+00 : f32
    %9 = vector.broadcast %cst_8 : f32 to vector<32x128xf32>
    %10 = arith.cmpf oge, %8, %9 : vector<32x128xf32>
    %cst_9 = arith.constant 1.000000e-01 : f32
    %11 = vector.broadcast %cst_9 : f32 to vector<32x128xf32>
    %12 = arith.mulf %11, %8 : vector<32x128xf32>
    %13 = arith.select %10, %8, %12 : vector<32x128xi1>, vector<32x128xf32>
    %14 = arith.truncf %13 : vector<32x128xf32> to vector<32x128xbf16>
    %c0_10 = arith.constant 0 : index
    %c0_11 = arith.constant 0 : index
    %c0_12 = arith.constant 0 : index
    %15 = vector.load %arg5[%c0_10, %c0_11, %c0_12] : memref<1x32x128xbf16, #tpu.memory_space<vmem>>, vector<1x32x128xbf16>
    %16 = vector.shape_cast %15 : vector<1x32x128xbf16> to vector<32x128xbf16>
    %17 = vector.shape_cast %14 : vector<32x128xbf16> to vector<1x32x128xbf16>
    tpu.vector_store %arg5[%c0_10, %c0_11, %c0_12], %17 {strides = array<i32>} : memref<1x32x128xbf16, #tpu.memory_space<vmem>>, vector<1x32x128xbf16>,
    return
  }
  func.func @transform_0(%arg0: i32, %arg1: i32) -> (i32, i32, i32) {
    %c0_i32 = arith.constant 0 : i32
    %c0_i32_0 = arith.constant 0 : i32
    return %arg0, %arg1, %c0_i32 : i32, i32, i32
  }
  func.func @transform_1(%arg0: i32, %arg1: i32) -> (i32, i32, i32) {
    %c0_i32 = arith.constant 0 : i32
    %c0_i32_0 = arith.constant 0 : i32
    %c0_i32_1 = arith.constant 0 : i32
    return %arg0, %c0_i32, %c0_i32_0 : i32, i32, i32
  }
  func.func @transform_2(%arg0: i32, %arg1: i32) -> (i32, i32, i32) {
    %c0_i32 = arith.constant 0 : i32
    %c0_i32_0 = arith.constant 0 : i32
    %c0_i32_1 = arith.constant 0 : i32
    return %arg0, %c0_i32, %c0_i32_0 : i32, i32, i32
  }
  func.func @transform_3(%arg0: i32, %arg1: i32) -> (i32, i32, i32) {
    %c0_i32 = arith.constant 0 : i32
    %c0_i32_0 = arith.constant 0 : i32
    return %arg0, %arg1, %c0_i32 : i32, i32, i32
  }
}

module attributes {stable_mosaic.version = 11 : i64} {
  func.func @_conv_gemm_kernel(%arg0: i32, %arg1: i32, %arg2: memref<1x32x512xbf16, #tpu.memory_space<vmem>>, %arg3: memref<1x512x128xbf16, #tpu.memory_space<vmem>>, %arg4: memref<1x1x128xf32, #tpu.memory_space<vmem>>, %arg5: memref<1x32x128xbf16, #tpu.memory_space<vmem>>) attributes {dimension_semantics = [#tpu.dimension_semantics<parallel>, #tpu.dimension_semantics<parallel>], iteration_bounds = array<i64: 5, 1>, scalar_prefetch = 0 : i64, scratch_operands = 0 : i64, tpu.core_type = #tpu.core_type<tc>, window_params = [{transform_indices = @transform_0, window_bounds = array<i64: 1, 32, 512>}, {transform_indices = @transform_1, window_bounds = array<i64: 1, 512, 128>}, {transform_indices = @transform_2, window_bounds = array<i64: 1, 1, 128>}, {transform_indices = @transform_3, window_bounds = array<i64: 1, 32, 128>}]} {
    %c0 = arith.constant 0 : index
    %c0_0 = arith.constant 0 : index
    %c0_1 = arith.constant 0 : index
    %0 = vector.load %arg2[%c0, %c0_0, %c0_1] : memref<1x32x512xbf16, #tpu.memory_space<vmem>>, vector<1x32x512xbf16>
    %1 = vector.shape_cast %0 : vector<1x32x512xbf16> to vector<32x512xbf16>
    %c0_2 = arith.constant 0 : index
    %c0_3 = arith.constant 0 : index
    %c0_4 = arith.constant 0 : index
    %2 = vector.load %arg3[%c0_2, %c0_3, %c0_4] : memref<1x512x128xbf16, #tpu.memory_space<vmem>>, vector<1x512x128xbf16>
    %3 = vector.shape_cast %2 : vector<1x512x128xbf16> to vector<512x128xbf16>
    %cst = arith.constant dense<0.000000e+00> : vector<32x128xf32>
    %4 = tpu.matmul %1, %3, %cst {dimension_numbers = #tpu.dot_dimension_numbers<[1], [0], [0], [1], [0, 0, 1, 1], [], []>} : vector<32x512xbf16>, vector<512x128xbf16>, vector<32x128xf32> -> vector<32x128xf32>
    %c0_5 = arith.constant 0 : index
    %c0_6 = arith.constant 0 : index
    %c0_7 = arith.constant 0 : index
    %5 = vector.load %arg4[%c0_5, %c0_6, %c0_7] : memref<1x1x128xf32, #tpu.memory_space<vmem>>, vector<1x1x128xf32>
    %6 = vector.shape_cast %5 : vector<1x1x128xf32> to vector<1x128xf32>
    %7 = vector.broadcast %6 : vector<1x128xf32> to vector<32x128xf32>
    %8 = arith.addf %4, %7 : vector<32x128xf32>
    %cst_8 = arith.constant 0.000000e+00 : f32
    %9 = vector.broadcast %cst_8 : f32 to vector<32x128xf32>
    %10 = arith.cmpf oge, %8, %9 : vector<32x128xf32>
    %cst_9 = arith.constant 1.000000e-01 : f32
    %11 = vector.broadcast %cst_9 : f32 to vector<32x128xf32>
    %12 = arith.mulf %11, %8 : vector<32x128xf32>
    %13 = arith.select %10, %8, %12 : vector<32x128xi1>, vector<32x128xf32>
    %14 = arith.truncf %13 : vector<32x128xf32> to vector<32x128xbf16>
    %c0_10 = arith.constant 0 : index
    %c0_11 = arith.constant 0 : index
    %c0_12 = arith.constant 0 : index
    %15 = vector.load %arg5[%c0_10, %c0_11, %c0_12] : memref<1x32x128xbf16, #tpu.memory_space<vmem>>, vector<1x32x128xbf16>
    %16 = vector.shape_cast %15 : vector<1x32x128xbf16> to vector<32x128xbf16>
    %17 = vector.shape_cast %14 : vector<32x128xbf16> to vector<1x32x128xbf16>
    tpu.vector_store %arg5[%c0_10, %c0_11, %c0_12], %17 {strides = array<i32>} : memref<1x32x128xbf16, #tpu.memory_space<vmem>>, vector<1x32x128xbf16>,
    return
  }
  func.func @transform_0(%arg0: i32, %arg1: i32) -> (i32, i32, i32) {
    %c0_i32 = arith.constant 0 : i32
    %c0_i32_0 = arith.constant 0 : i32
    return %arg0, %arg1, %c0_i32 : i32, i32, i32
  }
  func.func @transform_1(%arg0: i32, %arg1: i32) -> (i32, i32, i32) {
    %c0_i32 = arith.constant 0 : i32
    %c0_i32_0 = arith.constant 0 : i32
    %c0_i32_1 = arith.constant 0 : i32
    return %arg0, %c0_i32, %c0_i32_0 : i32, i32, i32
  }
  func.func @transform_2(%arg0: i32, %arg1: i32) -> (i32, i32, i32) {
    %c0_i32 = arith.constant 0 : i32
    %c0_i32_0 = arith.constant 0 : i32
    %c0_i32_1 = arith.constant 0 : i32
    return %arg0, %c0_i32, %c0_i32_0 : i32, i32, i32
  }
  func.func @transform_3(%arg0: i32, %arg1: i32) -> (i32, i32, i32) {
    %c0_i32 = arith.constant 0 : i32
    %c0_i32_0 = arith.constant 0 : i32
    return %arg0, %arg1, %c0_i32 : i32, i32, i32
  }
}

module attributes {stable_mosaic.version = 11 : i64} {
  func.func @_conv_gemm_kernel(%arg0: i32, %arg1: i32, %arg2: memref<1x32x896xbf16, #tpu.memory_space<vmem>>, %arg3: memref<1x896x128xbf16, #tpu.memory_space<vmem>>, %arg4: memref<1x1x128xf32, #tpu.memory_space<vmem>>, %arg5: memref<1x32x128xf32, #tpu.memory_space<vmem>>) attributes {dimension_semantics = [#tpu.dimension_semantics<parallel>, #tpu.dimension_semantics<parallel>], iteration_bounds = array<i64: 1, 1>, scalar_prefetch = 0 : i64, scratch_operands = 0 : i64, tpu.core_type = #tpu.core_type<tc>, window_params = [{transform_indices = @transform_0, window_bounds = array<i64: 1, 32, 896>}, {transform_indices = @transform_1, window_bounds = array<i64: 1, 896, 128>}, {transform_indices = @transform_2, window_bounds = array<i64: 1, 1, 128>}, {transform_indices = @transform_3, window_bounds = array<i64: 1, 32, 128>}]} {
    %c0 = arith.constant 0 : index
    %c0_0 = arith.constant 0 : index
    %c0_1 = arith.constant 0 : index
    %0 = vector.load %arg2[%c0, %c0_0, %c0_1] : memref<1x32x896xbf16, #tpu.memory_space<vmem>>, vector<1x32x896xbf16>
    %1 = vector.shape_cast %0 : vector<1x32x896xbf16> to vector<32x896xbf16>
    %c0_2 = arith.constant 0 : index
    %c0_3 = arith.constant 0 : index
    %c0_4 = arith.constant 0 : index
    %2 = vector.load %arg3[%c0_2, %c0_3, %c0_4] : memref<1x896x128xbf16, #tpu.memory_space<vmem>>, vector<1x896x128xbf16>
    %3 = vector.shape_cast %2 : vector<1x896x128xbf16> to vector<896x128xbf16>
    %cst = arith.constant dense<0.000000e+00> : vector<32x128xf32>
    %4 = tpu.matmul %1, %3, %cst {dimension_numbers = #tpu.dot_dimension_numbers<[1], [0], [0], [1], [0, 0, 1, 1], [], []>} : vector<32x896xbf16>, vector<896x128xbf16>, vector<32x128xf32> -> vector<32x128xf32>
    %c0_5 = arith.constant 0 : index
    %c0_6 = arith.constant 0 : index
    %c0_7 = arith.constant 0 : index
    %5 = vector.load %arg4[%c0_5, %c0_6, %c0_7] : memref<1x1x128xf32, #tpu.memory_space<vmem>>, vector<1x1x128xf32>
    %6 = vector.shape_cast %5 : vector<1x1x128xf32> to vector<1x128xf32>
    %7 = vector.broadcast %6 : vector<1x128xf32> to vector<32x128xf32>
    %8 = arith.addf %4, %7 : vector<32x128xf32>
    %c0_8 = arith.constant 0 : index
    %c0_9 = arith.constant 0 : index
    %c0_10 = arith.constant 0 : index
    %9 = vector.load %arg5[%c0_8, %c0_9, %c0_10] : memref<1x32x128xf32, #tpu.memory_space<vmem>>, vector<1x32x128xf32>
    %10 = vector.shape_cast %9 : vector<1x32x128xf32> to vector<32x128xf32>
    %11 = vector.shape_cast %8 : vector<32x128xf32> to vector<1x32x128xf32>
    tpu.vector_store %arg5[%c0_8, %c0_9, %c0_10], %11 {strides = array<i32>} : memref<1x32x128xf32, #tpu.memory_space<vmem>>, vector<1x32x128xf32>,
    return
  }
  func.func @transform_0(%arg0: i32, %arg1: i32) -> (i32, i32, i32) {
    %c0_i32 = arith.constant 0 : i32
    %c0_i32_0 = arith.constant 0 : i32
    return %arg0, %arg1, %c0_i32 : i32, i32, i32
  }
  func.func @transform_1(%arg0: i32, %arg1: i32) -> (i32, i32, i32) {
    %c0_i32 = arith.constant 0 : i32
    %c0_i32_0 = arith.constant 0 : i32
    %c0_i32_1 = arith.constant 0 : i32
    return %arg0, %c0_i32, %c0_i32_0 : i32, i32, i32
  }
  func.func @transform_2(%arg0: i32, %arg1: i32) -> (i32, i32, i32) {
    %c0_i32 = arith.constant 0 : i32
    %c0_i32_0 = arith.constant 0 : i32
    %c0_i32_1 = arith.constant 0 : i32
    return %arg0, %c0_i32, %c0_i32_0 : i32, i32, i32
  }
  func.func @transform_3(%arg0: i32, %arg1: i32) -> (i32, i32, i32) {
    %c0_i32 = arith.constant 0 : i32
    %c0_i32_0 = arith.constant 0 : i32
    return %arg0, %arg1, %c0_i32 : i32, i32, i32
  }
}

</mosaic_0001>

<bundles_post_ra>
// kernel: discriminator_b_forward.7
= control target key start
LH: loop header
LB: loop body
LE: loop exit
PB: predicated region body
PF: predicated region fallthrough
CT: control target
= control target key end

     0   :  { %s278_s1 = inlined_call_operand.vmem [shape: f32[128,256], index: 1, kind: input, shape index: {}]   ;;  %s279_s0 = inlined_call_operand.vmem [shape: f32[24,128], index: 0, kind: input, shape index: {}]   ;;  %s280_s2 = inlined_call_operand.vmem [shape: f32[24,256], index: 2, kind: output, shape index: {}]  }
   0x1   :  { %v44_v0 = vld [vmem:[%s278_s1 + $0xf0] sm:$0xff]  ;;  %v45_v1 = vld [vmem:[%s278_s1 + $0xf8] sm:$0xff]  ;;  %v42_v2 = vld [vmem:[%s278_s1 + $0xe0] sm:$0xff] }
   0x2   :  { %108 = vmatpush.msra.mxu2 %v44_v0  ;;  %124 = vmatpush.msra.mxu3 %v45_v1  ;;  %v43_v3 = vld [vmem:[%s278_s1 + $0xe8] sm:$0xff]  ;;  %v40_v4 = vld [vmem:[%s278_s1 + $0xd0] sm:$0xff]  ;;  %v41_v5 = vld [vmem:[%s278_s1 + $0xd8] sm:$0xff] }
   0x3   :  { %46 = vmatpush.msra.mxu0 %v44_v0  ;;  %72 = vmatpush.msra.mxu1 %v45_v1  ;;  %v38_v6 = vld [vmem:[%s278_s1 + $0xc0] sm:$0xff]  ;;  %v39_v7 = vld [vmem:[%s278_s1 + $0xc8] sm:$0xff]  ;;  %v36_v8 = vld [vmem:[%s278_s1 + $0xb0] sm:$0xff] }
   0x4   :  { %109 = vmatpush.msra.mxu2 %v42_v2  ;;  %125 = vmatpush.msra.mxu3 %v43_v3  ;;  %v37_v9 = vld [vmem:[%s278_s1 + $0xb8] sm:$0xff]  ;;  %v34_v10 = vld [vmem:[%s278_s1 + $0xa0] sm:$0xff]  ;;  %v35_v11 = vld [vmem:[%s278_s1 + $0xa8] sm:$0xff] }
   0x5   :  { %47 = vmatpush.msra.mxu0 %v42_v2  ;;  %73 = vmatpush.msra.mxu1 %v43_v3  ;;  %v32_v12 = vld [vmem:[%s278_s1 + $0x90] sm:$0xff]  ;;  %v33_v13 = vld [vmem:[%s278_s1 + $0x98] sm:$0xff]  ;;  %v30_v14 = vld [vmem:[%s278_s1 + $0x80] sm:$0xff] }
   0x6   :  { %110 = vmatpush.msra.mxu2 %v40_v4  ;;  %126 = vmatpush.msra.mxu3 %v41_v5  ;;  %v31_v15 = vld [vmem:[%s278_s1 + $0x88] sm:$0xff]  ;;  %v28_v16 = vld [vmem:[%s278_s1 + $0x70] sm:$0xff]  ;;  %v29_v17 = vld [vmem:[%s278_s1 + $0x78] sm:$0xff] }
   0x7   :  { %48 = vmatpush.msra.mxu0 %v40_v4  ;;  %74 = vmatpush.msra.mxu1 %v41_v5  ;;  %v26_v18 = vld [vmem:[%s278_s1 + $0x60] sm:$0xff]  ;;  %v27_v19 = vld [vmem:[%s278_s1 + $0x68] sm:$0xff]  ;;  %v24_v20 = vld [vmem:[%s278_s1 + $0x50] sm:$0xff] }
   0x8   :  { %111 = vmatpush.msra.mxu2 %v38_v6  ;;  %127 = vmatpush.msra.mxu3 %v39_v7  ;;  %v25_v21 = vld [vmem:[%s278_s1 + $0x58] sm:$0xff]  ;;  %v22_v22 = vld [vmem:[%s278_s1 + $0x40] sm:$0xff]  ;;  %v23_v23 = vld [vmem:[%s278_s1 + $0x48] sm:$0xff] }
   0x9   :  { %49 = vmatpush.msra.mxu0 %v38_v6  ;;  %75 = vmatpush.msra.mxu1 %v39_v7  ;;  %v20_v24 = vld [vmem:[%s278_s1 + $0x30] sm:$0xff]  ;;  %v21_v25 = vld [vmem:[%s278_s1 + $0x38] sm:$0xff]  ;;  %v18_v26 = vld [vmem:[%s278_s1 + $0x20] sm:$0xff] }
   0xa   :  { %112 = vmatpush.msra.mxu2 %v36_v8  ;;  %128 = vmatpush.msra.mxu3 %v37_v9  ;;  %v19_v27 = vld [vmem:[%s278_s1 + $0x28] sm:$0xff]  ;;  %v16_v28 = vld [vmem:[%s278_s1 + $0x10] sm:$0xff]  ;;  %v17_v29 = vld [vmem:[%s278_s1 + $0x18] sm:$0xff] }
   0xb   :  { %50 = vmatpush.msra.mxu0 %v36_v8  ;;  %76 = vmatpush.msra.mxu1 %v37_v9  ;;  %v14_v30 = vld [vmem:[%s278_s1] sm:$0xff]  ;;  %v15_v31 = vld [vmem:[%s278_s1 + $0x8] sm:$0xff]  ;;  %v13_v34 = vld [vmem:[%s279_s0 + $0x10] sm:$0xff] }
   0xc   :  { %113 = vmatpush.msra.mxu2 %v34_v10  ;;  %129 = vmatpush.msra.mxu3 %v35_v11  ;;  %v12_v32 = vld [vmem:[%s279_s0 + $0x8] sm:$0xff]  ;;  %v11_v33 = vld [vmem:[%s279_s0] sm:$0xff] }
   0xd   :  { %51 = vmatpush.msra.mxu0 %v34_v10  ;;  %77 = vmatpush.msra.mxu1 %v35_v11 }
   0xe   :  { %114 = vmatpush.msra.mxu2 %v32_v12  ;;  %130 = vmatpush.msra.mxu3 %v33_v13 }
   0xf   :  { %52 = vmatpush.msra.mxu0 %v32_v12  ;;  %78 = vmatpush.msra.mxu1 %v33_v13 }
  0x10   :  { %115 = vmatpush.msra.mxu2 %v30_v14  ;;  %131 = vmatpush.msra.mxu3 %v31_v15 }
  0x11   :  { %53 = vmatpush.msra.mxu0 %v30_v14  ;;  %79 = vmatpush.msra.mxu1 %v31_v15 }
  0x12   :  { %116 = vmatpush.msra.mxu2 %v28_v16  ;;  %132 = vmatpush.msra.mxu3 %v29_v17 }
  0x13   :  { %54 = vmatpush.msra.mxu0 %v28_v16  ;;  %80 = vmatpush.msra.mxu1 %v29_v17 }
  0x14   :  { %117 = vmatpush.msra.mxu2 %v26_v18  ;;  %133 = vmatpush.msra.mxu3 %v27_v19 }
  0x15   :  { %55 = vmatpush.msra.mxu0 %v26_v18  ;;  %81 = vmatpush.msra.mxu1 %v27_v19 }
  0x16   :  { %118 = vmatpush.msra.mxu2 %v24_v20  ;;  %134 = vmatpush.msra.mxu3 %v25_v21 }
  0x17   :  { %56 = vmatpush.msra.mxu0 %v24_v20  ;;  %82 = vmatpush.msra.mxu1 %v25_v21 }
  0x18   :  { %119 = vmatpush.msra.mxu2 %v22_v22  ;;  %135 = vmatpush.msra.mxu3 %v23_v23 }
  0x19   :  { %57 = vmatpush.msra.mxu0 %v22_v22  ;;  %83 = vmatpush.msra.mxu1 %v23_v23 }
  0x1a   :  { %120 = vmatpush.msra.mxu2 %v20_v24  ;;  %136 = vmatpush.msra.mxu3 %v21_v25 }
  0x1b   :  { %58 = vmatpush.msra.mxu0 %v20_v24  ;;  %84 = vmatpush.msra.mxu1 %v21_v25 }
  0x1c   :  { %121 = vmatpush.msra.mxu2 %v18_v26  ;;  %137 = vmatpush.msra.mxu3 %v19_v27 }
  0x1d   :  { %59 = vmatpush.msra.mxu0 %v18_v26  ;;  %85 = vmatpush.msra.mxu1 %v19_v27 }
  0x1e   :  { %122 = vmatpush.msra.mxu2 %v16_v28  ;;  %138 = vmatpush.msra.mxu3 %v17_v29 }
  0x1f   :  { %60 = vmatpush.msra.mxu0 %v16_v28  ;;  %86 = vmatpush.msra.mxu1 %v17_v29 }
  0x20   :  { %123 = vmatpush.msra.mxu2 %v14_v30  ;;  %139 = vmatpush.msra.mxu3 %v15_v31 }
  0x21   :  { %65 = vmatmul.f32.vlgmr.msra.gmra.mxu2 %v12_v32  ;;  %91 = vmatmul.f32.vlgmr.msra.gmra.mxu3 %v12_v32 }
  0x22   :  { %61 = vmatpush.msra.mxu0 %v14_v30  ;;  %87 = vmatpush.msra.mxu1 %v15_v31 }
  0x23   :  { %62 = vmatmul.f32.vlgmr.msra.gmra.mxu0 %v11_v33  ;;  %88 = vmatmul.f32.vlgmr.msra.gmra.mxu1 %v11_v33 }
  0x29   :  { %68 = vmatmul.f32.gmra.mxu2 %v13_v34  ;;  %94 = vmatmul.f32.gmra.mxu3 %v13_v34 }
  0xa0   :  { %v63_v35 = vpop.f32.mrf.mxu0  ;;  %v89_v36 = vpop.f32.mrf.mxu1 }
  0xa1   :  { %98 = vst [vmem:[%s280_s2] sm:$0xff] %v63_v35 }
  0xa2   :  { %99 = vst [vmem:[%s280_s2 + $0x8] sm:$0xff] %v89_v36 }
  0xa4   :  { %v66_v37 = vpop.f32.mrf.mxu2  ;;  %v92_v38 = vpop.f32.mrf.mxu3 }
  0xa5   :  { %100 = vst [vmem:[%s280_s2 + $0x10] sm:$0xff] %v66_v37 }
  0xa6   :  { %101 = vst [vmem:[%s280_s2 + $0x18] sm:$0xff] %v92_v38 }
  0xac   :  { %v69_v39 = vpop.f32.mrf.mxu2  ;;  %v95_v40 = vpop.f32.mrf.mxu3 }
  0xad   :  { %102 = vst [vmem:[%s280_s2 + $0x20] sm:$0xff] %v69_v39 }
  0xae   :  { %103 = vst [vmem:[%s280_s2 + $0x28] sm:$0xff] %v95_v40 }

// kernel: discriminator_b_forward.8
= control target key start
LH: loop header
LB: loop body
LE: loop exit
PB: predicated region body
PF: predicated region fallthrough
CT: control target
= control target key end

     0   :  { %s1249_s12 = smov 0   ;;  %s1251_s13 = smov 0   ;;  %s1422_s0 = inlined_call_operand.vmem [shape: bf16[5,32,256], index: 0, kind: input, shape index: {}]   ;;  %s1423_s1 = inlined_call_operand.vmem [shape: bf16[5,256,384], index: 1, kind: input, shape index: {}]   ;;  %s1424_s2 = inlined_call_operand.vmem [shape: f32[5,1,384], index: 2, kind: input, shape index: {}]   ;;  %s1425_s3 = inlined_call_operand.vmem [shape: bf16[5,32,384], index: 3, kind: output, shape index: {}]  }
   0x1   :  { %s1253_s14 = smov 0  }
   0x2 LB: > { %s25_s15 = sadd.s32 1, %s1223_s13  ;;  %p894_p0 = scmp.ge.s32.totalorder %s1227_s14, 1  ;;  %s1227_s14 = sphi %s1253_s14, %s13_s14   ;;  %s1223_s13 = sphi %s1251_s13, %s1427_s13   ;;  %s1219_s12 = sphi %s1249_s12, %s1426_s12  }
   0x3   : > { %p27_p1 = scmp.ge.s32.totalorder %s25_s15, 5  ;;  %p178_p2 = scmp.lt.s32.totalorder %s1227_s14, 6 }
   0x5   : > { %s1429_s15 = smov (%p27_p1, %s25_s15), 0  ;;  %p179_p3 = pnand %p894_p0, %p178_p2 }
   0x6   : > { %p222_p4 = scmp.lt.s32.totalorder (!%p179_p3), %s1219_s12, 4 }
   0x7   : > { %182 = sbr.rel (%p179_p3) target bundleno = 233 (0xe9), region = 32 }
   0xc   : > { %s1431_s12 = smov (!%p222_p4, %s1219_s12), 4 }
   0xd   : > { %s1178_s16 = smul.u32 384, %s1431_s12  ;;  %s1109_s20 = sshll.u32 %s1431_s12, 5 }
   0xe   : > { %s1337_s23 = scalar_lea.vmem %s1422_s0, %s1109_s20  ;;  %s1179_s24 = smul.u32 3, %s1431_s12 }
   0xf   : > { %s1273_s19 = scalar_lea.vmem %s1423_s1, %s1178_s16  ;;  %s1180_s28 = smul.u32 48, %s1431_s12 }
  0x10   : > { %v1001_v0 = vld [vmem:[%s1273_s19 + $0xa8] sm:$0xf]  ;;  %v1136_v1 = vld [vmem:[%s1273_s19 + $0xb0] sm:$0xf0]  ;;  %v1135_v5 = vld [vmem:[%s1273_s19 + $0xac] sm:$0xf]  ;;  %s240_s27 = scalar_lea.vmem %s1424_s2, %s1179_s24 }
  0x11   : > { %v1097_v2 = vld [vmem:[%s1273_s19 + $0x168] sm:$0xf]  ;;  %v1002_v3 = vor.u32 %v1136_v1, %v1001_v0  ;;  %v1160_v4 = vld [vmem:[%s1273_s19 + $0x170] sm:$0xf0]  ;;  %v1003_v6 = vld [vmem:[%s1273_s19 + $0xb4] sm:$0xf0]  ;;  %s1403_s4 = scalar_lea.vmem %s1425_s3, %s1180_s28 }
  0x12   : > { %v1098_v7 = vor.u32 %v1160_v4, %v1097_v2  ;;  %v1006_v8 = vor.u32 %v1135_v5, %v1003_v6  ;;  %v1159_v9 = vld [vmem:[%s1273_s19 + $0x16c] sm:$0xf]  ;;  %v1099_v10 = vld [vmem:[%s1273_s19 + $0x174] sm:$0xf0]  ;;  %v989_v11 = vld [vmem:[%s1273_s19 + $0x90] sm:$0xf] }
  0x13   : > { %604 = vmatpush.bf16.msra.mxu0 %v1002_v3  ;;  %v1102_v12 = vor.u32 %v1159_v9, %v1099_v10  ;;  %v1133_v13 = vld [vmem:[%s1273_s19 + $0x98] sm:$0xf0]  ;;  %v1085_v14 = vld [vmem:[%s1273_s19 + $0x150] sm:$0xf]  ;;  %v1132_v18 = vld [vmem:[%s1273_s19 + $0x94] sm:$0xf] }
  0x14   : > { %v1157_v15 = vld [vmem:[%s1273_s19 + $0x158] sm:$0xf0]  ;;  %623 = vmatpush.bf16.msra.mxu1 %v1098_v7  ;;  %642 = vmatpush.bf16.msra.mxu2 %v1006_v8  ;;  %v990_v16 = vor.u32 %v1133_v13, %v989_v11  ;;  %v991_v19 = vld [vmem:[%s1273_s19 + $0x9c] sm:$0xf0]  ;;  %v1156_v20 = vld [vmem:[%s1273_s19 + $0x154] sm:$0xf] }
  0x15   : > { %v1086_v17 = vor.u32 %v1157_v15, %v1085_v14  ;;  %661 = vmatpush.bf16.msra.mxu3 %v1102_v12  ;;  %v994_v21 = vor.u32 %v1132_v18, %v991_v19  ;;  %v1087_v22 = vld [vmem:[%s1273_s19 + $0x15c] sm:$0xf0]  ;;  %v977_v23 = vld [vmem:[%s1273_s19 + $0x78] sm:$0xf]  ;;  %v1130_v24 = vld [vmem:[%s1273_s19 + $0x80] sm:$0xf0] }
  0x16   : > { %v1090_v25 = vor.u32 %v1156_v20, %v1087_v22  ;;  %v1073_v26 = vld [vmem:[%s1273_s19 + $0x138] sm:$0xf]  ;;  %v1154_v27 = vld [vmem:[%s1273_s19 + $0x140] sm:$0xf0]  ;;  %v1129_v28 = vld [vmem:[%s1273_s19 + $0x7c] sm:$0xf]  ;;  %v978_v29 = vor.u32 %v1130_v24, %v977_v23 }
  0x17   : > { %605 = vmatpush.bf16.msra.mxu0 %v990_v16  ;;  %v979_v30 = vld [vmem:[%s1273_s19 + $0x84] sm:$0xf0]  ;;  %v1153_v31 = vld [vmem:[%s1273_s19 + $0x13c] sm:$0xf]  ;;  %v1074_v33 = vor.u32 %v1154_v27, %v1073_v26  ;;  %v965_v35 = vld [vmem:[%s1273_s19 + $0x60] sm:$0xf] }
  0x18   : > { %v1075_v32 = vld [vmem:[%s1273_s19 + $0x144] sm:$0xf0]  ;;  %624 = vmatpush.bf16.msra.mxu1 %v1086_v17  ;;  %643 = vmatpush.bf16.msra.mxu2 %v994_v21  ;;  %v982_v34 = vor.u32 %v1129_v28, %v979_v30  ;;  %v1127_v36 = vld [vmem:[%s1273_s19 + $0x68] sm:$0xf0]  ;;  %v1061_v37 = vld [vmem:[%s1273_s19 + $0x120] sm:$0xf] }
  0x19   : > { %662 = vmatpush.bf16.msra.mxu3 %v1090_v25  ;;  %v1078_v38 = vor.u32 %v1153_v31, %v1075_v32  ;;  %v1151_v39 = vld [vmem:[%s1273_s19 + $0x128] sm:$0xf0]  ;;  %v1126_v40 = vld [vmem:[%s1273_s19 + $0x64] sm:$0xf]  ;;  %v967_v41 = vld [vmem:[%s1273_s19 + $0x6c] sm:$0xf0]  ;;  %v966_v44 = vor.u32 %v1127_v36, %v965_v35 }
  0x1a   : > { %v1150_v42 = vld [vmem:[%s1273_s19 + $0x124] sm:$0xf]  ;;  %v1063_v43 = vld [vmem:[%s1273_s19 + $0x12c] sm:$0xf0]  ;;  %v1062_v45 = vor.u32 %v1151_v39, %v1061_v37  ;;  %v970_v46 = vor.u32 %v1126_v40, %v967_v41  ;;  %v953_v47 = vld [vmem:[%s1273_s19 + $0x48] sm:$0xf] }
  0x1b   : > { %606 = vmatpush.bf16.msra.mxu0 %v978_v29  ;;  %v1124_v48 = vld [vmem:[%s1273_s19 + $0x50] sm:$0xf0]  ;;  %v1049_v49 = vld [vmem:[%s1273_s19 + $0x108] sm:$0xf]  ;;  %v1066_v50 = vor.u32 %v1150_v42, %v1063_v43  ;;  %v1123_v52 = vld [vmem:[%s1273_s19 + $0x4c] sm:$0xf] }
  0x1c   : > { %625 = vmatpush.bf16.msra.mxu1 %v1074_v33  ;;  %644 = vmatpush.bf16.msra.mxu2 %v982_v34  ;;  %v1148_v51 = vld [vmem:[%s1273_s19 + $0x110] sm:$0xf0]  ;;  %v955_v53 = vld [vmem:[%s1273_s19 + $0x54] sm:$0xf0]  ;;  %v1147_v54 = vld [vmem:[%s1273_s19 + $0x10c] sm:$0xf]  ;;  %v954_v56 = vor.u32 %v1124_v48, %v953_v47 }
  0x1d   : > { %663 = vmatpush.bf16.msra.mxu3 %v1078_v38  ;;  %v1051_v55 = vld [vmem:[%s1273_s19 + $0x114] sm:$0xf0]  ;;  %v1050_v57 = vor.u32 %v1148_v51, %v1049_v49  ;;  %v958_v58 = vor.u32 %v1123_v52, %v955_v53  ;;  %v941_v59 = vld [vmem:[%s1273_s19 + $0x30] sm:$0xf]  ;;  %v1121_v60 = vld [vmem:[%s1273_s19 + $0x38] sm:$0xf0] }
  0x1e   : > { %v1037_v61 = vld [vmem:[%s1273_s19 + $0xf0] sm:$0xf]  ;;  %v1054_v62 = vor.u32 %v1147_v54, %v1051_v55  ;;  %v1145_v63 = vld [vmem:[%s1273_s19 + $0xf8] sm:$0xf0]  ;;  %v1120_v0 = vld [vmem:[%s1273_s19 + $0x34] sm:$0xf]  ;;  %v942_v4 = vor.u32 %v1121_v60, %v941_v59 }
  0x1f   : > { %607 = vmatpush.bf16.msra.mxu0 %v966_v44  ;;  %v943_v1 = vld [vmem:[%s1273_s19 + $0x3c] sm:$0xf0]  ;;  %v1144_v2 = vld [vmem:[%s1273_s19 + $0xf4] sm:$0xf]  ;;  %v1038_v5 = vor.u32 %v1145_v63, %v1037_v61  ;;  %v929_v7 = vld [vmem:[%s1273_s19 + $0x18] sm:$0xf] }
  0x20   : > { %626 = vmatpush.bf16.msra.mxu1 %v1062_v45  ;;  %645 = vmatpush.bf16.msra.mxu2 %v970_v46  ;;  %v1039_v3 = vld [vmem:[%s1273_s19 + $0xfc] sm:$0xf0]  ;;  %v946_v6 = vor.u32 %v1120_v0, %v943_v1  ;;  %v1118_v8 = vld [vmem:[%s1273_s19 + $0x20] sm:$0xf0]  ;;  %v1025_v9 = vld [vmem:[%s1273_s19 + $0xd8] sm:$0xf] }
  0x21   : > { %664 = vmatpush.bf16.msra.mxu3 %v1066_v50  ;;  %v1042_v10 = vor.u32 %v1144_v2, %v1039_v3  ;;  %v1142_v11 = vld [vmem:[%s1273_s19 + $0xe0] sm:$0xf0]  ;;  %v1117_v12 = vld [vmem:[%s1273_s19 + $0x1c] sm:$0xf]  ;;  %v931_v13 = vld [vmem:[%s1273_s19 + $0x24] sm:$0xf0]  ;;  %v930_v16 = vor.u32 %v1118_v8, %v929_v7 }
  0x22   : > { %v1141_v14 = vld [vmem:[%s1273_s19 + $0xdc] sm:$0xf]  ;;  %v1027_v15 = vld [vmem:[%s1273_s19 + $0xe4] sm:$0xf0]  ;;  %v917_v17 = vld [vmem:[%s1273_s19] sm:$0xf]  ;;  %v1026_v19 = vor.u32 %v1142_v11, %v1025_v9  ;;  %v934_v20 = vor.u32 %v1117_v12, %v931_v13 }
  0x23   : > { %608 = vmatpush.bf16.msra.mxu0 %v954_v56  ;;  %v1115_v18 = vld [vmem:[%s1273_s19 + $0x8] sm:$0xf0]  ;;  %v1013_v21 = vld [vmem:[%s1273_s19 + $0xc0] sm:$0xf]  ;;  %v1114_v23 = vld [vmem:[%s1273_s19 + $0x4] sm:$0xf]  ;;  %v1030_v24 = vor.u32 %v1141_v14, %v1027_v15 }
  0x24   : > { %627 = vmatpush.bf16.msra.mxu1 %v1050_v57  ;;  %646 = vmatpush.bf16.msra.mxu2 %v958_v58  ;;  %v1139_v22 = vld [vmem:[%s1273_s19 + $0xc8] sm:$0xf0]  ;;  %v919_v25 = vld [vmem:[%s1273_s19 + $0xc] sm:$0xf0]  ;;  %v1138_v26 = vld [vmem:[%s1273_s19 + $0xc4] sm:$0xf]  ;;  %v918_v31 = vor.u32 %v1115_v18, %v917_v17 }
  0x25   : > { %665 = vmatpush.bf16.msra.mxu3 %v1054_v62  ;;  %v1015_v27 = vld [vmem:[%s1273_s19 + $0xcc] sm:$0xf0]  ;;  %v901_v28 = vld [vmem:[%s1337_s23] sm:$0xf]  ;;  %v1137_v30 = vld [vmem:[%s1273_s19 + $0xb8] sm:$0xf0]  ;;  %v1014_v35 = vor.u32 %v1139_v22, %v1013_v21  ;;  %v922_v36 = vor.u32 %v1114_v23, %v919_v25 }
  0x26   : > { %v1009_v29 = vld [vmem:[%s1273_s19 + $0xb0] sm:$0xf]  ;;  %v1111_v32 = vld [vmem:[%s1337_s23 + $0x4] sm:$0xf0]  ;;  %v1161_v34 = vld [vmem:[%s1273_s19 + $0x178] sm:$0xf0]  ;;  %v1018_v39 = vor.u32 %v1138_v26, %v1015_v27 }
  0x27   : > { %609 = vmatpush.bf16.msra.mxu0 %v942_v4  ;;  %v1105_v33 = vld [vmem:[%s1273_s19 + $0x170] sm:$0xf]  ;;  %v1110_v37 = vld [vmem:[%s1337_s23 + $0x4] sm:$0xf]  ;;  %v903_v38 = vld [vmem:[%s1337_s23 + $0x8] sm:$0xf0]  ;;  %v1010_v40 = vor.u32 %v1137_v30, %v1009_v29  ;;  %v1353_v41 = vor.u32 %v1111_v32, %v901_v28 }
  0x28   : > { %628 = vmatpush.bf16.msra.mxu1 %v1038_v5  ;;  %647 = vmatpush.bf16.msra.mxu2 %v946_v6  ;;  %v1106_v42 = vor.u32 %v1161_v34, %v1105_v33  ;;  %v997_v43 = vld [vmem:[%s1273_s19 + $0x98] sm:$0xf]  ;;  %v1134_v44 = vld [vmem:[%s1273_s19 + $0xa0] sm:$0xf0]  ;;  %v1357_v45 = vor.u32 %v1110_v37, %v903_v38  ;;  %v985_v50 = vld [vmem:[%s1273_s19 + $0x80] sm:$0xf] }
  0x29   : > { %666 = vmatpush.bf16.msra.mxu3 %v1042_v10  ;;  %v1093_v46 = vld [vmem:[%s1273_s19 + $0x158] sm:$0xf]  ;;  %v1158_v47 = vld [vmem:[%s1273_s19 + $0x160] sm:$0xf0]  ;;  %v998_v48 = vor.u32 %v1134_v44, %v997_v43  ;;  %v1131_v51 = vld [vmem:[%s1273_s19 + $0x88] sm:$0xf0] }
  0x2a   : > { %v1094_v49 = vor.u32 %v1158_v47, %v1093_v46  ;;  %v1081_v52 = vld [vmem:[%s1273_s19 + $0x140] sm:$0xf]  ;;  %v1155_v53 = vld [vmem:[%s1273_s19 + $0x148] sm:$0xf0]  ;;  %v986_v54 = vor.u32 %v1131_v51, %v985_v50  ;;  %v973_v56 = vld [vmem:[%s1273_s19 + $0x68] sm:$0xf] }
  0x2b   : > { %610 = vmatpush.bf16.msra.mxu0 %v930_v16  ;;  %v1082_v55 = vor.u32 %v1155_v53, %v1081_v52  ;;  %v1128_v57 = vld [vmem:[%s1273_s19 + $0x70] sm:$0xf0]  ;;  %v1069_v58 = vld [vmem:[%s1273_s19 + $0x128] sm:$0xf]  ;;  %v909_v62 = vld [vmem:[%s1337_s23 + $0x10] sm:$0xf] }
  0x2c   : > { %629 = vmatpush.bf16.msra.mxu1 %v1026_v19  ;;  %648 = vmatpush.bf16.msra.mxu2 %v934_v20  ;;  %v1152_v59 = vld [vmem:[%s1273_s19 + $0x130] sm:$0xf0]  ;;  %v974_v60 = vor.u32 %v1128_v57, %v973_v56  ;;  %v961_v63 = vld [vmem:[%s1273_s19 + $0x50] sm:$0xf]  ;;  %v1125_v0 = vld [vmem:[%s1273_s19 + $0x58] sm:$0xf0] }
  0x2d   : > { %667 = vmatpush.bf16.msra.mxu3 %v1030_v24  ;;  %v1070_v61 = vor.u32 %v1152_v59, %v1069_v58  ;;  %v1113_v1 = vld [vmem:[%s1337_s23 + $0x14] sm:$0xf0]  ;;  %v1057_v2 = vld [vmem:[%s1273_s19 + $0x110] sm:$0xf]  ;;  %v1149_v3 = vld [vmem:[%s1273_s19 + $0x118] sm:$0xf0]  ;;  %v962_v6 = vor.u32 %v1125_v0, %v961_v63 }
  0x2e   : > { %v1112_v4 = vld [vmem:[%s1337_s23 + $0x14] sm:$0xf]  ;;  %v911_v5 = vld [vmem:[%s1337_s23 + $0x18] sm:$0xf0]  ;;  %v910_v7 = vor.u32 %v1113_v1, %v909_v62  ;;  %v1058_v8 = vor.u32 %v1149_v3, %v1057_v2  ;;  %v949_v9 = vld [vmem:[%s1273_s19 + $0x38] sm:$0xf] }
  0x2f   : > { %611 = vmatpush.bf16.msra.mxu0 %v918_v31  ;;  %v1122_v10 = vld [vmem:[%s1273_s19 + $0x40] sm:$0xf0]  ;;  %v914_v11 = vor.u32 %v1112_v4, %v911_v5  ;;  %v1045_v12 = vld [vmem:[%s1273_s19 + $0xf8] sm:$0xf]  ;;  %v937_v16 = vld [vmem:[%s1273_s19 + $0x20] sm:$0xf] }
  0x30   : > { %630 = vmatpush.bf16.msra.mxu1 %v1014_v35  ;;  %649 = vmatpush.bf16.msra.mxu2 %v922_v36  ;;  %v1146_v13 = vld [vmem:[%s1273_s19 + $0x100] sm:$0xf0]  ;;  %v950_v14 = vor.u32 %v1122_v10, %v949_v9  ;;  %v1119_v17 = vld [vmem:[%s1273_s19 + $0x28] sm:$0xf0]  ;;  %v1033_v18 = vld [vmem:[%s1273_s19 + $0xe0] sm:$0xf] }
  0x31   : > { %668 = vmatpush.bf16.msra.mxu3 %v1018_v39  ;;  %v1046_v15 = vor.u32 %v1146_v13, %v1045_v12  ;;  %v1143_v19 = vld [vmem:[%s1273_s19 + $0xe8] sm:$0xf0]  ;;  %v938_v20 = vor.u32 %v1119_v17, %v937_v16  ;;  %v925_v22 = vld [vmem:[%s1273_s19 + $0x8] sm:$0xf]  ;;  %v1116_v23 = vld [vmem:[%s1273_s19 + $0x10] sm:$0xf0] }
  0x32   : > { %612 = vmatmul.bf16.vlgmr.msra.gmra.mxu0 %v1353_v41  ;;  %v1034_v21 = vor.u32 %v1143_v19, %v1033_v18  ;;  %v1021_v24 = vld [vmem:[%s1273_s19 + $0xc8] sm:$0xf]  ;;  %v1140_v25 = vld [vmem:[%s1273_s19 + $0xd0] sm:$0xf0]  ;;  %v926_v26 = vor.u32 %v1116_v23, %v925_v22  ;;  %v320_v28 = vld [vmem:[%s240_s27] sm:$0x7] }
  0x33   : > { %631 = vmatmul.bf16.vlgmr.msra.gmra.mxu1 %v1357_v45  ;;  %650 = vmatmul.bf16.vlgmr.msra.gmra.mxu2 %v1353_v41  ;;  %v1022_v27 = vor.u32 %v1140_v25, %v1021_v24  ;;  %v322_v29 = vperm.slane %v320_v28, 0  ;;  %v323_v33 = vperm.slane %v320_v28, 1  ;;  %v324_v9 = vperm.slane %v320_v28, 2 }
  0x34   : > { %1162 = vmatpush.bf16.msrb.mxu2 %v1010_v40  ;;  %699 = vmatpush.bf16.msrb.mxu1 %v1106_v42 }
  0x35   : > { %669 = vmatmul.bf16.vlgmr.msra.gmra.mxu3 %v1357_v45  ;;  %680 = vmatpush.bf16.msrb.mxu0 %v1010_v40 }
  0x36   : > { %1170 = vmatpush.bf16.msrb.mxu3 %v1106_v42 }
  0x38   : > { %1163 = vmatpush.bf16.msrb.mxu2 %v998_v48  ;;  %700 = vmatpush.bf16.msrb.mxu1 %v1094_v49 }
  0x39   : > { %681 = vmatpush.bf16.msrb.mxu0 %v998_v48 }
  0x3a   : > { %1171 = vmatpush.bf16.msrb.mxu3 %v1094_v49 }
  0x3c   : > { %1164 = vmatpush.bf16.msrb.mxu2 %v986_v54  ;;  %701 = vmatpush.bf16.msrb.mxu1 %v1082_v55 }
  0x3d   : > { %682 = vmatpush.bf16.msrb.mxu0 %v986_v54 }
  0x3e   : > { %1172 = vmatpush.bf16.msrb.mxu3 %v1082_v55 }
  0x40   : > { %1165 = vmatpush.bf16.msrb.mxu2 %v974_v60  ;;  %702 = vmatpush.bf16.msrb.mxu1 %v1070_v61 }
  0x41   : > { %683 = vmatpush.bf16.msrb.mxu0 %v974_v60 }
  0x42   : > { %1173 = vmatpush.bf16.msrb.mxu3 %v1070_v61  ;;  %617 = vmatmul.bf16.gmra.mxu0 %v910_v7 }
  0x43   : > { %636 = vmatmul.bf16.gmra.mxu1 %v914_v11  ;;  %655 = vmatmul.bf16.gmra.mxu2 %v910_v7 }
  0x44   : > { %1166 = vmatpush.bf16.msrb.mxu2 %v962_v6  ;;  %703 = vmatpush.bf16.msrb.mxu1 %v1058_v8 }
  0x45   : > { %674 = vmatmul.bf16.gmra.mxu3 %v914_v11  ;;  %684 = vmatpush.bf16.msrb.mxu0 %v962_v6 }
  0x46   : > { %1174 = vmatpush.bf16.msrb.mxu3 %v1058_v8 }
  0x48   : > { %1167 = vmatpush.bf16.msrb.mxu2 %v950_v14  ;;  %704 = vmatpush.bf16.msrb.mxu1 %v1046_v15 }
  0x49   : > { %685 = vmatpush.bf16.msrb.mxu0 %v950_v14 }
  0x4a   : > { %1175 = vmatpush.bf16.msrb.mxu3 %v1046_v15 }
  0x4c   : > { %1168 = vmatpush.bf16.msrb.mxu2 %v938_v20  ;;  %705 = vmatpush.bf16.msrb.mxu1 %v1034_v21 }
  0x4d   : > { %686 = vmatpush.bf16.msrb.mxu0 %v938_v20 }
  0x4e   : > { %1176 = vmatpush.bf16.msrb.mxu3 %v1034_v21 }
  0x50   : > { %1169 = vmatpush.bf16.msrb.mxu2 %v926_v26  ;;  %706 = vmatpush.bf16.msrb.mxu1 %v1022_v27 }
  0x51   : > { %687 = vmatpush.bf16.msrb.mxu0 %v926_v26 }
  0x52   : > { %1177 = vmatpush.bf16.msrb.mxu3 %v1022_v27 }
  0x53   : > { %693 = vmatmul.bf16.vlgmr.msrb.gmra.mxu2 %v910_v7  ;;  %707 = vmatmul.bf16.vlgmr.msrb.gmra.mxu1 %v1357_v45 }
  0x54   : > { %688 = vmatmul.bf16.vlgmr.msrb.gmra.mxu0 %v1353_v41 }
  0x55   : > { %712 = vmatmul.bf16.vlgmr.msrb.gmra.mxu3 %v914_v11 }
  0xaf   : > { %v613_v30 = vpop.f32.mrf.mxu0 }
  0xb0   : > { %v632_v31 = vpop.f32.mrf.mxu1  ;;  %v614_v32 = vadd.f32 %v613_v30, %v322_v29 }
  0xb2   : > { %v633_v34 = vadd.f32 %v632_v31, %v614_v32 }
  0xb4   : > { %v730_v40 = vmul.f32 0.1, %v633_v34  ;;  %vm718_vm0 = vcmp.ge.f32.partialorder %v633_v34, 0.0 }
  0xb6   : > { %v651_v35 = vpop.f32.mrf.mxu2  ;;  %v742_v44 = vsel %vm718_vm0, %v633_v34, %v730_v40 }
  0xb7   : > { %v652_v36 = vadd.f32 %v651_v35, %v323_v33  ;;  %v615_v38 = vpop.f32.mrf.mxu0 }
  0xb8   : > { %v670_v37 = vpop.f32.mrf.mxu3  ;;  %v634_v39 = vpop.f32.mrf.mxu1  ;;  %v616_v42 = vadd.f32 %v615_v38, %v322_v29 }
  0xb9   : > { %v671_v41 = vadd.f32 %v670_v37, %v652_v36 }
  0xba   : > { %v635_v46 = vadd.f32 %v634_v39, %v616_v42 }
  0xbb   : > { %vm719_vm1 = vcmp.ge.f32.partialorder %v671_v41, 0.0  ;;  %v731_v43 = vmul.f32 0.1, %v671_v41 }
  0xbc   : > { %v733_v53 = vmul.f32 0.1, %v635_v46  ;;  %vm721_vm2 = vcmp.ge.f32.partialorder %v635_v46, 0.0 }
  0xbd   : > { %v743_v45 = vsel %vm719_vm1, %v671_v41, %v731_v43 }
  0xbe   : > { %v754_v47 = vpack.c.bf16 %v743_v45, %v742_v44  ;;  %v653_v48 = vpop.f32.mrf.mxu2  ;;  %v745_v57 = vsel %vm721_vm2, %v635_v46, %v733_v53 }
  0xbf   : > { %v654_v49 = vadd.f32 %v653_v48, %v323_v33  ;;  %v618_v51 = vpop.f32.mrf.mxu0 }
  0xc0   : > { %v672_v50 = vpop.f32.mrf.mxu3  ;;  %762 = vst [vmem:[%s1403_s4] sm:$0xff] %v754_v47  ;;  %v637_v52 = vpop.f32.mrf.mxu1  ;;  %v619_v55 = vadd.f32 %v618_v51, %v322_v29 }
  0xc1   : > { %v673_v54 = vadd.f32 %v672_v50, %v654_v49 }
  0xc2   : > { %v638_v59 = vadd.f32 %v637_v52, %v619_v55 }
  0xc3   : > { %vm722_vm3 = vcmp.ge.f32.partialorder %v673_v54, 0.0  ;;  %v734_v56 = vmul.f32 0.1, %v673_v54 }
  0xc4   : > { %v736_v2 = vmul.f32 0.1, %v638_v59  ;;  %vm724_vm4 = vcmp.ge.f32.partialorder %v638_v59, 0.0 }
  0xc5   : > { %v746_v58 = vsel %vm722_vm3, %v673_v54, %v734_v56 }
  0xc6   : > { %v756_v60 = vpack.c.bf16 %v746_v58, %v745_v57  ;;  %v656_v61 = vpop.f32.mrf.mxu2  ;;  %v748_v6 = vsel %vm724_vm4, %v638_v59, %v736_v2 }
  0xc7   : > { %v657_v62 = vadd.f32 %v656_v61, %v323_v33  ;;  %v620_v0 = vpop.f32.mrf.mxu0 }
  0xc8   : > { %v675_v63 = vpop.f32.mrf.mxu3  ;;  %764 = vst [vmem:[%s1403_s4 + $0xc] sm:$0xff] %v756_v60  ;;  %v639_v1 = vpop.f32.mrf.mxu1  ;;  %v621_v4 = vadd.f32 %v620_v0, %v322_v29 }
  0xc9   : > { %v676_v3 = vadd.f32 %v675_v63, %v657_v62 }
  0xca   : > { %v640_v8 = vadd.f32 %v639_v1, %v621_v4 }
  0xcb   : > { %vm725_vm5 = vcmp.ge.f32.partialorder %v676_v3, 0.0  ;;  %v737_v5 = vmul.f32 0.1, %v676_v3 }
  0xcc   : > { %v739_v15 = vmul.f32 0.1, %v640_v8  ;;  %vm727_vm6 = vcmp.ge.f32.partialorder %v640_v8, 0.0 }
  0xcd   : > { %v749_v7 = vsel %vm725_vm5, %v676_v3, %v737_v5 }
  0xce   : > { %v758_v10 = vpack.c.bf16 %v749_v7, %v748_v6  ;;  %v658_v11 = vpop.f32.mrf.mxu2  ;;  %v751_v21 = vsel %vm727_vm6, %v640_v8, %v739_v15 }
  0xcf   : > { %v659_v12 = vadd.f32 %v658_v11, %v323_v33 }
  0xd0   : > { %v677_v13 = vpop.f32.mrf.mxu3  ;;  %766 = vst [vmem:[%s1403_s4 + $0x18] sm:$0xff] %v758_v10  ;;  %v708_v18 = vpop.f32.mrf.mxu1 }
  0xd1   : > { %v689_v14 = vpop.f32.mrf.mxu0  ;;  %v678_v16 = vadd.f32 %v677_v13, %v659_v12 }
  0xd2   : > { %v690_v17 = vadd.f32 %v689_v14, %v324_v9 }
  0xd3   : > { %vm728_vm7 = vcmp.ge.f32.partialorder %v678_v16, 0.0  ;;  %v740_v19 = vmul.f32 0.1, %v678_v16 }
  0xd4   : > { %v709_v20 = vadd.f32 %v708_v18, %v690_v17 }
  0xd5   : > { %v752_v22 = vsel %vm728_vm7, %v678_v16, %v740_v19 }
  0xd6   : > { %vm720_vm8 = vcmp.ge.f32.partialorder %v709_v20, 0.0  ;;  %v732_v23 = vmul.f32 0.1, %v709_v20  ;;  %v760_v24 = vpack.c.bf16 %v752_v22, %v751_v21  ;;  %v694_v25 = vpop.f32.mrf.mxu2 }
  0xd7   : > { %v695_v27 = vadd.f32 %v694_v25, %v324_v9 }
  0xd8   : > { %v744_v26 = vsel %vm720_vm8, %v709_v20, %v732_v23  ;;  %v713_v28 = vpop.f32.mrf.mxu3  ;;  %768 = vst [vmem:[%s1403_s4 + $0x24] sm:$0xff] %v760_v24  ;;  %v710_v33 = vpop.f32.mrf.mxu1 }
  0xd9   : > { %v755_v29 = vpack.c.bf16 %v744_v26, %v744_v26  ;;  %v691_v30 = vpop.f32.mrf.mxu0  ;;  %v714_v31 = vadd.f32 %v713_v28, %v695_v27 }
  0xda   : > { %v692_v32 = vadd.f32 %v691_v30, %v324_v9 }
  0xdb   : > { %763 = vst [vmem:[%s1403_s4 + $0x8] sm:$0xf] %v755_v29  ;;  %vm726_vm9 = vcmp.ge.f32.partialorder %v714_v31, 0.0  ;;  %v738_v34 = vmul.f32 0.1, %v714_v31 }
  0xdc   : > { %v711_v35 = vadd.f32 %v710_v33, %v692_v32 }
  0xdd   : > { %v750_v36 = vsel %vm726_vm9, %v714_v31, %v738_v34 }
  0xde   : > { %vm723_vm10 = vcmp.ge.f32.partialorder %v711_v35, 0.0  ;;  %v735_v37 = vmul.f32 0.1, %v711_v35  ;;  %v759_v38 = vpack.c.bf16 %v750_v36, %v750_v36  ;;  %v696_v39 = vpop.f32.mrf.mxu2 }
  0xdf   : > { %v697_v41 = vadd.f32 %v696_v39, %v324_v9 }
  0xe0   : > { %v747_v40 = vsel %vm723_vm10, %v711_v35, %v735_v37  ;;  %767 = vst [vmem:[%s1403_s4 + $0x20] sm:$0xf] %v759_v38  ;;  %v715_v43 = vpop.f32.mrf.mxu3 }
  0xe1   : > { %v757_v42 = vpack.c.bf16 %v747_v40, %v747_v40  ;;  %v716_v44 = vadd.f32 %v715_v43, %v697_v41 }
  0xe3   : > { %765 = vst [vmem:[%s1403_s4 + $0x14] sm:$0xf] %v757_v42  ;;  %vm729_vm11 = vcmp.ge.f32.partialorder %v716_v44, 0.0  ;;  %v741_v45 = vmul.f32 0.1, %v716_v44 }
  0xe5   : > { %v753_v46 = vsel %vm729_vm11, %v716_v44, %v741_v45 }
  0xe6   : > { %v761_v47 = vpack.c.bf16 %v753_v46, %v753_v46 }
  0xe8   : > { %769 = vst [vmem:[%s1403_s4 + $0x2c] sm:$0xf] %v761_v47 }
  0xe9 PF: > { %s13_s14 = sadd.s32 1, %s1227_s14   ;;  %s1426_s12 = smov %s1223_s13 }
  0xea   : > { %p10_p5 = scmp.ge.s32.totalorder %s13_s14, 7   ;;  %s1427_s13 = smov %s1429_s15 }
  0xec   :  { %12 = sbr.rel (!%p10_p5) target bundleno = 2 (0x2), region = 68 }

// kernel: discriminator_b_forward.9
= control target key start
LH: loop header
LB: loop body
LE: loop exit
PB: predicated region body
PF: predicated region fallthrough
CT: control target
= control target key end

     0   :  { %s4053_s12 = smov 0   ;;  %s4055_s13 = smov 0   ;;  %s4825_s0 = inlined_call_operand.vmem [shape: bf16[5,32,1920], index: 0, kind: input, shape index: {}]   ;;  %s4826_s1 = inlined_call_operand.vmem [shape: bf16[5,1920,256], index: 1, kind: input, shape index: {}]   ;;  %s4827_s2 = inlined_call_operand.vmem [shape: f32[5,1,256], index: 2, kind: input, shape index: {}]   ;;  %s4828_s3 = inlined_call_operand.vmem [shape: bf16[5,32,256], index: 3, kind: output, shape index: {}]  }
   0x1   :  { %s4057_s14 = smov 0  }
   0x2 LB: > { %s25_s15 = sadd.s32 1, %s4027_s13  ;;  %p2608_p0 = scmp.ge.s32.totalorder %s4031_s14, 1  ;;  %s4031_s14 = sphi %s4057_s14, %s13_s14   ;;  %s4027_s13 = sphi %s4055_s13, %s4830_s13   ;;  %s4023_s12 = sphi %s4053_s12, %s4829_s12  }
   0x3   : > { %p27_p1 = scmp.ge.s32.totalorder %s25_s15, 5  ;;  %p178_p2 = scmp.lt.s32.totalorder %s4031_s14, 6 }
   0x5   : > { %s4832_s15 = smov (%p27_p1, %s25_s15), 0  ;;  %p179_p3 = pnand %p2608_p0, %p178_p2 }
   0x6   : > { %p222_p4 = scmp.lt.s32.totalorder (!%p179_p3), %s4023_s12, 4 }
   0x7   : > { %182 = sbr.rel (%p179_p3) target bundleno = 426 (0x1aa), region = 32 }
   0xc   : > { %s4834_s12 = smov (!%p222_p4, %s4023_s12), 4 }
   0xd   : > { %s3984_s16 = smul.u32 1920, %s4834_s12  ;;  %s2611_s24 = sshll.u32 %s4834_s12, 1 }
   0xe   : > { %s3983_s20 = smul.u32 240, %s4834_s12  ;;  %s240_s27 = scalar_lea.vmem %s4827_s2, %s2611_s24 }
   0xf   : > { %s4077_s19 = scalar_lea.vmem %s4826_s1, %s3984_s16  ;;  %s3696_s28 = sshll.u32 %s4834_s12, 5 }
  0x10   : > { %v2792_v0 = vld [vmem:[%s4077_s19 + $0x70] sm:$0xf]  ;;  %v3742_v1 = vld [vmem:[%s4077_s19 + $0x74] sm:$0xf0]  ;;  %v2784_v11 = vld [vmem:[%s4077_s19 + $0x60] sm:$0xf]  ;;  %s4140_s23 = scalar_lea.vmem %s4825_s0, %s3983_s20  ;;  %s4801_s4 = scalar_lea.vmem %s4828_s3, %s3696_s28 }
  0x11   : > { %v2856_v2 = vld [vmem:[%s4077_s19 + $0xf0] sm:$0xf]  ;;  %v2793_v3 = vor.u32 %v3742_v1, %v2792_v0  ;;  %v3758_v4 = vld [vmem:[%s4077_s19 + $0xf4] sm:$0xf0]  ;;  %v3740_v13 = vld [vmem:[%s4077_s19 + $0x64] sm:$0xf0] }
  0x12   : > { %v2920_v5 = vld [vmem:[%s4077_s19 + $0x170] sm:$0xf]  ;;  %v3774_v6 = vld [vmem:[%s4077_s19 + $0x174] sm:$0xf0]  ;;  %v2857_v7 = vor.u32 %v3758_v4, %v2856_v2  ;;  %v2848_v14 = vld [vmem:[%s4077_s19 + $0xe0] sm:$0xf]  ;;  %v2785_v16 = vor.u32 %v3740_v13, %v2784_v11 }
  0x13   : > { %v2921_v8 = vor.u32 %v3774_v6, %v2920_v5  ;;  %v2984_v9 = vld [vmem:[%s4077_s19 + $0x1f0] sm:$0xf]  ;;  %v3790_v10 = vld [vmem:[%s4077_s19 + $0x1f4] sm:$0xf0]  ;;  %1882 = vmatpush.bf16.msra.mxu0 %v2793_v3  ;;  %v3756_v15 = vld [vmem:[%s4077_s19 + $0xe4] sm:$0xf0] }
  0x14   : > { %v2985_v12 = vor.u32 %v3790_v10, %v2984_v9  ;;  %1901 = vmatpush.bf16.msra.mxu1 %v2857_v7  ;;  %v2849_v17 = vor.u32 %v3756_v15, %v2848_v14  ;;  %v2912_v18 = vld [vmem:[%s4077_s19 + $0x160] sm:$0xf]  ;;  %v3772_v19 = vld [vmem:[%s4077_s19 + $0x164] sm:$0xf0]  ;;  %v2776_v23 = vld [vmem:[%s4077_s19 + $0x50] sm:$0xf] }
  0x15   : > { %1920 = vmatpush.bf16.msra.mxu2 %v2921_v8  ;;  %v2976_v20 = vld [vmem:[%s4077_s19 + $0x1e0] sm:$0xf]  ;;  %v2913_v21 = vor.u32 %v3772_v19, %v2912_v18  ;;  %v3788_v22 = vld [vmem:[%s4077_s19 + $0x1e4] sm:$0xf0]  ;;  %v3738_v24 = vld [vmem:[%s4077_s19 + $0x54] sm:$0xf0] }
  0x16   : > { %1939 = vmatpush.bf16.msra.mxu3 %v2985_v12  ;;  %v2977_v25 = vor.u32 %v3788_v22, %v2976_v20  ;;  %v2840_v26 = vld [vmem:[%s4077_s19 + $0xd0] sm:$0xf]  ;;  %v3754_v27 = vld [vmem:[%s4077_s19 + $0xd4] sm:$0xf0]  ;;  %v2777_v29 = vor.u32 %v3738_v24, %v2776_v23  ;;  %v2768_v35 = vld [vmem:[%s4077_s19 + $0x40] sm:$0xf] }
  0x17   : > { %v2904_v28 = vld [vmem:[%s4077_s19 + $0x150] sm:$0xf]  ;;  %1883 = vmatpush.bf16.msra.mxu0 %v2785_v16  ;;  %v3770_v30 = vld [vmem:[%s4077_s19 + $0x154] sm:$0xf0]  ;;  %v2841_v33 = vor.u32 %v3754_v27, %v2840_v26  ;;  %v3736_v36 = vld [vmem:[%s4077_s19 + $0x44] sm:$0xf0] }
  0x18   : > { %v2968_v31 = vld [vmem:[%s4077_s19 + $0x1d0] sm:$0xf]  ;;  %v3786_v32 = vld [vmem:[%s4077_s19 + $0x1d4] sm:$0xf0]  ;;  %1902 = vmatpush.bf16.msra.mxu1 %v2849_v17  ;;  %v2905_v34 = vor.u32 %v3770_v30, %v2904_v28  ;;  %v2832_v37 = vld [vmem:[%s4077_s19 + $0xc0] sm:$0xf]  ;;  %v2769_v44 = vor.u32 %v3736_v36, %v2768_v35 }
  0x19   : > { %1921 = vmatpush.bf16.msra.mxu2 %v2913_v21  ;;  %v2969_v38 = vor.u32 %v3786_v32, %v2968_v31  ;;  %v3752_v39 = vld [vmem:[%s4077_s19 + $0xc4] sm:$0xf0]  ;;  %v2896_v40 = vld [vmem:[%s4077_s19 + $0x140] sm:$0xf]  ;;  %v2760_v47 = vld [vmem:[%s4077_s19 + $0x30] sm:$0xf] }
  0x1a   : > { %1940 = vmatpush.bf16.msra.mxu3 %v2977_v25  ;;  %v3768_v41 = vld [vmem:[%s4077_s19 + $0x144] sm:$0xf0]  ;;  %v2960_v42 = vld [vmem:[%s4077_s19 + $0x1c0] sm:$0xf]  ;;  %v2833_v45 = vor.u32 %v3752_v39, %v2832_v37  ;;  %v3734_v48 = vld [vmem:[%s4077_s19 + $0x34] sm:$0xf0] }
  0x1b   : > { %v3784_v43 = vld [vmem:[%s4077_s19 + $0x1c4] sm:$0xf0]  ;;  %1884 = vmatpush.bf16.msra.mxu0 %v2777_v29  ;;  %v2897_v46 = vor.u32 %v3768_v41, %v2896_v40  ;;  %v2824_v49 = vld [vmem:[%s4077_s19 + $0xb0] sm:$0xf]  ;;  %v3750_v51 = vld [vmem:[%s4077_s19 + $0xb4] sm:$0xf0]  ;;  %v2761_v56 = vor.u32 %v3734_v48, %v2760_v47 }
  0x1c   : > { %1903 = vmatpush.bf16.msra.mxu1 %v2841_v33  ;;  %v2961_v50 = vor.u32 %v3784_v43, %v2960_v42  ;;  %v2888_v52 = vld [vmem:[%s4077_s19 + $0x130] sm:$0xf]  ;;  %v3766_v53 = vld [vmem:[%s4077_s19 + $0x134] sm:$0xf0]  ;;  %v2825_v57 = vor.u32 %v3750_v51, %v2824_v49  ;;  %v2752_v59 = vld [vmem:[%s4077_s19 + $0x20] sm:$0xf] }
  0x1d   : > { %1922 = vmatpush.bf16.msra.mxu2 %v2905_v34  ;;  %v2952_v54 = vld [vmem:[%s4077_s19 + $0x1b0] sm:$0xf]  ;;  %v3782_v55 = vld [vmem:[%s4077_s19 + $0x1b4] sm:$0xf0]  ;;  %v2889_v58 = vor.u32 %v3766_v53, %v2888_v52  ;;  %v3732_v60 = vld [vmem:[%s4077_s19 + $0x24] sm:$0xf0] }
  0x1e   : > { %1941 = vmatpush.bf16.msra.mxu3 %v2969_v38  ;;  %v2816_v61 = vld [vmem:[%s4077_s19 + $0xa0] sm:$0xf]  ;;  %v2953_v62 = vor.u32 %v3782_v55, %v2952_v54  ;;  %v3748_v63 = vld [vmem:[%s4077_s19 + $0xa4] sm:$0xf0]  ;;  %v2753_v4 = vor.u32 %v3732_v60, %v2752_v59  ;;  %v2744_v7 = vld [vmem:[%s4077_s19 + $0x10] sm:$0xf] }
  0x1f   : > { %1885 = vmatpush.bf16.msra.mxu0 %v2769_v44  ;;  %v2880_v0 = vld [vmem:[%s4077_s19 + $0x120] sm:$0xf]  ;;  %v3764_v1 = vld [vmem:[%s4077_s19 + $0x124] sm:$0xf0]  ;;  %v2817_v5 = vor.u32 %v3748_v63, %v2816_v61  ;;  %v3730_v8 = vld [vmem:[%s4077_s19 + $0x14] sm:$0xf0] }
  0x20   : > { %1904 = vmatpush.bf16.msra.mxu1 %v2833_v45  ;;  %v2944_v2 = vld [vmem:[%s4077_s19 + $0x1a0] sm:$0xf]  ;;  %v3780_v3 = vld [vmem:[%s4077_s19 + $0x1a4] sm:$0xf0]  ;;  %v2881_v6 = vor.u32 %v3764_v1, %v2880_v0  ;;  %v2808_v9 = vld [vmem:[%s4077_s19 + $0x90] sm:$0xf]  ;;  %v2745_v17 = vor.u32 %v3730_v8, %v2744_v7 }
  0x21   : > { %1923 = vmatpush.bf16.msra.mxu2 %v2897_v46  ;;  %v2945_v10 = vor.u32 %v3780_v3, %v2944_v2  ;;  %v3746_v11 = vld [vmem:[%s4077_s19 + $0x94] sm:$0xf0]  ;;  %v2872_v12 = vld [vmem:[%s4077_s19 + $0x110] sm:$0xf]  ;;  %v2736_v16 = vld [vmem:[%s4077_s19] sm:$0xf] }
  0x22   : > { %1942 = vmatpush.bf16.msra.mxu3 %v2961_v50  ;;  %v3762_v13 = vld [vmem:[%s4077_s19 + $0x114] sm:$0xf0]  ;;  %v2936_v14 = vld [vmem:[%s4077_s19 + $0x190] sm:$0xf]  ;;  %v3728_v18 = vld [vmem:[%s4077_s19 + $0x4] sm:$0xf0]  ;;  %v2809_v21 = vor.u32 %v3746_v11, %v2808_v9 }
  0x23   : > { %1886 = vmatpush.bf16.msra.mxu0 %v2761_v56  ;;  %v3778_v15 = vld [vmem:[%s4077_s19 + $0x194] sm:$0xf0]  ;;  %v2800_v19 = vld [vmem:[%s4077_s19 + $0x80] sm:$0xf]  ;;  %v3744_v20 = vld [vmem:[%s4077_s19 + $0x84] sm:$0xf0]  ;;  %v2873_v22 = vor.u32 %v3762_v13, %v2872_v12  ;;  %v2737_v34 = vor.u32 %v3728_v18, %v2736_v16 }
  0x24   : > { %1905 = vmatpush.bf16.msra.mxu1 %v2825_v57  ;;  %v2864_v23 = vld [vmem:[%s4077_s19 + $0x100] sm:$0xf]  ;;  %v3760_v24 = vld [vmem:[%s4077_s19 + $0x104] sm:$0xf0]  ;;  %v2937_v26 = vor.u32 %v3778_v15, %v2936_v14  ;;  %v3704_v29 = vld [vmem:[%s4140_s23 + $0x38] sm:$0xf0]  ;;  %v2801_v38 = vor.u32 %v3744_v20, %v2800_v19 }
  0x25   : > { %1924 = vmatpush.bf16.msra.mxu2 %v2889_v58  ;;  %v2928_v25 = vld [vmem:[%s4077_s19 + $0x180] sm:$0xf]  ;;  %v3776_v27 = vld [vmem:[%s4077_s19 + $0x184] sm:$0xf0]  ;;  %v3697_v30 = vld [vmem:[%s4140_s23 + $0x4] sm:$0xf]  ;;  %v2865_v39 = vor.u32 %v3760_v24, %v2864_v23 }
  0x26   : > { %1943 = vmatpush.bf16.msra.mxu3 %v2953_v62  ;;  %v2616_v28 = vld [vmem:[%s4140_s23] sm:$0xf]  ;;  %v3176_v32 = vld [vmem:[%s4077_s19 + $0x370] sm:$0xf]  ;;  %v3838_v33 = vld [vmem:[%s4077_s19 + $0x374] sm:$0xf0]  ;;  %v2929_v43 = vor.u32 %v3776_v27, %v2928_v25 }
  0x27   : > { %1887 = vmatpush.bf16.msra.mxu0 %v2753_v4  ;;  %v2618_v31 = vld [vmem:[%s4140_s23 + $0x3c] sm:$0xf0]  ;;  %v2624_v35 = vld [vmem:[%s4140_s23 + $0x8] sm:$0xf]  ;;  %v3112_v36 = vld [vmem:[%s4077_s19 + $0x2f0] sm:$0xf]  ;;  %v3177_v44 = vor.u32 %v3838_v33, %v3176_v32  ;;  %v4164_v48 = vor.u32 %v3704_v29, %v2616_v28 }
  0x28   : > { %1906 = vmatpush.bf16.msra.mxu1 %v2817_v5  ;;  %v3822_v37 = vld [vmem:[%s4077_s19 + $0x2f4] sm:$0xf0]  ;;  %v3705_v40 = vld [vmem:[%s4140_s23 + $0x40] sm:$0xf0]  ;;  %v3698_v41 = vld [vmem:[%s4140_s23 + $0xc] sm:$0xf]  ;;  %v4169_v53 = vor.u32 %v3697_v30, %v2618_v31 }
  0x29   : > { %1925 = vmatpush.bf16.msra.mxu2 %v2881_v6  ;;  %v2626_v42 = vld [vmem:[%s4140_s23 + $0x44] sm:$0xf0]  ;;  %v3048_v45 = vld [vmem:[%s4077_s19 + $0x270] sm:$0xf]  ;;  %v3806_v46 = vld [vmem:[%s4077_s19 + $0x274] sm:$0xf0]  ;;  %v3113_v49 = vor.u32 %v3822_v37, %v3112_v36  ;;  %v4171_v54 = vor.u32 %v3705_v40, %v2624_v35 }
  0x2a   : > { %1944 = vmatpush.bf16.msra.mxu3 %v2945_v10  ;;  %v3240_v47 = vld [vmem:[%s4077_s19 + $0x3f0] sm:$0xf]  ;;  %v3854_v50 = vld [vmem:[%s4077_s19 + $0x3f4] sm:$0xf0]  ;;  %v3168_v51 = vld [vmem:[%s4077_s19 + $0x360] sm:$0xf]  ;;  %v4175_v57 = vor.u32 %v3698_v41, %v2626_v42  ;;  %v3049_v58 = vor.u32 %v3806_v46, %v3048_v45 }
  0x2b   : > { %1888 = vmatpush.bf16.msra.mxu0 %v2745_v17  ;;  %v3836_v52 = vld [vmem:[%s4077_s19 + $0x364] sm:$0xf0]  ;;  %v3104_v55 = vld [vmem:[%s4077_s19 + $0x2e0] sm:$0xf]  ;;  %v3241_v59 = vor.u32 %v3854_v50, %v3240_v47  ;;  %v3160_v2 = vld [vmem:[%s4077_s19 + $0x350] sm:$0xf] }
  0x2c   : > { %1907 = vmatpush.bf16.msra.mxu1 %v2809_v21  ;;  %v3820_v56 = vld [vmem:[%s4077_s19 + $0x2e4] sm:$0xf0]  ;;  %v3169_v60 = vor.u32 %v3836_v52, %v3168_v51  ;;  %v3040_v61 = vld [vmem:[%s4077_s19 + $0x260] sm:$0xf]  ;;  %v3834_v3 = vld [vmem:[%s4077_s19 + $0x354] sm:$0xf0] }
  0x2d   : > { %1926 = vmatpush.bf16.msra.mxu2 %v2873_v22  ;;  %v3804_v62 = vld [vmem:[%s4077_s19 + $0x264] sm:$0xf0]  ;;  %v3232_v63 = vld [vmem:[%s4077_s19 + $0x3e0] sm:$0xf]  ;;  %v3105_v0 = vor.u32 %v3820_v56, %v3104_v55  ;;  %v3096_v4 = vld [vmem:[%s4077_s19 + $0x2d0] sm:$0xf]  ;;  %v3161_v8 = vor.u32 %v3834_v3, %v3160_v2 }
  0x2e   : > { %1945 = vmatpush.bf16.msra.mxu3 %v2937_v26  ;;  %v3852_v1 = vld [vmem:[%s4077_s19 + $0x3e4] sm:$0xf0]  ;;  %v3818_v5 = vld [vmem:[%s4077_s19 + $0x2d4] sm:$0xf0]  ;;  %v3041_v6 = vor.u32 %v3804_v62, %v3040_v61  ;;  %v3032_v9 = vld [vmem:[%s4077_s19 + $0x250] sm:$0xf] }
  0x2f   : > { %1889 = vmatpush.bf16.msra.mxu0 %v2737_v34  ;;  %v3233_v7 = vor.u32 %v3852_v1, %v3232_v63  ;;  %v3802_v10 = vld [vmem:[%s4077_s19 + $0x254] sm:$0xf0]  ;;  %v3224_v11 = vld [vmem:[%s4077_s19 + $0x3d0] sm:$0xf]  ;;  %v3097_v12 = vor.u32 %v3818_v5, %v3096_v4  ;;  %v3152_v14 = vld [vmem:[%s4077_s19 + $0x340] sm:$0xf] }
  0x30   : > { %1908 = vmatpush.bf16.msra.mxu1 %v2801_v38  ;;  %v3850_v13 = vld [vmem:[%s4077_s19 + $0x3d4] sm:$0xf0]  ;;  %v3832_v15 = vld [vmem:[%s4077_s19 + $0x344] sm:$0xf0]  ;;  %v3088_v16 = vld [vmem:[%s4077_s19 + $0x2c0] sm:$0xf]  ;;  %v3033_v18 = vor.u32 %v3802_v10, %v3032_v9 }
  0x31   : > { %1927 = vmatpush.bf16.msra.mxu2 %v2865_v39  ;;  %v3816_v17 = vld [vmem:[%s4077_s19 + $0x2c4] sm:$0xf0]  ;;  %v3024_v19 = vld [vmem:[%s4077_s19 + $0x240] sm:$0xf]  ;;  %v3225_v22 = vor.u32 %v3850_v13, %v3224_v11  ;;  %v3153_v23 = vor.u32 %v3832_v15, %v3152_v14  ;;  %v2676_v25 = vld [vmem:[%s4140_s23 + $0x78] sm:$0xf] }
  0x32   : > { %1946 = vmatpush.bf16.msra.mxu3 %v2929_v43  ;;  %1890 = vmatmul.bf16.vlgmr.msra.gmra.mxu0 %v4164_v48  ;;  %v3800_v20 = vld [vmem:[%s4077_s19 + $0x244] sm:$0xf0]  ;;  %v3216_v21 = vld [vmem:[%s4077_s19 + $0x3c0] sm:$0xf]  ;;  %v3719_v26 = vld [vmem:[%s4140_s23 + $0xb0] sm:$0xf0]  ;;  %v3089_v27 = vor.u32 %v3816_v17, %v3088_v16 }
  0x33   : > { %1909 = vmatmul.bf16.vlgmr.msra.gmra.mxu1 %v4169_v53  ;;  %1958 = vmatpush.bf16.msrb.mxu0 %v3049_v58  ;;  %v3848_v24 = vld [vmem:[%s4077_s19 + $0x3c4] sm:$0xf0]  ;;  %v3712_v28 = vld [vmem:[%s4140_s23 + $0x7c] sm:$0xf]  ;;  %v2678_v29 = vld [vmem:[%s4140_s23 + $0xb4] sm:$0xf0]  ;;  %v3025_v35 = vor.u32 %v3800_v20, %v3024_v19 }
  0x34   : > { %1977 = vmatpush.bf16.msrb.mxu1 %v3113_v49  ;;  %1928 = vmatmul.bf16.vlgmr.msra.gmra.mxu2 %v4171_v54  ;;  %v3144_v30 = vld [vmem:[%s4077_s19 + $0x330] sm:$0xf]  ;;  %v3830_v31 = vld [vmem:[%s4077_s19 + $0x334] sm:$0xf0]  ;;  %v2684_v32 = vld [vmem:[%s4140_s23 + $0x80] sm:$0xf]  ;;  %v3217_v39 = vor.u32 %v3848_v24, %v3216_v21  ;;  %v4221_v50 = vor.u32 %v3712_v28, %v2678_v29 }
  0x35   : > { %1996 = vmatpush.bf16.msrb.mxu2 %v3177_v44  ;;  %1947 = vmatmul.bf16.vlgmr.msra.gmra.mxu3 %v4175_v57  ;;  %v3080_v33 = vld [vmem:[%s4077_s19 + $0x2b0] sm:$0xf]  ;;  %v3814_v34 = vld [vmem:[%s4077_s19 + $0x2b4] sm:$0xf0]  ;;  %v3720_v36 = vld [vmem:[%s4140_s23 + $0xb8] sm:$0xf0]  ;;  %v3145_v40 = vor.u32 %v3830_v31, %v3144_v30  ;;  %v4216_v44 = vor.u32 %v3719_v26, %v2676_v25 }
  0x36   : > { %2015 = vmatpush.bf16.msrb.mxu3 %v3241_v59  ;;  %v3713_v37 = vld [vmem:[%s4140_s23 + $0x84] sm:$0xf]  ;;  %v2686_v38 = vld [vmem:[%s4140_s23 + $0xbc] sm:$0xf0]  ;;  %v3016_v41 = vld [vmem:[%s4077_s19 + $0x230] sm:$0xf]  ;;  %v3081_v45 = vor.u32 %v3814_v34, %v3080_v33  ;;  %v4223_v51 = vor.u32 %v3720_v36, %v2684_v32 }
  0x37   : > { %1959 = vmatpush.bf16.msrb.mxu0 %v3041_v6  ;;  %v3798_v42 = vld [vmem:[%s4077_s19 + $0x234] sm:$0xf0]  ;;  %v3208_v43 = vld [vmem:[%s4077_s19 + $0x3b0] sm:$0xf]  ;;  %v3136_v47 = vld [vmem:[%s4077_s19 + $0x320] sm:$0xf]  ;;  %v4227_v56 = vor.u32 %v3713_v37, %v2686_v38 }
  0x38   : > { %1978 = vmatpush.bf16.msrb.mxu1 %v3105_v0  ;;  %v3846_v46 = vld [vmem:[%s4077_s19 + $0x3b4] sm:$0xf0]  ;;  %v3828_v49 = vld [vmem:[%s4077_s19 + $0x324] sm:$0xf0]  ;;  %v3072_v52 = vld [vmem:[%s4077_s19 + $0x2a0] sm:$0xf]  ;;  %v3017_v58 = vor.u32 %v3798_v42, %v3016_v41 }
  0x39   : > { %1997 = vmatpush.bf16.msrb.mxu2 %v3169_v60  ;;  %v3812_v55 = vld [vmem:[%s4077_s19 + $0x2a4] sm:$0xf0]  ;;  %v3209_v59 = vor.u32 %v3846_v46, %v3208_v43  ;;  %v3137_v60 = vor.u32 %v3828_v49, %v3136_v47  ;;  %v3008_v61 = vld [vmem:[%s4077_s19 + $0x220] sm:$0xf]  ;;  %v3128_v2 = vld [vmem:[%s4077_s19 + $0x310] sm:$0xf] }
  0x3a   : > { %2016 = vmatpush.bf16.msrb.mxu3 %v3233_v7  ;;  %v3796_v62 = vld [vmem:[%s4077_s19 + $0x224] sm:$0xf0]  ;;  %v3200_v63 = vld [vmem:[%s4077_s19 + $0x3a0] sm:$0xf]  ;;  %v3073_v0 = vor.u32 %v3812_v55, %v3072_v52  ;;  %v3826_v3 = vld [vmem:[%s4077_s19 + $0x314] sm:$0xf0] }
  0x3b   : > { %1960 = vmatpush.bf16.msrb.mxu0 %v3033_v18  ;;  %v3844_v1 = vld [vmem:[%s4077_s19 + $0x3a4] sm:$0xf0]  ;;  %v3064_v4 = vld [vmem:[%s4077_s19 + $0x290] sm:$0xf]  ;;  %v3810_v5 = vld [vmem:[%s4077_s19 + $0x294] sm:$0xf0]  ;;  %v3009_v6 = vor.u32 %v3796_v62, %v3008_v61  ;;  %v3129_v9 = vor.u32 %v3826_v3, %v3128_v2 }
  0x3c   : > { %1979 = vmatpush.bf16.msrb.mxu1 %v3097_v12  ;;  %v3000_v7 = vld [vmem:[%s4077_s19 + $0x210] sm:$0xf]  ;;  %v3794_v10 = vld [vmem:[%s4077_s19 + $0x214] sm:$0xf0]  ;;  %v3065_v13 = vor.u32 %v3810_v5, %v3064_v4  ;;  %v3120_v14 = vld [vmem:[%s4077_s19 + $0x300] sm:$0xf] }
  0x3d   : > { %1998 = vmatpush.bf16.msrb.mxu2 %v3161_v8  ;;  %v3201_v8 = vor.u32 %v3844_v1, %v3200_v63  ;;  %v3192_v11 = vld [vmem:[%s4077_s19 + $0x390] sm:$0xf]  ;;  %v3842_v12 = vld [vmem:[%s4077_s19 + $0x394] sm:$0xf0]  ;;  %v3824_v15 = vld [vmem:[%s4077_s19 + $0x304] sm:$0xf0]  ;;  %v3001_v20 = vor.u32 %v3794_v10, %v3000_v7 }
  0x3e   : > { %2017 = vmatpush.bf16.msrb.mxu3 %v3225_v22  ;;  %v3056_v16 = vld [vmem:[%s4077_s19 + $0x280] sm:$0xf]  ;;  %v3808_v17 = vld [vmem:[%s4077_s19 + $0x284] sm:$0xf0]  ;;  %v3432_v18 = vld [vmem:[%s4077_s19 + $0x570] sm:$0xf]  ;;  %v3193_v24 = vor.u32 %v3842_v12, %v3192_v11  ;;  %v3121_v25 = vor.u32 %v3824_v15, %v3120_v14 }
  0x3f   : > { %1961 = vmatpush.bf16.msrb.mxu0 %v3025_v35  ;;  %v3902_v19 = vld [vmem:[%s4077_s19 + $0x574] sm:$0xf0]  ;;  %v2992_v21 = vld [vmem:[%s4077_s19 + $0x200] sm:$0xf]  ;;  %v3368_v22 = vld [vmem:[%s4077_s19 + $0x4f0] sm:$0xf]  ;;  %v3057_v29 = vor.u32 %v3808_v17, %v3056_v16 }
  0x40   : > { %1980 = vmatpush.bf16.msrb.mxu1 %v3089_v27  ;;  %v3792_v26 = vld [vmem:[%s4077_s19 + $0x204] sm:$0xf0]  ;;  %v3184_v27 = vld [vmem:[%s4077_s19 + $0x380] sm:$0xf]  ;;  %v2632_v30 = vld [vmem:[%s4140_s23 + $0x10] sm:$0xf]  ;;  %v3433_v34 = vor.u32 %v3902_v19, %v3432_v18 }
  0x41   : > { %1999 = vmatpush.bf16.msrb.mxu2 %v3153_v23  ;;  %v3886_v23 = vld [vmem:[%s4077_s19 + $0x4f4] sm:$0xf0]  ;;  %v3840_v28 = vld [vmem:[%s4077_s19 + $0x384] sm:$0xf0]  ;;  %v3706_v31 = vld [vmem:[%s4140_s23 + $0x48] sm:$0xf0]  ;;  %v2993_v42 = vor.u32 %v3792_v26, %v2992_v21 }
  0x42   : > { %2018 = vmatpush.bf16.msrb.mxu3 %v3217_v39  ;;  %1895 = vmatmul.bf16.gmra.mxu0 %v4216_v44  ;;  %v3699_v32 = vld [vmem:[%s4140_s23 + $0x14] sm:$0xf]  ;;  %v2634_v33 = vld [vmem:[%s4140_s23 + $0x4c] sm:$0xf0]  ;;  %v3870_v36 = vld [vmem:[%s4077_s19 + $0x474] sm:$0xf0]  ;;  %v3369_v38 = vor.u32 %v3886_v23, %v3368_v22  ;;  %v3185_v47 = vor.u32 %v3840_v28, %v3184_v27 }
  0x43   : > { %1914 = vmatmul.bf16.gmra.mxu1 %v4221_v50  ;;  %1962 = vmatpush.bf16.msrb.mxu0 %v3017_v58  ;;  %v3304_v35 = vld [vmem:[%s4077_s19 + $0x470] sm:$0xf]  ;;  %v3918_v39 = vld [vmem:[%s4077_s19 + $0x5f4] sm:$0xf0]  ;;  %v3900_v41 = vld [vmem:[%s4077_s19 + $0x564] sm:$0xf0]  ;;  %v4278_v1 = vor.u32 %v3699_v32, %v2634_v33 }
  0x44   : > { %1981 = vmatpush.bf16.msrb.mxu1 %v3081_v45  ;;  %1933 = vmatmul.bf16.gmra.mxu2 %v4223_v51  ;;  %v3496_v37 = vld [vmem:[%s4077_s19 + $0x5f0] sm:$0xf]  ;;  %v2640_v43 = vld [vmem:[%s4140_s23 + $0x18] sm:$0xf]  ;;  %v3707_v45 = vld [vmem:[%s4140_s23 + $0x50] sm:$0xf0]  ;;  %v3305_v52 = vor.u32 %v3870_v36, %v3304_v35 }
  0x45   : > { %2000 = vmatpush.bf16.msrb.mxu2 %v3145_v40  ;;  %1952 = vmatmul.bf16.gmra.mxu3 %v4227_v56  ;;  %v3424_v40 = vld [vmem:[%s4077_s19 + $0x560] sm:$0xf]  ;;  %v3700_v46 = vld [vmem:[%s4140_s23 + $0x1c] sm:$0xf]  ;;  %v2642_v49 = vld [vmem:[%s4140_s23 + $0x54] sm:$0xf0]  ;;  %v4283_v5 = vor.u32 %v3707_v45, %v2640_v43 }
  0x46   : > { %2019 = vmatpush.bf16.msrb.mxu3 %v3209_v59  ;;  %v3296_v55 = vld [vmem:[%s4077_s19 + $0x460] sm:$0xf]  ;;  %v3868_v58 = vld [vmem:[%s4077_s19 + $0x464] sm:$0xf0]  ;;  %v3497_v59 = vor.u32 %v3918_v39, %v3496_v37  ;;  %v3416_v3 = vld [vmem:[%s4077_s19 + $0x550] sm:$0xf] }
  0x47   : > { %1963 = vmatpush.bf16.msrb.mxu0 %v3009_v6  ;;  %v3360_v61 = vld [vmem:[%s4077_s19 + $0x4e0] sm:$0xf]  ;;  %v3884_v62 = vld [vmem:[%s4077_s19 + $0x4e4] sm:$0xf0]  ;;  %v3898_v4 = vld [vmem:[%s4077_s19 + $0x554] sm:$0xf0]  ;;  %v4285_v6 = vor.u32 %v3700_v46, %v2642_v49  ;;  %v3297_v7 = vor.u32 %v3868_v58, %v3296_v55 }
  0x48   : > { %1982 = vmatpush.bf16.msrb.mxu1 %v3073_v0  ;;  %v3488_v63 = vld [vmem:[%s4077_s19 + $0x5e0] sm:$0xf]  ;;  %v4276_v0 = vor.u32 %v3706_v31, %v2632_v30  ;;  %v3916_v2 = vld [vmem:[%s4077_s19 + $0x5e4] sm:$0xf0]  ;;  %v3866_v10 = vld [vmem:[%s4077_s19 + $0x454] sm:$0xf0]  ;;  %v3417_v12 = vor.u32 %v3898_v4, %v3416_v3 }
  0x49   : > { %2001 = vmatpush.bf16.msrb.mxu2 %v3137_v60  ;;  %v3425_v60 = vor.u32 %v3900_v41, %v3424_v40  ;;  %v3489_v11 = vor.u32 %v3916_v2, %v3488_v63  ;;  %v3882_v14 = vld [vmem:[%s4077_s19 + $0x4d4] sm:$0xf0]  ;;  %v3480_v15 = vld [vmem:[%s4077_s19 + $0x5d0] sm:$0xf]  ;;  %v3408_v17 = vld [vmem:[%s4077_s19 + $0x540] sm:$0xf] }
  0x4a   : > { %2020 = vmatpush.bf16.msrb.mxu3 %v3201_v8  ;;  %v3361_v8 = vor.u32 %v3884_v62, %v3360_v61  ;;  %v3914_v16 = vld [vmem:[%s4077_s19 + $0x5d4] sm:$0xf0]  ;;  %v3896_v18 = vld [vmem:[%s4077_s19 + $0x544] sm:$0xf0]  ;;  %v3280_v21 = vld [vmem:[%s4077_s19 + $0x440] sm:$0xf] }
  0x4b   : > { %1964 = vmatpush.bf16.msrb.mxu0 %v3001_v20  ;;  %v3864_v22 = vld [vmem:[%s4077_s19 + $0x444] sm:$0xf0]  ;;  %v3481_v23 = vor.u32 %v3914_v16, %v3480_v15  ;;  %v3472_v27 = vld [vmem:[%s4077_s19 + $0x5c0] sm:$0xf]  ;;  %v3894_v30 = vld [vmem:[%s4077_s19 + $0x534] sm:$0xf0] }
  0x4c   : > { %1983 = vmatpush.bf16.msrb.mxu1 %v3065_v13  ;;  %v3352_v13 = vld [vmem:[%s4077_s19 + $0x4d0] sm:$0xf]  ;;  %v3880_v26 = vld [vmem:[%s4077_s19 + $0x4c4] sm:$0xf0]  ;;  %v3281_v31 = vor.u32 %v3864_v22, %v3280_v21  ;;  %v3721_v37 = vld [vmem:[%s4140_s23 + $0xc0] sm:$0xf0] }
  0x4d   : > { %2002 = vmatpush.bf16.msrb.mxu2 %v3129_v9  ;;  %v3288_v9 = vld [vmem:[%s4077_s19 + $0x450] sm:$0xf]  ;;  %v3353_v20 = vor.u32 %v3882_v14, %v3352_v13  ;;  %v3912_v28 = vld [vmem:[%s4077_s19 + $0x5c4] sm:$0xf0]  ;;  %v3910_v45 = vld [vmem:[%s4077_s19 + $0x5b4] sm:$0xf0] }
  0x4e   : > { %2021 = vmatpush.bf16.msrb.mxu3 %v3193_v24  ;;  %v3289_v19 = vor.u32 %v3866_v10, %v3288_v9  ;;  %v3409_v24 = vor.u32 %v3896_v18, %v3408_v17  ;;  %v3272_v33 = vld [vmem:[%s4077_s19 + $0x430] sm:$0xf]  ;;  %v3473_v35 = vor.u32 %v3912_v28, %v3472_v27  ;;  %v2692_v36 = vld [vmem:[%s4140_s23 + $0x88] sm:$0xf]  ;;  %v3392_v46 = vld [vmem:[%s4077_s19 + $0x520] sm:$0xf] }
  0x4f   : > { %1965 = vmatpush.bf16.msrb.mxu0 %v2993_v42  ;;  %v2694_v39 = vld [vmem:[%s4140_s23 + $0xc4] sm:$0xf0]  ;;  %v3336_v41 = vld [vmem:[%s4077_s19 + $0x4b0] sm:$0xf]  ;;  %v3878_v42 = vld [vmem:[%s4077_s19 + $0x4b4] sm:$0xf0] }
  0x50   : > { %1984 = vmatpush.bf16.msrb.mxu1 %v3057_v29  ;;  %v3400_v29 = vld [vmem:[%s4077_s19 + $0x530] sm:$0xf]  ;;  %v3715_v55 = vld [vmem:[%s4140_s23 + $0x94] sm:$0xf]  ;;  %v3264_v61 = vld [vmem:[%s4077_s19 + $0x420] sm:$0xf] }
  0x51   : > { %2003 = vmatpush.bf16.msrb.mxu2 %v3121_v25  ;;  %v3344_v25 = vld [vmem:[%s4077_s19 + $0x4c0] sm:$0xf]  ;;  %v3401_v40 = vor.u32 %v3894_v30, %v3400_v29  ;;  %v3464_v43 = vld [vmem:[%s4077_s19 + $0x5b0] sm:$0xf]  ;;  %v3860_v62 = vld [vmem:[%s4077_s19 + $0x424] sm:$0xf0] }
  0x52   : > { %2022 = vmatpush.bf16.msrb.mxu3 %v3185_v47  ;;  %1966 = vmatmul.bf16.vlgmr.msrb.gmra.mxu0 %v4276_v0  ;;  %v3345_v32 = vor.u32 %v3880_v26, %v3344_v25  ;;  %v3892_v47 = vld [vmem:[%s4077_s19 + $0x524] sm:$0xf0]  ;;  %v2700_v49 = vld [vmem:[%s4140_s23 + $0x90] sm:$0xf]  ;;  %v3465_v63 = vor.u32 %v3910_v45, %v3464_v43  ;;  %v3328_v3 = vld [vmem:[%s4077_s19 + $0x4a0] sm:$0xf]  ;;  %v3265_v15 = vor.u32 %v3860_v62, %v3264_v61 }
  0x53   : > { %2034 = vmatpush.bf16.msra.mxu0 %v3305_v52  ;;  %1985 = vmatmul.bf16.vlgmr.msrb.gmra.mxu1 %v4278_v1  ;;  %v3722_v52 = vld [vmem:[%s4140_s23 + $0xc8] sm:$0xf0]  ;;  %v2702_v58 = vld [vmem:[%s4140_s23 + $0xcc] sm:$0xf0]  ;;  %v3393_v2 = vor.u32 %v3892_v47, %v3392_v46  ;;  %v3876_v4 = vld [vmem:[%s4077_s19 + $0x4a4] sm:$0xf0] }
  0x54   : > { %2053 = vmatpush.bf16.msra.mxu1 %v3369_v38  ;;  %2004 = vmatmul.bf16.vlgmr.msrb.gmra.mxu2 %v4283_v5  ;;  %v3714_v38 = vld [vmem:[%s4140_s23 + $0x8c] sm:$0xf]  ;;  %v3908_v10 = vld [vmem:[%s4077_s19 + $0x5a4] sm:$0xf0]  ;;  %v4335_v13 = vor.u32 %v3722_v52, %v2700_v49  ;;  %v4337_v14 = vor.u32 %v3715_v55, %v2702_v58  ;;  %v3329_v16 = vor.u32 %v3876_v4, %v3328_v3  ;;  %v3256_v17 = vld [vmem:[%s4077_s19 + $0x410] sm:$0xf] }
  0x55   : > { %2072 = vmatpush.bf16.msra.mxu2 %v3433_v34  ;;  %2023 = vmatmul.bf16.vlgmr.msrb.gmra.mxu3 %v4285_v6  ;;  %v3862_v34 = vld [vmem:[%s4077_s19 + $0x434] sm:$0xf0]  ;;  %v4330_v9 = vor.u32 %v3714_v38, %v2694_v39  ;;  %v3320_v21 = vld [vmem:[%s4077_s19 + $0x490] sm:$0xf]  ;;  %v3376_v25 = vld [vmem:[%s4077_s19 + $0x500] sm:$0xf] }
  0x56   : > { %2091 = vmatpush.bf16.msra.mxu3 %v3497_v59  ;;  %v3273_v59 = vor.u32 %v3862_v34, %v3272_v33  ;;  %v3858_v18 = vld [vmem:[%s4077_s19 + $0x414] sm:$0xf0]  ;;  %v3888_v26 = vld [vmem:[%s4077_s19 + $0x504] sm:$0xf0]  ;;  %v3688_v27 = vld [vmem:[%s4077_s19 + $0x770] sm:$0xf] }
  0x57   : > { %2035 = vmatpush.bf16.msra.mxu0 %v3297_v7  ;;  %v3456_v7 = vld [vmem:[%s4077_s19 + $0x5a0] sm:$0xf]  ;;  %v3874_v22 = vld [vmem:[%s4077_s19 + $0x494] sm:$0xf0]  ;;  %v3257_v29 = vor.u32 %v3858_v18, %v3256_v17  ;;  %v3904_v38 = vld [vmem:[%s4077_s19 + $0x584] sm:$0xf0] }
  0x58   : > { %2054 = vmatpush.bf16.msra.mxu1 %v3361_v8  ;;  %v4328_v8 = vor.u32 %v3721_v37, %v2692_v36  ;;  %v3966_v28 = vld [vmem:[%s4077_s19 + $0x774] sm:$0xf0]  ;;  %v3321_v30 = vor.u32 %v3874_v22, %v3320_v21  ;;  %v3312_v33 = vld [vmem:[%s4077_s19 + $0x480] sm:$0xf]  ;;  %v3872_v36 = vld [vmem:[%s4077_s19 + $0x484] sm:$0xf0] }
  0x59   : > { %2073 = vmatpush.bf16.msra.mxu2 %v3425_v60  ;;  %v3337_v60 = vor.u32 %v3878_v42, %v3336_v41  ;;  %v3440_v37 = vld [vmem:[%s4077_s19 + $0x580] sm:$0xf]  ;;  %v3689_v39 = vor.u32 %v3966_v28, %v3688_v27  ;;  %v3934_v41 = vld [vmem:[%s4077_s19 + $0x674] sm:$0xf0]  ;;  %v3624_v42 = vld [vmem:[%s4077_s19 + $0x6f0] sm:$0xf]  ;;  %v3313_v49 = vor.u32 %v3872_v36, %v3312_v33 }
  0x5a   : > { %2092 = vmatpush.bf16.msra.mxu3 %v3489_v11  ;;  %v3384_v11 = vld [vmem:[%s4077_s19 + $0x510] sm:$0xf]  ;;  %v3950_v43 = vld [vmem:[%s4077_s19 + $0x6f4] sm:$0xf0]  ;;  %v3741_v45 = vld [vmem:[%s4077_s19 + $0x74] sm:$0xf]  ;;  %v3441_v58 = vor.u32 %v3904_v38, %v3440_v37 }
  0x5b   : > { %2036 = vmatpush.bf16.msra.mxu0 %v3289_v19  ;;  %v3457_v19 = vor.u32 %v3908_v10, %v3456_v7  ;;  %v2794_v46 = vld [vmem:[%s4077_s19 + $0x78] sm:$0xf0]  ;;  %v3680_v52 = vld [vmem:[%s4077_s19 + $0x760] sm:$0xf]  ;;  %v3964_v55 = vld [vmem:[%s4077_s19 + $0x764] sm:$0xf0] }
  0x5c   : > { %2055 = vmatpush.bf16.msra.mxu1 %v3353_v20  ;;  %v3701_v61 = vld [vmem:[%s4140_s23 + $0x24] sm:$0xf]  ;;  %v2797_v3 = vor.u32 %v3741_v45, %v2794_v46  ;;  %v3552_v4 = vld [vmem:[%s4077_s19 + $0x660] sm:$0xf]  ;;  %v3932_v7 = vld [vmem:[%s4077_s19 + $0x664] sm:$0xf0] }
  0x5d   : > { %2074 = vmatpush.bf16.msra.mxu2 %v3417_v12  ;;  %v3890_v12 = vld [vmem:[%s4077_s19 + $0x514] sm:$0xf0]  ;;  %v2656_v10 = vld [vmem:[%s4140_s23 + $0x28] sm:$0xf]  ;;  %v3616_v17 = vld [vmem:[%s4077_s19 + $0x6e0] sm:$0xf] }
  0x5e   : > { %2093 = vmatpush.bf16.msra.mxu3 %v3481_v23  ;;  %v3385_v20 = vor.u32 %v3890_v12, %v3384_v11  ;;  %v3448_v23 = vld [vmem:[%s4077_s19 + $0x590] sm:$0xf]  ;;  %v3709_v11 = vld [vmem:[%s4140_s23 + $0x60] sm:$0xf0]  ;;  %v3702_v12 = vld [vmem:[%s4140_s23 + $0x2c] sm:$0xf] }
  0x5f   : > { %2037 = vmatpush.bf16.msra.mxu0 %v3281_v31  ;;  %v3248_v31 = vld [vmem:[%s4077_s19 + $0x400] sm:$0xf]  ;;  %v3948_v18 = vld [vmem:[%s4077_s19 + $0x6e4] sm:$0xf0]  ;;  %v2786_v21 = vld [vmem:[%s4077_s19 + $0x68] sm:$0xf0]  ;;  %v4389_v28 = vor.u32 %v3709_v11, %v2656_v10 }
  0x60   : > { %2056 = vmatpush.bf16.msra.mxu1 %v3345_v32  ;;  %v3856_v32 = vld [vmem:[%s4077_s19 + $0x404] sm:$0xf0]  ;;  %v3672_v22 = vld [vmem:[%s4077_s19 + $0x750] sm:$0xf]  ;;  %v3930_v27 = vld [vmem:[%s4077_s19 + $0x654] sm:$0xf0] }
  0x61   : > { %2075 = vmatpush.bf16.msra.mxu2 %v3409_v24  ;;  %v3906_v24 = vld [vmem:[%s4077_s19 + $0x594] sm:$0xf0]  ;;  %v3249_v47 = vor.u32 %v3856_v32, %v3248_v31  ;;  %v3608_v32 = vld [vmem:[%s4077_s19 + $0x6d0] sm:$0xf]  ;;  %v3737_v36 = vld [vmem:[%s4077_s19 + $0x54] sm:$0xf] }
  0x62   : > { %2094 = vmatpush.bf16.msra.mxu3 %v3473_v35  ;;  %1971 = vmatmul.bf16.gmra.mxu0 %v4328_v8  ;;  %v3449_v34 = vor.u32 %v3906_v24, %v3448_v23  ;;  %v3377_v35 = vor.u32 %v3888_v26, %v3376_v25  ;;  %v3962_v25 = vld [vmem:[%s4077_s19 + $0x754] sm:$0xf0]  ;;  %v3544_v26 = vld [vmem:[%s4077_s19 + $0x650] sm:$0xf]  ;;  %v2778_v37 = vld [vmem:[%s4077_s19 + $0x58] sm:$0xf0] }
  0x63   : > { %2038 = vmatpush.bf16.msra.mxu0 %v3273_v59  ;;  %1990 = vmatmul.bf16.gmra.mxu1 %v4330_v9  ;;  %v2648_v59 = vld [vmem:[%s4140_s23 + $0x20] sm:$0xf]  ;;  %v3946_v33 = vld [vmem:[%s4077_s19 + $0x6d4] sm:$0xf0]  ;;  %v3944_v46 = vld [vmem:[%s4077_s19 + $0x6c4] sm:$0xf0] }
  0x64   : > { %2057 = vmatpush.bf16.msra.mxu1 %v3337_v60  ;;  %2009 = vmatmul.bf16.gmra.mxu2 %v4335_v13  ;;  %v3708_v60 = vld [vmem:[%s4140_s23 + $0x58] sm:$0xf0]  ;;  %v3664_v38 = vld [vmem:[%s4077_s19 + $0x740] sm:$0xf]  ;;  %v2710_v11 = vld [vmem:[%s4140_s23 + $0xd4] sm:$0xf0] }
  0x65   : > { %2076 = vmatpush.bf16.msra.mxu2 %v3401_v40  ;;  %2028 = vmatmul.bf16.gmra.mxu3 %v4337_v14  ;;  %v3560_v40 = vld [vmem:[%s4077_s19 + $0x670] sm:$0xf]  ;;  %v4382_v23 = vor.u32 %v3708_v60, %v2648_v59  ;;  %v3600_v45 = vld [vmem:[%s4077_s19 + $0x6c0] sm:$0xf]  ;;  %v3958_v59 = vld [vmem:[%s4077_s19 + $0x734] sm:$0xf0] }
  0x66   : > { %2095 = vmatpush.bf16.msra.mxu3 %v3465_v63  ;;  %v3561_v62 = vor.u32 %v3934_v41, %v3560_v40  ;;  %v2650_v63 = vld [vmem:[%s4140_s23 + $0x5c] sm:$0xf0]  ;;  %v3928_v41 = vld [vmem:[%s4077_s19 + $0x644] sm:$0xf0]  ;;  %v3528_v60 = vld [vmem:[%s4077_s19 + $0x630] sm:$0xf] }
  0x67   : > { %2039 = vmatpush.bf16.msra.mxu0 %v3265_v15  ;;  %v3681_v15 = vor.u32 %v3964_v55, %v3680_v52  ;;  %v4384_v24 = vor.u32 %v3701_v61, %v2650_v63  ;;  %v3536_v40 = vld [vmem:[%s4077_s19 + $0x640] sm:$0xf]  ;;  %v3735_v52 = vld [vmem:[%s4077_s19 + $0x44] sm:$0xf]  ;;  %v2770_v55 = vld [vmem:[%s4077_s19 + $0x48] sm:$0xf0] }
  0x68   : > { %2058 = vmatpush.bf16.msra.mxu1 %v3329_v16  ;;  %v2658_v16 = vld [vmem:[%s4140_s23 + $0x64] sm:$0xf0]  ;;  %v3926_v61 = vld [vmem:[%s4077_s19 + $0x634] sm:$0xf0]  ;;  %v2773_v63 = vor.u32 %v3735_v52, %v2770_v55  ;;  %v3716_v10 = vld [vmem:[%s4140_s23 + $0x9c] sm:$0xf] }
  0x69   : > { %2077 = vmatpush.bf16.msra.mxu2 %v3393_v2  ;;  %v3625_v2 = vor.u32 %v3950_v43, %v3624_v42  ;;  %v3609_v42 = vor.u32 %v3946_v33, %v3608_v32  ;;  %v2781_v43 = vor.u32 %v3737_v36, %v2778_v37  ;;  %v3584_v32 = vld [vmem:[%s4077_s19 + $0x6a0] sm:$0xf]  ;;  %v3940_v33 = vld [vmem:[%s4077_s19 + $0x6a4] sm:$0xf0]  ;;  %v3731_v36 = vld [vmem:[%s4077_s19 + $0x24] sm:$0xf] }
  0x6a   : > { %2096 = vmatpush.bf16.msra.mxu3 %v3457_v19  ;;  %v3553_v19 = vor.u32 %v3932_v7, %v3552_v4  ;;  %v2708_v4 = vld [vmem:[%s4140_s23 + $0x98] sm:$0xf]  ;;  %v3723_v7 = vld [vmem:[%s4140_s23 + $0xd0] sm:$0xf0]  ;;  %v2754_v37 = vld [vmem:[%s4077_s19 + $0x28] sm:$0xf0] }
  0x6b   : > { %2040 = vmatpush.bf16.msra.mxu0 %v3257_v29  ;;  %v4391_v29 = vor.u32 %v3702_v12, %v2658_v16  ;;  %v3733_v16 = vld [vmem:[%s4077_s19 + $0x34] sm:$0xf]  ;;  %v3576_v52 = vld [vmem:[%s4077_s19 + $0x690] sm:$0xf]  ;;  %v3938_v55 = vld [vmem:[%s4077_s19 + $0x694] sm:$0xf0] }
  0x6c   : > { %2059 = vmatpush.bf16.msra.mxu1 %v3321_v30  ;;  %v3617_v30 = vor.u32 %v3948_v18, %v3616_v17  ;;  %v2762_v17 = vld [vmem:[%s4077_s19 + $0x38] sm:$0xf0]  ;;  %v3648_v18 = vld [vmem:[%s4077_s19 + $0x720] sm:$0xf] }
  0x6d   : > { %2078 = vmatpush.bf16.msra.mxu2 %v3385_v20  ;;  %v3739_v20 = vld [vmem:[%s4077_s19 + $0x64] sm:$0xf] }
  0x6e   : > { %2097 = vmatpush.bf16.msra.mxu3 %v3449_v34  ;;  %v2789_v31 = vor.u32 %v3739_v20, %v2786_v21  ;;  %v3673_v34 = vor.u32 %v3962_v25, %v3672_v22  ;;  %v3520_v20 = vld [vmem:[%s4077_s19 + $0x620] sm:$0xf]  ;;  %v3924_v21 = vld [vmem:[%s4077_s19 + $0x624] sm:$0xf0]  ;;  %v3724_v25 = vld [vmem:[%s4140_s23 + $0xd8] sm:$0xf0] }
  0x6f   : > { %2041 = vmatpush.bf16.msra.mxu0 %v3249_v47  ;;  %v2716_v22 = vld [vmem:[%s4140_s23 + $0xa0] sm:$0xf] }
  0x70   : > { %2060 = vmatpush.bf16.msra.mxu1 %v3313_v49  ;;  %v3537_v49 = vor.u32 %v3928_v41, %v3536_v40  ;;  %v4436_v40 = vor.u32 %v3716_v10, %v2710_v11  ;;  %v3954_v41 = vld [vmem:[%s4077_s19 + $0x714] sm:$0xf0]  ;;  %v3757_v10 = vld [vmem:[%s4077_s19 + $0xf4] sm:$0xf]  ;;  %v2858_v11 = vld [vmem:[%s4077_s19 + $0xf8] sm:$0xf0] }
  0x71   : > { %2079 = vmatpush.bf16.msra.mxu2 %v3377_v35  ;;  %v3545_v35 = vor.u32 %v3930_v27, %v3544_v26  ;;  %v3717_v26 = vld [vmem:[%s4140_s23 + $0xa4] sm:$0xf]  ;;  %v2718_v27 = vld [vmem:[%s4140_s23 + $0xdc] sm:$0xf0] }
  0x72   : > { %2098 = vmatpush.bf16.msra.mxu3 %v3441_v58  ;;  %2042 = vmatmul.bf16.vlgmr.msra.gmra.mxu0 %v4382_v23  ;;  %v3656_v58 = vld [vmem:[%s4077_s19 + $0x730] sm:$0xf] }
  0x73   : > { %2110 = vmatpush.bf16.msrb.mxu0 %v3561_v62  ;;  %2061 = vmatmul.bf16.vlgmr.msra.gmra.mxu1 %v4384_v24  ;;  %v3601_v62 = vor.u32 %v3944_v46, %v3600_v45  ;;  %v3657_v12 = vor.u32 %v3958_v59, %v3656_v58  ;;  %v4441_v45 = vor.u32 %v3724_v25, %v2716_v22  ;;  %v3729_v58 = vld [vmem:[%s4077_s19 + $0x14] sm:$0xf]  ;;  %v2922_v25 = vld [vmem:[%s4077_s19 + $0x178] sm:$0xf0] }
  0x74   : > { %2129 = vmatpush.bf16.msrb.mxu1 %v3625_v2  ;;  %2080 = vmatmul.bf16.vlgmr.msra.gmra.mxu2 %v4389_v28  ;;  %v3592_v2 = vld [vmem:[%s4077_s19 + $0x6b0] sm:$0xf]  ;;  %v4443_v46 = vor.u32 %v3717_v26, %v2718_v27  ;;  %v3773_v22 = vld [vmem:[%s4077_s19 + $0x174] sm:$0xf]  ;;  %v2861_v27 = vor.u32 %v3757_v10, %v2858_v11  ;;  %v2842_v11 = vld [vmem:[%s4077_s19 + $0xd8] sm:$0xf0] }
  0x75   : > { %2148 = vmatpush.bf16.msrb.mxu2 %v3689_v39  ;;  %v3960_v39 = vld [vmem:[%s4077_s19 + $0x744] sm:$0xf0]  ;;  %2099 = vmatmul.bf16.vlgmr.msra.gmra.mxu3 %v4391_v29  ;;  %v3753_v10 = vld [vmem:[%s4077_s19 + $0xd4] sm:$0xf] }
  0x76   : > { %2167 = vmatpush.bf16.msrb.mxu3 %v2797_v3  ;;  %v3665_v47 = vor.u32 %v3960_v39, %v3664_v38  ;;  %v3942_v3 = vld [vmem:[%s4077_s19 + $0x6b4] sm:$0xf0]  ;;  %v3640_v38 = vld [vmem:[%s4077_s19 + $0x710] sm:$0xf]  ;;  %v4434_v39 = vor.u32 %v3723_v7, %v2708_v4  ;;  %v3789_v4 = vld [vmem:[%s4077_s19 + $0x1f4] sm:$0xf] }
  0x77   : > { %2111 = vmatpush.bf16.msrb.mxu0 %v3553_v19  ;;  %v3956_v19 = vld [vmem:[%s4077_s19 + $0x724] sm:$0xf0]  ;;  %v3641_v59 = vor.u32 %v3954_v41, %v3640_v38  ;;  %v2986_v7 = vld [vmem:[%s4077_s19 + $0x1f8] sm:$0xf0]  ;;  %v2664_v38 = vld [vmem:[%s4140_s23 + $0x30] sm:$0xf] }
  0x78   : > { %2130 = vmatpush.bf16.msrb.mxu1 %v3617_v30  ;;  %v3593_v30 = vor.u32 %v3942_v3, %v3592_v2  ;;  %v3504_v2 = vld [vmem:[%s4077_s19 + $0x600] sm:$0xf]  ;;  %v3920_v3 = vld [vmem:[%s4077_s19 + $0x604] sm:$0xf0]  ;;  %v2989_v26 = vor.u32 %v3789_v4, %v2986_v7  ;;  %v3710_v41 = vld [vmem:[%s4140_s23 + $0x68] sm:$0xf0] }
  0x79   : > { %2149 = vmatpush.bf16.msrb.mxu2 %v3681_v15  ;;  %v3529_v15 = vor.u32 %v3926_v61, %v3528_v60  ;;  %v2746_v61 = vld [vmem:[%s4077_s19 + $0x18] sm:$0xf0] }
  0x7a   : > { %2168 = vmatpush.bf16.msrb.mxu3 %v2789_v31  ;;  %v2765_v31 = vor.u32 %v3733_v16, %v2762_v17  ;;  %v3568_v16 = vld [vmem:[%s4077_s19 + $0x680] sm:$0xf]  ;;  %v3936_v17 = vld [vmem:[%s4077_s19 + $0x684] sm:$0xf0] }
  0x7b   : > { %2112 = vmatpush.bf16.msrb.mxu0 %v3545_v35  ;;  %v3521_v35 = vor.u32 %v3924_v21, %v3520_v20  ;;  %v3505_v20 = vor.u32 %v3920_v3, %v3504_v2  ;;  %v2738_v21 = vld [vmem:[%s4077_s19 + $0x8] sm:$0xf0]  ;;  %v3785_v2 = vld [vmem:[%s4077_s19 + $0x1d4] sm:$0xf]  ;;  %v2970_v3 = vld [vmem:[%s4077_s19 + $0x1d8] sm:$0xf0] }
  0x7c   : > { %2131 = vmatpush.bf16.msrb.mxu1 %v3609_v42  ;;  %v3512_v42 = vld [vmem:[%s4077_s19 + $0x610] sm:$0xf] }
  0x7d   : > { %2150 = vmatpush.bf16.msrb.mxu2 %v3673_v34  ;;  %v3649_v34 = vor.u32 %v3956_v19, %v3648_v18  ;;  %v3727_v18 = vld [vmem:[%s4077_s19 + $0x4] sm:$0xf] }
  0x7e   : > { %2169 = vmatpush.bf16.msrb.mxu3 %v2781_v43  ;;  %v3922_v43 = vld [vmem:[%s4077_s19 + $0x614] sm:$0xf0] }
  0x7f   : > { %2113 = vmatpush.bf16.msrb.mxu0 %v3537_v49  ;;  %v2757_v49 = vor.u32 %v3731_v36, %v2754_v37  ;;  %v3513_v60 = vor.u32 %v3922_v43, %v3512_v42  ;;  %v3569_v36 = vor.u32 %v3936_v17, %v3568_v16  ;;  %v2741_v37 = vor.u32 %v3727_v18, %v2738_v21  ;;  %v2906_v17 = vld [vmem:[%s4077_s19 + $0x158] sm:$0xf0]  ;;  %v3801_v18 = vld [vmem:[%s4077_s19 + $0x254] sm:$0xf] }
  0x80   : > { %2132 = vmatpush.bf16.msrb.mxu1 %v3601_v62  ;;  %v3632_v62 = vld [vmem:[%s4077_s19 + $0x700] sm:$0xf]  ;;  %v2925_v42 = vor.u32 %v3773_v22, %v2922_v25  ;;  %v2973_v21 = vor.u32 %v3785_v2, %v2970_v3  ;;  %v2845_v22 = vor.u32 %v3753_v10, %v2842_v11  ;;  %v3783_v25 = vld [vmem:[%s4077_s19 + $0x1c4] sm:$0xf]  ;;  %v2724_v2 = vld [vmem:[%s4140_s23 + $0xa8] sm:$0xf] }
  0x81   : > { %2151 = vmatpush.bf16.msrb.mxu2 %v3665_v47  ;;  %v3585_v47 = vor.u32 %v3940_v33, %v3584_v32  ;;  %v3787_v32 = vld [vmem:[%s4077_s19 + $0x1e4] sm:$0xf]  ;;  %v2978_v33 = vld [vmem:[%s4077_s19 + $0x1e8] sm:$0xf0] }
  0x82   : > { %2170 = vmatpush.bf16.msrb.mxu3 %v2773_v63  ;;  %v3952_v63 = vld [vmem:[%s4077_s19 + $0x704] sm:$0xf0]  ;;  %2047 = vmatmul.bf16.gmra.mxu0 %v4434_v39  ;;  %v3725_v3 = vld [vmem:[%s4140_s23 + $0xe0] sm:$0xf0]  ;;  %v2818_v11 = vld [vmem:[%s4077_s19 + $0xa8] sm:$0xf0] }
  0x83   : > { %2114 = vmatpush.bf16.msrb.mxu0 %v3529_v15  ;;  %2066 = vmatmul.bf16.gmra.mxu1 %v4436_v40  ;;  %v2749_v15 = vor.u32 %v3729_v58, %v2746_v61  ;;  %v3633_v19 = vor.u32 %v3952_v63, %v3632_v62  ;;  %v3803_v58 = vld [vmem:[%s4077_s19 + $0x264] sm:$0xf]  ;;  %v2666_v61 = vld [vmem:[%s4140_s23 + $0x6c] sm:$0xf0]  ;;  %v2672_v62 = vld [vmem:[%s4140_s23 + $0x38] sm:$0xf] }
  0x84   : > { %2133 = vmatpush.bf16.msrb.mxu1 %v3593_v30  ;;  %2085 = vmatmul.bf16.gmra.mxu2 %v4441_v45  ;;  %v3805_v30 = vld [vmem:[%s4077_s19 + $0x274] sm:$0xf]  ;;  %v3747_v10 = vld [vmem:[%s4077_s19 + $0xa4] sm:$0xf] }
  0x85   : > { %2152 = vmatpush.bf16.msrb.mxu2 %v3657_v12  ;;  %2104 = vmatmul.bf16.gmra.mxu3 %v4443_v46  ;;  %v3577_v12 = vor.u32 %v3938_v55, %v3576_v52  ;;  %v2914_v55 = vld [vmem:[%s4077_s19 + $0x168] sm:$0xf0]  ;;  %v3711_v63 = vld [vmem:[%s4140_s23 + $0x70] sm:$0xf0] }
  0x86   : > { %2171 = vmatpush.bf16.msrb.mxu3 %v2765_v31  ;;  %v3050_v31 = vld [vmem:[%s4077_s19 + $0x278] sm:$0xf0] }
  0x87   : > { %2115 = vmatpush.bf16.msrb.mxu0 %v3521_v35  ;;  %v2850_v35 = vld [vmem:[%s4077_s19 + $0xe8] sm:$0xf0]  ;;  %v3053_v43 = vor.u32 %v3805_v30, %v3050_v31  ;;  %v3751_v31 = vld [vmem:[%s4077_s19 + $0xc4] sm:$0xf] }
  0x88   : > { %2134 = vmatpush.bf16.msrb.mxu1 %v3585_v47  ;;  %v3771_v47 = vld [vmem:[%s4077_s19 + $0x164] sm:$0xf] }
  0x89   : > { %2153 = vmatpush.bf16.msrb.mxu2 %v3649_v34  ;;  %v3755_v34 = vld [vmem:[%s4077_s19 + $0xe4] sm:$0xf]  ;;  %v2917_v4 = vor.u32 %v3771_v47, %v2914_v55  ;;  %v3765_v55 = vld [vmem:[%s4077_s19 + $0x134] sm:$0xf] }
  0x8a   : > { %2172 = vmatpush.bf16.msrb.mxu3 %v2757_v49  ;;  %v2981_v49 = vor.u32 %v3787_v32, %v2978_v33  ;;  %v2853_v52 = vor.u32 %v3755_v34, %v2850_v35  ;;  %v2834_v32 = vld [vmem:[%s4077_s19 + $0xc8] sm:$0xf0]  ;;  %v3767_v33 = vld [vmem:[%s4077_s19 + $0x144] sm:$0xf] }
  0x8b   : > { %2116 = vmatpush.bf16.msrb.mxu0 %v3513_v60  ;;  %v3703_v60 = vld [vmem:[%s4140_s23 + $0x34] sm:$0xf]  ;;  %v2898_v34 = vld [vmem:[%s4077_s19 + $0x148] sm:$0xf0]  ;;  %v3799_v35 = vld [vmem:[%s4077_s19 + $0x244] sm:$0xf] }
  0x8c   : > { %2135 = vmatpush.bf16.msrb.mxu1 %v3577_v12  ;;  %v3769_v12 = vld [vmem:[%s4077_s19 + $0x154] sm:$0xf]  ;;  %v4490_v16 = vor.u32 %v3703_v60, %v2666_v61 }
  0x8d   : > { %2154 = vmatpush.bf16.msrb.mxu2 %v3641_v59  ;;  %v3042_v59 = vld [vmem:[%s4077_s19 + $0x268] sm:$0xf0] }
  0x8e   : > { %2173 = vmatpush.bf16.msrb.mxu3 %v2749_v15  ;;  %v3045_v7 = vor.u32 %v3803_v58, %v3042_v59  ;;  %v4488_v15 = vor.u32 %v3710_v41, %v2664_v38  ;;  %v2837_v38 = vor.u32 %v3751_v31, %v2834_v32  ;;  %v3781_v41 = vld [vmem:[%s4077_s19 + $0x1b4] sm:$0xf]  ;;  %v3018_v59 = vld [vmem:[%s4077_s19 + $0x238] sm:$0xf0] }
  0x8f   : > { %2117 = vmatpush.bf16.msrb.mxu0 %v3505_v20  ;;  %v4495_v20 = vor.u32 %v3711_v63, %v2672_v62  ;;  %v3797_v58 = vld [vmem:[%s4077_s19 + $0x234] sm:$0xf]  ;;  %v3779_v62 = vld [vmem:[%s4077_s19 + $0x1a4] sm:$0xf]  ;;  %v2946_v63 = vld [vmem:[%s4077_s19 + $0x1a8] sm:$0xf0] }
  0x90   : > { %2136 = vmatpush.bf16.msrb.mxu1 %v3569_v36  ;;  %v3026_v36 = vld [vmem:[%s4077_s19 + $0x248] sm:$0xf0]  ;;  %v3777_v31 = vld [vmem:[%s4077_s19 + $0x194] sm:$0xf]  ;;  %v2938_v32 = vld [vmem:[%s4077_s19 + $0x198] sm:$0xf0] }
  0x91   : > { %2155 = vmatpush.bf16.msrb.mxu2 %v3633_v19  ;;  %v3034_v19 = vld [vmem:[%s4077_s19 + $0x258] sm:$0xf0]  ;;  %v3029_v47 = vor.u32 %v3799_v35, %v3026_v36  ;;  %v3745_v35 = vld [vmem:[%s4077_s19 + $0x94] sm:$0xf] }
  0x92   : > { %2174 = vmatpush.bf16.msrb.mxu3 %v2741_v37  ;;  %v3037_v30 = vor.u32 %v3801_v18, %v3034_v19  ;;  %2118 = vmatmul.bf16.vlgmr.msrb.gmra.mxu0 %v4488_v15  ;;  %v3795_v18 = vld [vmem:[%s4077_s19 + $0x224] sm:$0xf]  ;;  %v3010_v19 = vld [vmem:[%s4077_s19 + $0x228] sm:$0xf0]  ;;  %v2810_v36 = vld [vmem:[%s4077_s19 + $0x98] sm:$0xf0] }
  0x93   : > { %2186 = vmatpush.bf16.msra.mxu0 %v2861_v27  ;;  %v2909_v27 = vor.u32 %v3769_v12, %v2906_v17  ;;  %2137 = vmatmul.bf16.vlgmr.msrb.gmra.mxu1 %v4490_v16  ;;  %v3763_v12 = vld [vmem:[%s4077_s19 + $0x124] sm:$0xf]  ;;  %v2882_v17 = vld [vmem:[%s4077_s19 + $0x128] sm:$0xf0] }
  0x94   : > { %2205 = vmatpush.bf16.msra.mxu1 %v2925_v42  ;;  %2156 = vmatmul.bf16.vlgmr.msrb.gmra.mxu2 %v4495_v20  ;;  %v2954_v42 = vld [vmem:[%s4077_s19 + $0x1b8] sm:$0xf0] }
  0x95   : > { %2224 = vmatpush.bf16.msra.mxu2 %v2989_v26  ;;  %v2962_v26 = vld [vmem:[%s4077_s19 + $0x1c8] sm:$0xf0]  ;;  %2175 = vmatmul.bf16.vlgmr.msrb.gmra.mxu3 %v4164_v48  ;;  %v2890_v48 = vld [vmem:[%s4077_s19 + $0x138] sm:$0xf0]  ;;  %v2957_v60 = vor.u32 %v3781_v41, %v2954_v42 }
  0x96   : > { %2243 = vmatpush.bf16.msra.mxu3 %v3053_v43  ;;  %v2965_v37 = vor.u32 %v3783_v25, %v2962_v26  ;;  %v2901_v43 = vor.u32 %v3767_v33, %v2898_v34  ;;  %v2732_v25 = vld [vmem:[%s4140_s23 + $0xb0] sm:$0xf]  ;;  %v3726_v26 = vld [vmem:[%s4140_s23 + $0xe8] sm:$0xf0]  ;;  %v2885_v33 = vor.u32 %v3763_v12, %v2882_v17  ;;  %v3013_v34 = vor.u32 %v3795_v18, %v3010_v19  ;;  %v2874_v42 = vld [vmem:[%s4077_s19 + $0x118] sm:$0xf0] }
  0x97   : > { %2187 = vmatpush.bf16.msra.mxu0 %v2853_v52  ;;  %v2826_v52 = vld [vmem:[%s4077_s19 + $0xb8] sm:$0xf0]  ;;  %v3837_v17 = vld [vmem:[%s4077_s19 + $0x374] sm:$0xf] }
  0x98   : > { %2206 = vmatpush.bf16.msra.mxu1 %v2917_v4  ;;  %v2893_v4 = vor.u32 %v3765_v55, %v2890_v48  ;;  %v2930_v55 = vld [vmem:[%s4077_s19 + $0x188] sm:$0xf0]  ;;  %v2941_v48 = vor.u32 %v3777_v31, %v2938_v32  ;;  %v3114_v12 = vld [vmem:[%s4077_s19 + $0x2f8] sm:$0xf0]  ;;  %v3851_v32 = vld [vmem:[%s4077_s19 + $0x3e4] sm:$0xf] }
  0x99   : > { %2225 = vmatpush.bf16.msra.mxu2 %v2981_v49  ;;  %v3749_v49 = vld [vmem:[%s4077_s19 + $0xb4] sm:$0xf] }
  0x9a   : > { %2244 = vmatpush.bf16.msra.mxu3 %v3045_v7  ;;  %v2829_v61 = vor.u32 %v3749_v49, %v2826_v52  ;;  %v3021_v7 = vor.u32 %v3797_v58, %v3018_v59  ;;  %v4543_v49 = vor.u32 %v3726_v26, %v2732_v25  ;;  %v3775_v52 = vld [vmem:[%s4077_s19 + $0x184] sm:$0xf]  ;;  %v2813_v58 = vor.u32 %v3745_v35, %v2810_v36  ;;  %v3306_v25 = vld [vmem:[%s4077_s19 + $0x478] sm:$0xf0] }
  0x9b   : > { %2188 = vmatpush.bf16.msra.mxu0 %v2845_v22  ;;  %v2726_v22 = vld [vmem:[%s4140_s23 + $0xe4] sm:$0xf0]  ;;  %v3743_v59 = vld [vmem:[%s4077_s19 + $0x84] sm:$0xf]  ;;  %v2933_v18 = vor.u32 %v3775_v52, %v2930_v55  ;;  %v3298_v52 = vld [vmem:[%s4077_s19 + $0x468] sm:$0xf0] }
  0x9c   : > { %2207 = vmatpush.bf16.msra.mxu1 %v2909_v27  ;;  %v2949_v27 = vor.u32 %v3779_v62, %v2946_v63  ;;  %v3759_v63 = vld [vmem:[%s4077_s19 + $0x104] sm:$0xf] }
  0x9d   : > { %2226 = vmatpush.bf16.msra.mxu2 %v2973_v21  ;;  %v3718_v21 = vld [vmem:[%s4140_s23 + $0xac] sm:$0xf]  ;;  %v3819_v36 = vld [vmem:[%s4077_s19 + $0x2e4] sm:$0xf] }
  0x9e   : > { %2245 = vmatpush.bf16.msra.mxu3 %v3037_v30  ;;  %v2821_v30 = vor.u32 %v3747_v10, %v2818_v11  ;;  %v4538_v41 = vor.u32 %v3718_v21, %v2726_v22  ;;  %v3242_v10 = vld [vmem:[%s4077_s19 + $0x3f8] sm:$0xf0]  ;;  %v3821_v11 = vld [vmem:[%s4077_s19 + $0x2f4] sm:$0xf] }
  0x9f   : > { %2189 = vmatpush.bf16.msra.mxu0 %v2837_v38  ;;  %v4536_v38 = vor.u32 %v3725_v3, %v2724_v2  ;;  %v2866_v2 = vld [vmem:[%s4077_s19 + $0x108] sm:$0xf0]  ;;  %v3791_v3 = vld [vmem:[%s4077_s19 + $0x204] sm:$0xf]  ;;  %v3178_v21 = vld [vmem:[%s4077_s19 + $0x378] sm:$0xf0]  ;;  %v3117_v31 = vor.u32 %v3821_v11, %v3114_v12 }
  0xa0   : > { %2208 = vmatpush.bf16.msra.mxu1 %v2901_v43  ;;  %v3793_v43 = vld [vmem:[%s4077_s19 + $0x214] sm:$0xf]  ;;  %v3290_v11 = vld [vmem:[%s4077_s19 + $0x458] sm:$0xf0] }
  0xa1   : > { %2227 = vmatpush.bf16.msra.mxu2 %v2965_v37  ;;  %v3761_v37 = vld [vmem:[%s4077_s19 + $0x114] sm:$0xf] }
  0xa2   : > { %2246 = vmatpush.bf16.msra.mxu3 %v3029_v47  ;;  %v3002_v47 = vld [vmem:[%s4077_s19 + $0x218] sm:$0xf0]  ;;  %2123 = vmatmul.bf16.gmra.mxu0 %v4536_v38  ;;  %v3869_v22 = vld [vmem:[%s4077_s19 + $0x474] sm:$0xf] }
  0xa3   : > { %2190 = vmatpush.bf16.msra.mxu0 %v2829_v61  ;;  %v2877_v61 = vor.u32 %v3761_v37, %v2874_v42  ;;  %v3005_v62 = vor.u32 %v3793_v43, %v3002_v47  ;;  %2142 = vmatmul.bf16.gmra.mxu1 %v4538_v41  ;;  %v3309_v35 = vor.u32 %v3869_v22, %v3306_v25  ;;  %v3106_v37 = vld [vmem:[%s4077_s19 + $0x2e8] sm:$0xf0]  ;;  %v3835_v42 = vld [vmem:[%s4077_s19 + $0x364] sm:$0xf] }
  0xa4   : > { %2209 = vmatpush.bf16.msra.mxu1 %v2893_v4  ;;  %v2994_v4 = vld [vmem:[%s4077_s19 + $0x208] sm:$0xf0]  ;;  %2161 = vmatmul.bf16.gmra.mxu2 %v4543_v49  ;;  %v3867_v47 = vld [vmem:[%s4077_s19 + $0x464] sm:$0xf] }
  0xa5   : > { %2228 = vmatpush.bf16.msra.mxu2 %v2957_v60  ;;  %v2802_v60 = vld [vmem:[%s4077_s19 + $0x88] sm:$0xf0]  ;;  %2180 = vmatmul.bf16.gmra.mxu3 %v4216_v44  ;;  %v2869_v44 = vor.u32 %v3759_v63, %v2866_v2  ;;  %v2997_v26 = vor.u32 %v3791_v3, %v2994_v4  ;;  %v3817_v63 = vld [vmem:[%s4077_s19 + $0x2d4] sm:$0xf]  ;;  %v3098_v2 = vld [vmem:[%s4077_s19 + $0x2d8] sm:$0xf0] }
  0xa6   : > { %2247 = vmatpush.bf16.msra.mxu3 %v3021_v7  ;;  %v3853_v7 = vld [vmem:[%s4077_s19 + $0x3f4] sm:$0xf]  ;;  %v2805_v19 = vor.u32 %v3743_v59, %v2802_v60  ;;  %v3170_v43 = vld [vmem:[%s4077_s19 + $0x368] sm:$0xf0]  ;;  %v3301_v60 = vor.u32 %v3867_v47, %v3298_v52 }
  0xa7   : > { %2191 = vmatpush.bf16.msra.mxu0 %v2821_v30  ;;  %v3245_v30 = vor.u32 %v3853_v7, %v3242_v10  ;;  %v3173_v59 = vor.u32 %v3835_v42, %v3170_v43  ;;  %v3833_v3 = vld [vmem:[%s4077_s19 + $0x354] sm:$0xf]  ;;  %v3162_v7 = vld [vmem:[%s4077_s19 + $0x358] sm:$0xf0]  ;;  %v3218_v22 = vld [vmem:[%s4077_s19 + $0x3c8] sm:$0xf0] }
  0xa8   : > { %2210 = vmatpush.bf16.msra.mxu1 %v2885_v33  ;;  %v3234_v33 = vld [vmem:[%s4077_s19 + $0x3e8] sm:$0xf0]  ;;  %v3865_v10 = vld [vmem:[%s4077_s19 + $0x454] sm:$0xf]  ;;  %v3210_v42 = vld [vmem:[%s4077_s19 + $0x3b8] sm:$0xf0] }
  0xa9   : > { %2229 = vmatpush.bf16.msra.mxu2 %v2949_v27  ;;  %v4569_v27 = vld [vmem:[%s240_s27] sm:$0x3]  ;;  %v3237_v55 = vor.u32 %v3851_v32, %v3234_v33  ;;  %v3831_v32 = vld [vmem:[%s4077_s19 + $0x344] sm:$0xf]  ;;  %v3154_v33 = vld [vmem:[%s4077_s19 + $0x348] sm:$0xf0] }
  0xaa   : > { %2248 = vmatpush.bf16.msra.mxu3 %v3013_v34  ;;  %v3181_v34 = vor.u32 %v3837_v17, %v3178_v21  ;;  %v3847_v21 = vld [vmem:[%s4077_s19 + $0x3c4] sm:$0xf]  ;;  %v3157_v43 = vor.u32 %v3831_v32, %v3154_v33  ;;  %v3813_v52 = vld [vmem:[%s4077_s19 + $0x2b4] sm:$0xf]  ;;  %v3194_v33 = vld [vmem:[%s4077_s19 + $0x398] sm:$0xf0] }
  0xab   : > { %2192 = vmatpush.bf16.msra.mxu0 %v2813_v58  ;;  %v4580_v58 = vperm.slane %v4569_v27, 0  ;;  %v3841_v32 = vld [vmem:[%s4077_s19 + $0x394] sm:$0xf] }
  0xac   : > { %2211 = vmatpush.bf16.msra.mxu1 %v2877_v61  ;;  %v3849_v61 = vld [vmem:[%s4077_s19 + $0x3d4] sm:$0xf] }
  0xad   : > { %2230 = vmatpush.bf16.msra.mxu2 %v2941_v48  ;;  %v3109_v48 = vor.u32 %v3819_v36, %v3106_v37  ;;  %v3221_v36 = vor.u32 %v3847_v21, %v3218_v22  ;;  %v3074_v21 = vld [vmem:[%s4077_s19 + $0x2a8] sm:$0xf0]  ;;  %v3827_v22 = vld [vmem:[%s4077_s19 + $0x324] sm:$0xf] }
  0xae   : > { %2249 = vmatpush.bf16.msra.mxu3 %v3005_v62  ;;  %v3226_v62 = vld [vmem:[%s4077_s19 + $0x3d8] sm:$0xf0] }
  0xaf   : > { %2193 = vmatpush.bf16.msra.mxu0 %v2805_v19  ;;  %v1891_v4 = vpop.f32.mrf.mxu0  ;;  %v3101_v19 = vor.u32 %v3817_v63, %v3098_v2 }
  0xb0   : > { %2212 = vmatpush.bf16.msra.mxu1 %v2869_v44  ;;  %v1892_v12 = vadd.f32 %v1891_v4, %v4580_v58  ;;  %v1910_v17 = vpop.f32.mrf.mxu1  ;;  %v3165_v44 = vor.u32 %v3833_v3, %v3162_v7 }
  0xb1   : > { %2231 = vmatpush.bf16.msra.mxu2 %v2933_v18  ;;  %v3229_v18 = vor.u32 %v3849_v61, %v3226_v62  ;;  %v3861_v61 = vld [vmem:[%s4077_s19 + $0x434] sm:$0xf]  ;;  %v3274_v62 = vld [vmem:[%s4077_s19 + $0x438] sm:$0xf0] }
  0xb2   : > { %2250 = vmatpush.bf16.msra.mxu3 %v2997_v26  ;;  %v1911_v25 = vadd.f32 %v1910_v17, %v1892_v12  ;;  %v3293_v26 = vor.u32 %v3865_v10, %v3290_v11  ;;  %2194 = vmatmul.bf16.vlgmr.msra.gmra.mxu0 %v4169_v53  ;;  %v3845_v53 = vld [vmem:[%s4077_s19 + $0x3b4] sm:$0xf]  ;;  %v3843_v10 = vld [vmem:[%s4077_s19 + $0x3a4] sm:$0xf]  ;;  %v3202_v11 = vld [vmem:[%s4077_s19 + $0x3a8] sm:$0xf0] }
  0xb3   : > { %2262 = vmatpush.bf16.msrb.mxu0 %v3117_v31  ;;  %v3090_v31 = vld [vmem:[%s4077_s19 + $0x2c8] sm:$0xf0]  ;;  %2213 = vmatmul.bf16.vlgmr.msra.gmra.mxu1 %v4171_v54  ;;  %v3213_v4 = vor.u32 %v3845_v53, %v3210_v42  ;;  %v3066_v53 = vld [vmem:[%s4077_s19 + $0x298] sm:$0xf0]  ;;  %v3825_v42 = vld [vmem:[%s4077_s19 + $0x314] sm:$0xf] }
  0xb4   : > { %2281 = vmatpush.bf16.msrb.mxu1 %v3181_v34  ;;  %v3863_v34 = vld [vmem:[%s4077_s19 + $0x444] sm:$0xf]  ;;  %2232 = vmatmul.bf16.vlgmr.msra.gmra.mxu2 %v4175_v57  ;;  %v3829_v57 = vld [vmem:[%s4077_s19 + $0x334] sm:$0xf] }
  0xb5   : > { %2300 = vmatpush.bf16.msrb.mxu2 %v3245_v30  ;;  %v3815_v30 = vld [vmem:[%s4077_s19 + $0x2c4] sm:$0xf]  ;;  %2251 = vmatmul.bf16.vlgmr.msra.gmra.mxu3 %v4276_v0 }
  0xb6   : > { %2319 = vmatpush.bf16.msrb.mxu3 %v3309_v35  ;;  %v3282_v35 = vld [vmem:[%s4077_s19 + $0x448] sm:$0xf0]  ;;  %v3093_v37 = vor.u32 %v3815_v30, %v3090_v31  ;;  %v3205_v30 = vor.u32 %v3843_v10, %v3202_v11 }
  0xb7   : > { %2263 = vmatpush.bf16.msrb.mxu0 %v3109_v48  ;;  %v1929_v54 = vpop.f32.mrf.mxu2  ;;  %v3285_v47 = vor.u32 %v3863_v34, %v3282_v35 }
  0xb8   : > { %2282 = vmatpush.bf16.msrb.mxu1 %v3173_v59  ;;  %v1930_v0 = vadd.f32 %v1929_v54, %v1911_v25  ;;  %v1948_v48 = vpop.f32.mrf.mxu3  ;;  %v1893_v59 = vpop.f32.mrf.mxu0  ;;  %v3138_v25 = vld [vmem:[%s4077_s19 + $0x328] sm:$0xf0] }
  0xb9   : > { %2301 = vmatpush.bf16.msrb.mxu2 %v3237_v55  ;;  %v3082_v55 = vld [vmem:[%s4077_s19 + $0x2b8] sm:$0xf0]  ;;  %v1894_v63 = vadd.f32 %v1893_v59, %v4580_v58  ;;  %v1912_v2 = vpop.f32.mrf.mxu1  ;;  %v3141_v35 = vor.u32 %v3827_v22, %v3138_v25  ;;  %v3839_v59 = vld [vmem:[%s4077_s19 + $0x384] sm:$0xf]  ;;  %v3885_v25 = vld [vmem:[%s4077_s19 + $0x4f4] sm:$0xf] }
  0xba   : > { %2320 = vmatpush.bf16.msrb.mxu3 %v3301_v60  ;;  %v3146_v60 = vld [vmem:[%s4077_s19 + $0x338] sm:$0xf0]  ;;  %v4612_v3 = vadd.f32 %v1948_v48, %v1930_v0  ;;  %v3085_v7 = vor.u32 %v3813_v52, %v3082_v55  ;;  %v3857_v55 = vld [vmem:[%s4077_s19 + $0x414] sm:$0xf] }
  0xbb   : > { %2264 = vmatpush.bf16.msrb.mxu0 %v3101_v19  ;;  %v1913_v12 = vadd.f32 %v1912_v2, %v1894_v63  ;;  %v3149_v17 = vor.u32 %v3829_v57, %v3146_v60  ;;  %v3811_v19 = vld [vmem:[%s4077_s19 + $0x2a4] sm:$0xf]  ;;  %v3130_v52 = vld [vmem:[%s4077_s19 + $0x318] sm:$0xf0]  ;;  %v3186_v63 = vld [vmem:[%s4077_s19 + $0x388] sm:$0xf0] }
  0xbc   : > { %2283 = vmatpush.bf16.msrb.mxu1 %v3165_v44  ;;  %v3859_v44 = vld [vmem:[%s4077_s19 + $0x424] sm:$0xf]  ;;  %v3077_v31 = vor.u32 %v3811_v19, %v3074_v21  ;;  %v3258_v57 = vld [vmem:[%s4077_s19 + $0x418] sm:$0xf0]  ;;  %v3133_v10 = vor.u32 %v3825_v42, %v3130_v52  ;;  %v3250_v19 = vld [vmem:[%s4077_s19 + $0x408] sm:$0xf0] }
  0xbd   : > { %2302 = vmatpush.bf16.msrb.mxu2 %v3229_v18  ;;  %v3277_v18 = vor.u32 %v3861_v61, %v3274_v62  ;;  %v3197_v61 = vor.u32 %v3841_v32, %v3194_v33  ;;  %v3807_v2 = vld [vmem:[%s4077_s19 + $0x284] sm:$0xf]  ;;  %v3261_v11 = vor.u32 %v3857_v55, %v3258_v57  ;;  %v3917_v21 = vld [vmem:[%s4077_s19 + $0x5f4] sm:$0xf]  ;;  %v3498_v22 = vld [vmem:[%s4077_s19 + $0x5f8] sm:$0xf0] }
  0xbe   : > { %2321 = vmatpush.bf16.msrb.mxu3 %v3293_v26  ;;  %v3266_v26 = vld [vmem:[%s4077_s19 + $0x428] sm:$0xf0]  ;;  %v3933_v32 = vld [vmem:[%s4077_s19 + $0x674] sm:$0xf]  ;;  %v3562_v33 = vld [vmem:[%s4077_s19 + $0x678] sm:$0xf0] }
  0xbf   : > { %2265 = vmatpush.bf16.msrb.mxu0 %v3093_v37  ;;  %v1931_v34 = vpop.f32.mrf.mxu2  ;;  %v3809_v37 = vld [vmem:[%s4077_s19 + $0x294] sm:$0xf]  ;;  %v3915_v42 = vld [vmem:[%s4077_s19 + $0x5e4] sm:$0xf]  ;;  %v3565_v55 = vor.u32 %v3933_v32, %v3562_v33 }
  0xc0   : > { %2284 = vmatpush.bf16.msrb.mxu1 %v3157_v43  ;;  %v1932_v54 = vadd.f32 %v1931_v34, %v1913_v12  ;;  %v1950_v43 = vpop.f32.mrf.mxu3  ;;  %v3069_v62 = vor.u32 %v3809_v37, %v3066_v53  ;;  %v3823_v12 = vld [vmem:[%s4077_s19 + $0x304] sm:$0xf]  ;;  %v3501_v37 = vor.u32 %v3917_v21, %v3498_v22  ;;  %v3897_v21 = vld [vmem:[%s4077_s19 + $0x554] sm:$0xf] }
  0xc1   : > { %2303 = vmatpush.bf16.msrb.mxu2 %v3221_v36  ;;  %v3269_v36 = vor.u32 %v3859_v44, %v3266_v26  ;;  %v1915_v48 = vpop.f32.mrf.mxu1  ;;  %v3370_v44 = vld [vmem:[%s4077_s19 + $0x4f8] sm:$0xf0]  ;;  %v3901_v26 = vld [vmem:[%s4077_s19 + $0x574] sm:$0xf]  ;;  %v3883_v57 = vld [vmem:[%s4077_s19 + $0x4e4] sm:$0xf] }
  0xc2   : > { %2322 = vmatpush.bf16.msrb.mxu3 %v3285_v47  ;;  %v1896_v47 = vpop.f32.mrf.mxu0  ;;  %v4632_v60 = vadd.f32 %v1950_v43, %v1932_v54  ;;  %2199 = vmatmul.bf16.gmra.mxu0 %v4221_v50  ;;  %v3434_v50 = vld [vmem:[%s4077_s19 + $0x578] sm:$0xf0]  ;;  %v3373_v53 = vor.u32 %v3885_v25, %v3370_v44  ;;  %v3490_v54 = vld [vmem:[%s4077_s19 + $0x5e8] sm:$0xf0] }
  0xc3   : > { %2266 = vmatpush.bf16.msrb.mxu0 %v3085_v7  ;;  %v1897_v0 = vadd.f32 %v1896_v47, %v4580_v58  ;;  %2218 = vmatmul.bf16.gmra.mxu1 %v4223_v51  ;;  %v3437_v52 = vor.u32 %v3901_v26, %v3434_v50  ;;  %v3418_v44 = vld [vmem:[%s4077_s19 + $0x558] sm:$0xf0]  ;;  %v3929_v26 = vld [vmem:[%s4077_s19 + $0x654] sm:$0xf] }
  0xc4   : > { %2285 = vmatpush.bf16.msrb.mxu1 %v3149_v17  ;;  %v3122_v17 = vld [vmem:[%s4077_s19 + $0x308] sm:$0xf0]  ;;  %2237 = vmatmul.bf16.gmra.mxu2 %v4227_v56 }
  0xc5   : > { %2304 = vmatpush.bf16.msrb.mxu2 %v3213_v4  ;;  %v3058_v4 = vld [vmem:[%s4077_s19 + $0x288] sm:$0xf0]  ;;  %v1916_v7 = vadd.f32 %v1915_v48, %v1897_v0  ;;  %2256 = vmatmul.bf16.gmra.mxu3 %v4328_v8  ;;  %v3125_v56 = vor.u32 %v3823_v12, %v3122_v17  ;;  %v3899_v48 = vld [vmem:[%s4077_s19 + $0x564] sm:$0xf]  ;;  %v3482_v12 = vld [vmem:[%s4077_s19 + $0x5d8] sm:$0xf0] }
  0xc6   : > { %2323 = vmatpush.bf16.msrb.mxu3 %v3277_v18  ;;  %v3855_v18 = vld [vmem:[%s4077_s19 + $0x404] sm:$0xf]  ;;  %v3362_v0 = vld [vmem:[%s4077_s19 + $0x4e8] sm:$0xf0] }
  0xc7   : > { %2267 = vmatpush.bf16.msrb.mxu0 %v3077_v31  ;;  %v3061_v31 = vor.u32 %v3807_v2, %v3058_v4  ;;  %v1934_v51 = vpop.f32.mrf.mxu2  ;;  %v3253_v8 = vor.u32 %v3855_v18, %v3250_v19  ;;  %v3365_v4 = vor.u32 %v3883_v57, %v3362_v0  ;;  %v3881_v18 = vld [vmem:[%s4077_s19 + $0x4d4] sm:$0xf]  ;;  %v3354_v19 = vld [vmem:[%s4077_s19 + $0x4d8] sm:$0xf0] }
  0xc8   : > { %2286 = vmatpush.bf16.msrb.mxu1 %v3141_v35  ;;  %v1935_v34 = vadd.f32 %v1934_v51, %v1916_v7  ;;  %v1953_v35 = vpop.f32.mrf.mxu3  ;;  %v3466_v57 = vld [vmem:[%s4077_s19 + $0x5b8] sm:$0xf0] }
  0xc9   : > { %2305 = vmatpush.bf16.msrb.mxu2 %v3205_v30  ;;  %v3189_v30 = vor.u32 %v3839_v59, %v3186_v63  ;;  %v1917_v47 = vpop.f32.mrf.mxu1  ;;  %v3554_v63 = vld [vmem:[%s4077_s19 + $0x668] sm:$0xf0] }
  0xca   : > { %2324 = vmatpush.bf16.msrb.mxu3 %v3269_v36  ;;  %v1898_v36 = vpop.f32.mrf.mxu0  ;;  %v4659_v59 = vadd.f32 %v1953_v35, %v1935_v34  ;;  %v3474_v34 = vld [vmem:[%s4077_s19 + $0x5c8] sm:$0xf0]  ;;  %v3421_v35 = vor.u32 %v3897_v21, %v3418_v44  ;;  %v3875_v44 = vld [vmem:[%s4077_s19 + $0x4a4] sm:$0xf] }
  0xcb   : > { %2268 = vmatpush.bf16.msrb.mxu0 %v3069_v62  ;;  %v1899_v43 = vadd.f32 %v1898_v36, %v4580_v58  ;;  %v3931_v62 = vld [vmem:[%s4077_s19 + $0x664] sm:$0xf]  ;;  %v3493_v58 = vor.u32 %v3915_v42, %v3490_v54 }
  0xcc   : > { %2287 = vmatpush.bf16.msrb.mxu1 %v3133_v10  ;;  %v3557_v10 = vor.u32 %v3931_v62, %v3554_v63  ;;  %v3895_v42 = vld [vmem:[%s4077_s19 + $0x544] sm:$0xf]  ;;  %v3402_v63 = vld [vmem:[%s4077_s19 + $0x538] sm:$0xf0] }
  0xcd   : > { %2306 = vmatpush.bf16.msrb.mxu2 %v3197_v61  ;;  %v3426_v61 = vld [vmem:[%s4077_s19 + $0x568] sm:$0xf0]  ;;  %v1918_v2 = vadd.f32 %v1917_v47, %v1899_v43 }
  0xce   : > { %2325 = vmatpush.bf16.msrb.mxu3 %v3261_v11  ;;  %v3429_v7 = vor.u32 %v3899_v48, %v3426_v61  ;;  %v3913_v11 = vld [vmem:[%s4077_s19 + $0x5d4] sm:$0xf]  ;;  %v3410_v43 = vld [vmem:[%s4077_s19 + $0x548] sm:$0xf0]  ;;  %v3338_v61 = vld [vmem:[%s4077_s19 + $0x4b8] sm:$0xf0] }
  0xcf   : > { %2269 = vmatpush.bf16.msrb.mxu0 %v3061_v31  ;;  %v1936_v17 = vpop.f32.mrf.mxu2  ;;  %v3485_v51 = vor.u32 %v3913_v11, %v3482_v12  ;;  %v3538_v47 = vld [vmem:[%s4077_s19 + $0x648] sm:$0xf0]  ;;  %v3877_v48 = vld [vmem:[%s4077_s19 + $0x4b4] sm:$0xf] }
  0xd0   : > { %2288 = vmatpush.bf16.msrb.mxu1 %v3125_v56  ;;  %v1937_v22 = vadd.f32 %v1936_v17, %v1918_v2  ;;  %v1955_v25 = vpop.f32.mrf.mxu3  ;;  %v3357_v56 = vor.u32 %v3881_v18, %v3354_v19  ;;  %v3925_v2 = vld [vmem:[%s4077_s19 + $0x634] sm:$0xf]  ;;  %v3341_v17 = vor.u32 %v3877_v48, %v3338_v61  ;;  %v3907_v18 = vld [vmem:[%s4077_s19 + $0x5a4] sm:$0xf]  ;;  %v3458_v19 = vld [vmem:[%s4077_s19 + $0x5a8] sm:$0xf0] }
  0xd1   : > { %2307 = vmatpush.bf16.msrb.mxu2 %v3189_v30  ;;  %v3546_v30 = vld [vmem:[%s4077_s19 + $0x658] sm:$0xf0]  ;;  %v1986_v50 = vpop.f32.mrf.mxu1  ;;  %v3903_v61 = vld [vmem:[%s4077_s19 + $0x584] sm:$0xf] }
  0xd2   : > { %2326 = vmatpush.bf16.msrb.mxu3 %v3253_v8  ;;  %v1967_v31 = vpop.f32.mrf.mxu0  ;;  %v4672_v32 = vadd.f32 %v1955_v25, %v1937_v22  ;;  %v3911_v8 = vld [vmem:[%s4077_s19 + $0x5c4] sm:$0xf]  ;;  %v3549_v36 = vor.u32 %v3929_v26, %v3546_v30  ;;  %2270 = vmatmul.bf16.vlgmr.msrb.gmra.mxu0 %v4278_v1  ;;  %v3909_v1 = vld [vmem:[%s4077_s19 + $0x5b4] sm:$0xf]  ;;  %v3330_v26 = vld [vmem:[%s4077_s19 + $0x4a8] sm:$0xf0] }
  0xd3   : > { %2338 = vmatpush.bf16.msra.mxu0 %v3373_v53  ;;  %v1968_v33 = vadd.f32 %v1967_v31, %v4612_v3  ;;  %v3346_v53 = vld [vmem:[%s4077_s19 + $0x4c8] sm:$0xf0]  ;;  %2289 = vmatmul.bf16.vlgmr.msrb.gmra.mxu1 %v4283_v5  ;;  %v3927_v3 = vld [vmem:[%s4077_s19 + $0x644] sm:$0xf]  ;;  %v3413_v5 = vor.u32 %v3895_v42, %v3410_v43  ;;  %v3469_v12 = vor.u32 %v3909_v1, %v3466_v57  ;;  %v3889_v42 = vld [vmem:[%s4077_s19 + $0x514] sm:$0xf] }
  0xd4   : > { %2357 = vmatpush.bf16.msra.mxu1 %v3437_v52  ;;  %2308 = vmatmul.bf16.vlgmr.msrb.gmra.mxu2 %v4285_v6  ;;  %v3477_v52 = vor.u32 %v3911_v8, %v3474_v34  ;;  %v3541_v0 = vor.u32 %v3927_v3, %v3538_v47  ;;  %v3893_v6 = vld [vmem:[%s4077_s19 + $0x534] sm:$0xf]  ;;  %v3394_v31 = vld [vmem:[%s4077_s19 + $0x528] sm:$0xf0]  ;;  %v3450_v34 = vld [vmem:[%s4077_s19 + $0x598] sm:$0xf0] }
  0xd5   : > { %2376 = vmatpush.bf16.msra.mxu2 %v3501_v37  ;;  %v3879_v37 = vld [vmem:[%s4077_s19 + $0x4c4] sm:$0xf]  ;;  %v1987_v54 = vadd.f32 %v1986_v50, %v1968_v33  ;;  %2327 = vmatmul.bf16.vlgmr.msrb.gmra.mxu3 %v4382_v23  ;;  %v3405_v22 = vor.u32 %v3893_v6, %v3402_v63  ;;  %v3522_v33 = vld [vmem:[%s4077_s19 + $0x628] sm:$0xf0]  ;;  %v3905_v8 = vld [vmem:[%s4077_s19 + $0x594] sm:$0xf] }
  0xd6   : > { %2395 = vmatpush.bf16.msra.mxu3 %v3565_v55  ;;  %v3349_v55 = vor.u32 %v3879_v37, %v3346_v53  ;;  %v3923_v50 = vld [vmem:[%s4077_s19 + $0x624] sm:$0xf]  ;;  %v3873_v37 = vld [vmem:[%s4077_s19 + $0x494] sm:$0xf]  ;;  %v3322_v53 = vld [vmem:[%s4077_s19 + $0x498] sm:$0xf0] }
  0xd7   : > { %2339 = vmatpush.bf16.msra.mxu0 %v3365_v4  ;;  %v2005_v62 = vpop.f32.mrf.mxu2  ;;  %v3386_v3 = vld [vmem:[%s4077_s19 + $0x518] sm:$0xf0]  ;;  %v3921_v47 = vld [vmem:[%s4077_s19 + $0x614] sm:$0xf]  ;;  %v3325_v48 = vor.u32 %v3873_v37, %v3322_v53  ;;  %v3442_v6 = vld [vmem:[%s4077_s19 + $0x588] sm:$0xf0] }
  0xd8   : > { %2358 = vmatpush.bf16.msra.mxu1 %v3429_v7  ;;  %v2024_v23 = vpop.f32.mrf.mxu3  ;;  %v2006_v4 = vadd.f32 %v2005_v62, %v1987_v54  ;;  %v3945_v53 = vld [vmem:[%s4077_s19 + $0x6d4] sm:$0xf] }
  0xd9   : > { %2377 = vmatpush.bf16.msra.mxu2 %v3493_v58  ;;  %v3530_v58 = vld [vmem:[%s4077_s19 + $0x638] sm:$0xf0] }
  0xda   : > { %2396 = vmatpush.bf16.msra.mxu3 %v3557_v10  ;;  %v1969_v7 = vpop.f32.mrf.mxu0  ;;  %v1988_v10 = vpop.f32.mrf.mxu1  ;;  %v4698_v21 = vadd.f32 %v2024_v23, %v2006_v4  ;;  %v3533_v25 = vor.u32 %v3925_v2, %v3530_v58  ;;  %v3389_v23 = vor.u32 %v3889_v42, %v3386_v3  ;;  %v3871_v2 = vld [vmem:[%s4077_s19 + $0x484] sm:$0xf]  ;;  %v3314_v58 = vld [vmem:[%s4077_s19 + $0x488] sm:$0xf0]  ;;  %v3674_v3 = vld [vmem:[%s4077_s19 + $0x758] sm:$0xf0] }
  0xdb   : > { %2340 = vmatpush.bf16.msra.mxu0 %v3357_v56  ;;  %v1970_v11 = vadd.f32 %v1969_v7, %v4632_v60  ;;  %v3891_v60 = vld [vmem:[%s4077_s19 + $0x524] sm:$0xf]  ;;  %v3333_v56 = vor.u32 %v3875_v44, %v3330_v26  ;;  %v3378_v7 = vld [vmem:[%s4077_s19 + $0x508] sm:$0xf0] }
  0xdc   : > { %2359 = vmatpush.bf16.msra.mxu1 %v3421_v35  ;;  %v3397_v35 = vor.u32 %v3891_v60, %v3394_v31 }
  0xdd   : > { %2378 = vmatpush.bf16.msra.mxu2 %v3485_v51  ;;  %v1989_v30 = vadd.f32 %v1988_v10, %v1970_v11  ;;  %v3461_v51 = vor.u32 %v3907_v18, %v3458_v19  ;;  %v3919_v10 = vld [vmem:[%s4077_s19 + $0x604] sm:$0xf]  ;;  %v3506_v11 = vld [vmem:[%s4077_s19 + $0x608] sm:$0xf0]  ;;  %v3445_v18 = vor.u32 %v3903_v61, %v3442_v6  ;;  %v3317_v19 = vor.u32 %v3871_v2, %v3314_v58  ;;  %v3941_v58 = vld [vmem:[%s4077_s19 + $0x6b4] sm:$0xf] }
  0xde   : > { %2397 = vmatpush.bf16.msra.mxu3 %v3549_v36  ;;  %v3525_v36 = vor.u32 %v3923_v50, %v3522_v33  ;;  %v3947_v50 = vld [vmem:[%s4077_s19 + $0x6e4] sm:$0xf]  ;;  %v3618_v33 = vld [vmem:[%s4077_s19 + $0x6e8] sm:$0xf0] }
  0xdf   : > { %2341 = vmatpush.bf16.msra.mxu0 %v3349_v55  ;;  %v2007_v54 = vpop.f32.mrf.mxu2  ;;  %v3602_v61 = vld [vmem:[%s4077_s19 + $0x6c8] sm:$0xf0] }
  0xe0   : > { %2360 = vmatpush.bf16.msra.mxu1 %v3413_v5  ;;  %v2026_v43 = vpop.f32.mrf.mxu3  ;;  %v2008_v55 = vadd.f32 %v2007_v54, %v1989_v30 }
  0xe1   : > { %2379 = vmatpush.bf16.msra.mxu2 %v3477_v52  ;;  %v3514_v52 = vld [vmem:[%s4077_s19 + $0x618] sm:$0xf0] }
  0xe2   : > { %2398 = vmatpush.bf16.msra.mxu3 %v3541_v0  ;;  %v1972_v1 = vpop.f32.mrf.mxu0  ;;  %v1991_v57 = vpop.f32.mrf.mxu1  ;;  %v3453_v0 = vor.u32 %v3905_v8, %v3450_v34  ;;  %v4717_v62 = vadd.f32 %v2026_v43, %v2008_v55  ;;  %v3517_v63 = vor.u32 %v3921_v47, %v3514_v52  ;;  %2275 = vmatmul.bf16.gmra.mxu0 %v4330_v9  ;;  %v3682_v8 = vld [vmem:[%s4077_s19 + $0x768] sm:$0xf0]  ;;  %v3961_v43 = vld [vmem:[%s4077_s19 + $0x754] sm:$0xf] }
  0xe3   : > { %2342 = vmatpush.bf16.msra.mxu0 %v3341_v17  ;;  %v1973_v5 = vadd.f32 %v1972_v1, %v4659_v59  ;;  %v3887_v59 = vld [vmem:[%s4077_s19 + $0x504] sm:$0xf]  ;;  %2294 = vmatmul.bf16.gmra.mxu1 %v4335_v13  ;;  %v3626_v17 = vld [vmem:[%s4077_s19 + $0x6f8] sm:$0xf0]  ;;  %v3509_v13 = vor.u32 %v3919_v10, %v3506_v11 }
  0xe4   : > { %2361 = vmatpush.bf16.msra.mxu1 %v3405_v22  ;;  %2313 = vmatmul.bf16.gmra.mxu2 %v4337_v14  ;;  %v3965_v22 = vld [vmem:[%s4077_s19 + $0x774] sm:$0xf]  ;;  %v3381_v9 = vor.u32 %v3887_v59, %v3378_v7  ;;  %v3594_v59 = vld [vmem:[%s4077_s19 + $0x6b8] sm:$0xf0] }
  0xe5   : > { %2380 = vmatpush.bf16.msra.mxu2 %v3469_v12  ;;  %v1992_v4 = vadd.f32 %v1991_v57, %v1973_v5  ;;  %2332 = vmatmul.bf16.gmra.mxu3 %v4434_v39  ;;  %v3949_v12 = vld [vmem:[%s4077_s19 + $0x6f4] sm:$0xf]  ;;  %v3658_v7 = vld [vmem:[%s4077_s19 + $0x738] sm:$0xf0] }
  0xe6   : > { %2399 = vmatpush.bf16.msra.mxu3 %v3533_v25  ;;  %v3690_v25 = vld [vmem:[%s4077_s19 + $0x778] sm:$0xf0]  ;;  %v3629_v26 = vor.u32 %v3949_v12, %v3626_v17  ;;  %v3597_v12 = vor.u32 %v3941_v58, %v3594_v59 }
  0xe7   : > { %2343 = vmatpush.bf16.msra.mxu0 %v3333_v56  ;;  %v2010_v44 = vpop.f32.mrf.mxu2  ;;  %v3693_v31 = vor.u32 %v3965_v22, %v3690_v25  ;;  %v3963_v56 = vld [vmem:[%s4077_s19 + $0x764] sm:$0xf]  ;;  %v3586_v22 = vld [vmem:[%s4077_s19 + $0x6a8] sm:$0xf0] }
  0xe8   : > { %2362 = vmatpush.bf16.msra.mxu1 %v3397_v35  ;;  %v2029_v14 = vpop.f32.mrf.mxu3  ;;  %v2011_v39 = vadd.f32 %v2010_v44, %v1992_v4  ;;  %v3685_v37 = vor.u32 %v3963_v56, %v3682_v8 }
  0xe9   : > { %2381 = vmatpush.bf16.msra.mxu2 %v3461_v51 }
  0xea   : > { %2400 = vmatpush.bf16.msra.mxu3 %v3525_v36  ;;  %v1974_v60 = vpop.f32.mrf.mxu0  ;;  %v1993_v30 = vpop.f32.mrf.mxu1  ;;  %v4738_v34 = vadd.f32 %v2029_v14, %v2011_v39  ;;  %v3621_v36 = vor.u32 %v3947_v50, %v3618_v33  ;;  %v3937_v14 = vld [vmem:[%s4077_s19 + $0x694] sm:$0xf] }
  0xeb   : > { %2344 = vmatpush.bf16.msra.mxu0 %v3325_v48  ;;  %v1975_v51 = vadd.f32 %v1974_v60, %v4672_v32  ;;  %v3610_v32 = vld [vmem:[%s4077_s19 + $0x6d8] sm:$0xf0]  ;;  %v3943_v48 = vld [vmem:[%s4077_s19 + $0x6c4] sm:$0xf] }
  0xec   : > { %2363 = vmatpush.bf16.msra.mxu1 %v3389_v23  ;;  %v3613_v57 = vor.u32 %v3945_v53, %v3610_v32  ;;  %v3959_v23 = vld [vmem:[%s4077_s19 + $0x744] sm:$0xf]  ;;  %v3570_v53 = vld [vmem:[%s4077_s19 + $0x688] sm:$0xf0] }
  0xed   : > { %2382 = vmatpush.bf16.msra.mxu2 %v3453_v0  ;;  %v1994_v35 = vadd.f32 %v1993_v30, %v1975_v51  ;;  %v3677_v0 = vor.u32 %v3961_v43, %v3674_v3  ;;  %v3953_v30 = vld [vmem:[%s4077_s19 + $0x714] sm:$0xf] }
  0xee   : > { %2401 = vmatpush.bf16.msra.mxu3 %v3517_v63  ;;  %v3666_v63 = vld [vmem:[%s4077_s19 + $0x748] sm:$0xf0] }
  0xef   : > { %2345 = vmatpush.bf16.msra.mxu0 %v3317_v19  ;;  %v2012_v42 = vpop.f32.mrf.mxu2  ;;  %v3669_v2 = vor.u32 %v3959_v23, %v3666_v63  ;;  %v3939_v19 = vld [vmem:[%s4077_s19 + $0x6a4] sm:$0xf] }
  0xf0   : > { %2364 = vmatpush.bf16.msra.mxu1 %v3381_v9  ;;  %v2031_v54 = vpop.f32.mrf.mxu3  ;;  %v2013_v47 = vadd.f32 %v2012_v42, %v1994_v35  ;;  %v3955_v9 = vld [vmem:[%s4077_s19 + $0x724] sm:$0xf] }
  0xf1   : > { %2383 = vmatpush.bf16.msra.mxu2 %v3445_v18  ;;  %v3951_v42 = vld [vmem:[%s4077_s19 + $0x704] sm:$0xf] }
  0xf2   : > { %2402 = vmatpush.bf16.msra.mxu3 %v3509_v13  ;;  %v2043_v52 = vpop.f32.mrf.mxu0  ;;  %v2062_v55 = vpop.f32.mrf.mxu1  ;;  %v4745_v5 = vadd.f32 %v2031_v54, %v2013_v47  ;;  %2346 = vmatmul.bf16.vlgmr.msra.gmra.mxu0 %v4384_v24  ;;  %v3650_v13 = vld [vmem:[%s4077_s19 + $0x728] sm:$0xf0] }
  0xf3   : > { %2414 = vmatpush.bf16.msrb.mxu0 %v3629_v26  ;;  %v2044_v1 = vadd.f32 %v2043_v52, %v4698_v21  ;;  %2365 = vmatmul.bf16.vlgmr.msra.gmra.mxu1 %v4389_v28  ;;  %v3605_v21 = vor.u32 %v3943_v48, %v3602_v61  ;;  %v3957_v28 = vld [vmem:[%s4077_s19 + $0x734] sm:$0xf]  ;;  %v3653_v44 = vor.u32 %v3955_v9, %v3650_v13  ;;  %v3634_v54 = vld [vmem:[%s4077_s19 + $0x708] sm:$0xf0] }
  0xf4   : > { %2433 = vmatpush.bf16.msrb.mxu1 %v3693_v31  ;;  %2384 = vmatmul.bf16.vlgmr.msra.gmra.mxu2 %v4391_v29  ;;  %v3661_v18 = vor.u32 %v3957_v28, %v3658_v7  ;;  %v3637_v43 = vor.u32 %v3951_v42, %v3634_v54 }
  0xf5   : > { %3967 = vmatpush.bf16.msrb.mxu2 %v3629_v26  ;;  %v2063_v6 = vadd.f32 %v2062_v55, %v2044_v1  ;;  %2403 = vmatmul.bf16.vlgmr.msra.gmra.mxu3 %v4488_v15  ;;  %v3578_v26 = vld [vmem:[%s4077_s19 + $0x698] sm:$0xf0] }
  0xf6   : > { %3975 = vmatpush.bf16.msrb.mxu3 %v3693_v31  ;;  %v3642_v31 = vld [vmem:[%s4077_s19 + $0x718] sm:$0xf0]  ;;  %v3581_v8 = vor.u32 %v3937_v14, %v3578_v26 }
  0xf7   : > { %2415 = vmatpush.bf16.msrb.mxu0 %v3621_v36  ;;  %v2081_v24 = vpop.f32.mrf.mxu2 }
  0xf8   : > { %2434 = vmatpush.bf16.msrb.mxu1 %v3685_v37  ;;  %v2100_v4 = vpop.f32.mrf.mxu3  ;;  %v2082_v10 = vadd.f32 %v2081_v24, %v2063_v6 }
  0xf9   : > { %3968 = vmatpush.bf16.msrb.mxu2 %v3621_v36  ;;  %v3645_v36 = vor.u32 %v3953_v30, %v3642_v31 }
  0xfa   : > { %3976 = vmatpush.bf16.msrb.mxu3 %v3685_v37  ;;  %v2045_v29 = vpop.f32.mrf.mxu0  ;;  %v2064_v11 = vpop.f32.mrf.mxu1  ;;  %v4760_v17 = vadd.f32 %v2100_v4, %v2082_v10  ;;  %v3935_v37 = vld [vmem:[%s4077_s19 + $0x684] sm:$0xf] }
  0xfb   : > { %2416 = vmatpush.bf16.msrb.mxu0 %v3613_v57  ;;  %v2046_v15 = vadd.f32 %v2045_v29, %v4717_v62  ;;  %v3589_v62 = vor.u32 %v3939_v19, %v3586_v22  ;;  %v527_v19 = vperm.slane %v4569_v27, 1 }
  0xfc   : > { %2435 = vmatpush.bf16.msrb.mxu1 %v3677_v0 }
  0xfd   : > { %3969 = vmatpush.bf16.msrb.mxu2 %v3613_v57  ;;  %v2065_v25 = vadd.f32 %v2064_v11, %v2046_v15 }
  0xfe   : > { %3977 = vmatpush.bf16.msrb.mxu3 %v3677_v0 }
  0xff   : > { %2417 = vmatpush.bf16.msrb.mxu0 %v3605_v21  ;;  %v2083_v39 = vpop.f32.mrf.mxu2 }
 0x100   : > { %2436 = vmatpush.bf16.msrb.mxu1 %v3669_v2  ;;  %v2102_v60 = vpop.f32.mrf.mxu3  ;;  %v2084_v50 = vadd.f32 %v2083_v39, %v2065_v25 }
 0x101   : > { %3970 = vmatpush.bf16.msrb.mxu2 %v3605_v21 }
 0x102   : > { %3978 = vmatpush.bf16.msrb.mxu3 %v3669_v2  ;;  %v2048_v33 = vpop.f32.mrf.mxu0  ;;  %v2067_v51 = vpop.f32.mrf.mxu1  ;;  %v2103_v35 = vadd.f32 %v2102_v60, %v2084_v50  ;;  %2351 = vmatmul.bf16.gmra.mxu0 %v4436_v40 }
 0x103   : > { %2418 = vmatpush.bf16.msrb.mxu0 %v3597_v12  ;;  %v2049_v56 = vadd.f32 %v2048_v33, %v4738_v34  ;;  %2370 = vmatmul.bf16.gmra.mxu1 %v4441_v45  ;;  %v3573_v34 = vor.u32 %v3935_v37, %v3570_v53 }
 0x104   : > { %2437 = vmatpush.bf16.msrb.mxu1 %v3661_v18  ;;  %2389 = vmatmul.bf16.gmra.mxu2 %v4443_v46 }
 0x105   : > { %3971 = vmatpush.bf16.msrb.mxu2 %v3597_v12  ;;  %v2068_v32 = vadd.f32 %v2067_v51, %v2049_v56  ;;  %2408 = vmatmul.bf16.gmra.mxu3 %v4536_v38 }
 0x106   : > { %3979 = vmatpush.bf16.msrb.mxu3 %v3661_v18 }
 0x107   : > { %2419 = vmatpush.bf16.msrb.mxu0 %v3589_v62  ;;  %v2086_v3 = vpop.f32.mrf.mxu2 }
 0x108   : > { %2438 = vmatpush.bf16.msrb.mxu1 %v3653_v44  ;;  %v2105_v47 = vpop.f32.mrf.mxu3  ;;  %v2087_v52 = vadd.f32 %v2086_v3, %v2068_v32 }
 0x109   : > { %3972 = vmatpush.bf16.msrb.mxu2 %v3589_v62 }
 0x10a   : > { %3980 = vmatpush.bf16.msrb.mxu3 %v3653_v44  ;;  %v2050_v55 = vpop.f32.mrf.mxu0  ;;  %v2069_v1 = vpop.f32.mrf.mxu1  ;;  %v2106_v45 = vadd.f32 %v2105_v47, %v2087_v52 }
 0x10b   : > { %2420 = vmatpush.bf16.msrb.mxu0 %v3581_v8  ;;  %v2051_v40 = vadd.f32 %v2050_v55, %v4745_v5 }
 0x10c   : > { %2439 = vmatpush.bf16.msrb.mxu1 %v3645_v36 }
 0x10d   : > { %3973 = vmatpush.bf16.msrb.mxu2 %v3581_v8  ;;  %v2070_v46 = vadd.f32 %v2069_v1, %v2051_v40 }
 0x10e   : > { %3981 = vmatpush.bf16.msrb.mxu3 %v3645_v36 }
 0x10f   : > { %2421 = vmatpush.bf16.msrb.mxu0 %v3573_v34  ;;  %v2088_v38 = vpop.f32.mrf.mxu2 }
 0x110   : > { %2440 = vmatpush.bf16.msrb.mxu1 %v3637_v43  ;;  %v2107_v57 = vpop.f32.mrf.mxu3  ;;  %v2089_v0 = vadd.f32 %v2088_v38, %v2070_v46 }
 0x111   : > { %3974 = vmatpush.bf16.msrb.mxu2 %v3573_v34 }
 0x112   : > { %3982 = vmatpush.bf16.msrb.mxu3 %v3637_v43  ;;  %v2119_v48 = vpop.f32.mrf.mxu0  ;;  %v2138_v61 = vpop.f32.mrf.mxu1  ;;  %v2108_v23 = vadd.f32 %v2107_v57, %v2089_v0  ;;  %2422 = vmatmul.bf16.vlgmr.msrb.gmra.mxu0 %v4490_v16 }
 0x113   : > { %v2120_v6 = vadd.f32 %v2119_v48, %v4760_v17  ;;  %2441 = vmatmul.bf16.vlgmr.msrb.gmra.mxu1 %v4495_v20 }
 0x114   : > { %2427 = vmatmul.bf16.vlgmr.msrb.gmra.mxu2 %v4538_v41 }
 0x115   : > { %v2139_v63 = vadd.f32 %v2138_v61, %v2120_v6  ;;  %2446 = vmatmul.bf16.vlgmr.msrb.gmra.mxu3 %v4543_v49 }
 0x117   : > { %v2157_v5 = vpop.f32.mrf.mxu2 }
 0x118   : > { %v2176_v21 = vpop.f32.mrf.mxu3  ;;  %v4785_v2 = vadd.f32 %v2157_v5, %v2139_v63 }
 0x119   : > { %v2177_v25 = vadd.f32 %v2176_v21, %v527_v19 }
 0x11a   : > { %v2121_v58 = vpop.f32.mrf.mxu0  ;;  %v2140_v59 = vpop.f32.mrf.mxu1  ;;  %vm2452_vm0 = vcmp.ge.f32.partialorder %v4785_v2, 0.0 }
 0x11b   : > { %v2122_v24 = vadd.f32 %v2121_v58, %v2103_v35 }
 0x11d   : > { %v2141_v4 = vadd.f32 %v2140_v59, %v2122_v24 }
 0x11f   : > { %v2159_v28 = vpop.f32.mrf.mxu2 }
 0x120   : > { %v2178_v7 = vpop.f32.mrf.mxu3  ;;  %v4787_v10 = vadd.f32 %v2159_v28, %v2141_v4 }
 0x121   : > { %v2179_v60 = vadd.f32 %v2178_v7, %v527_v19 }
 0x122   : > { %v2124_v29 = vpop.f32.mrf.mxu0  ;;  %v2143_v16 = vpop.f32.mrf.mxu1  ;;  %vm2454_vm3 = vcmp.ge.f32.partialorder %v4787_v10, 0.0 }
 0x123   : > { %v2125_v11 = vadd.f32 %v2124_v29, %v2106_v45 }
 0x125   : > { %v2144_v20 = vadd.f32 %v2143_v16, %v2125_v11 }
 0x127   : > { %v2162_v15 = vpop.f32.mrf.mxu2 }
 0x128   : > { %v2181_v41 = vpop.f32.mrf.mxu3  ;;  %v4789_v12 = vadd.f32 %v2162_v15, %v2144_v20 }
 0x129   : > { %v2182_v4 = vadd.f32 %v2181_v41, %v527_v19 }
 0x12a   : > { %v2126_v49 = vpop.f32.mrf.mxu0  ;;  %v2145_v17 = vpop.f32.mrf.mxu1  ;;  %vm2456_vm2 = vcmp.ge.f32.partialorder %v4789_v12, 0.0 }
 0x12b   : > { %v2127_v18 = vadd.f32 %v2126_v49, %v2108_v23 }
 0x12d   : > { %v2146_v22 = vadd.f32 %v2145_v17, %v2127_v18 }
 0x12f   : > { %v2164_v9 = vpop.f32.mrf.mxu2 }
 0x130   : > { %v2183_v13 = vpop.f32.mrf.mxu3  ;;  %v4792_v62 = vadd.f32 %v2164_v9, %v2146_v22 }
 0x131   : > { %v2184_v49 = vadd.f32 %v2183_v13, %v527_v19 }
 0x132   : > { %v2195_v44 = vpop.f32.mrf.mxu0  ;;  %v2214_v14 = vpop.f32.mrf.mxu1  ;;  %vm2458_vm6 = vcmp.ge.f32.partialorder %v4792_v62, 0.0 }
 0x133   : > { %v2196_v26 = vadd.f32 %v2195_v44, %v2177_v25 }
 0x135   : > { %v2215_v39 = vadd.f32 %v2214_v14, %v2196_v26 }
 0x137   : > { %v2233_v30 = vpop.f32.mrf.mxu2 }
 0x138   : > { %v2252_v31 = vpop.f32.mrf.mxu3  ;;  %v2234_v50 = vadd.f32 %v2233_v30, %v2215_v39 }
 0x13a   : > { %v2197_v33 = vpop.f32.mrf.mxu0  ;;  %v2216_v51 = vpop.f32.mrf.mxu1  ;;  %v2253_v8 = vadd.f32 %v2252_v31, %v2234_v50 }
 0x13b   : > { %v2198_v56 = vadd.f32 %v2197_v33, %v2179_v60 }
 0x13d   : > { %v2217_v35 = vadd.f32 %v2216_v51, %v2198_v56 }
 0x13f   : > { %v2235_v27 = vpop.f32.mrf.mxu2 }
 0x140   : > { %v2254_v36 = vpop.f32.mrf.mxu3  ;;  %v2236_v37 = vadd.f32 %v2235_v27, %v2217_v35 }
 0x142   : > { %v2200_v53 = vpop.f32.mrf.mxu0  ;;  %v2219_v32 = vpop.f32.mrf.mxu1  ;;  %v2255_v42 = vadd.f32 %v2254_v36, %v2236_v37 }
 0x143   : > { %v2201_v28 = vadd.f32 %v2200_v53, %v2182_v4 }
 0x145   : > { %v2220_v16 = vadd.f32 %v2219_v32, %v2201_v28 }
 0x147   : > { %v2238_v54 = vpop.f32.mrf.mxu2 }
 0x148   : > { %v2257_v34 = vpop.f32.mrf.mxu3  ;;  %v2239_v17 = vadd.f32 %v2238_v54, %v2220_v16 }
 0x14a   : > { %v2202_v43 = vpop.f32.mrf.mxu0  ;;  %v2221_v3 = vpop.f32.mrf.mxu1  ;;  %v2258_v25 = vadd.f32 %v2257_v34, %v2239_v17 }
 0x14b   : > { %v2203_v18 = vadd.f32 %v2202_v43, %v2184_v49  ;;  %v2464_v49 = vmul.f32 0.1, %v4789_v12 }
 0x14d   : > { %v2222_v26 = vadd.f32 %v2221_v3, %v2203_v18 }
 0x14f   : > { %v2240_v47 = vpop.f32.mrf.mxu2 }
 0x150   : > { %v2259_v52 = vpop.f32.mrf.mxu3  ;;  %v2241_v31 = vadd.f32 %v2240_v47, %v2222_v26 }
 0x152   : > { %v2271_v55 = vpop.f32.mrf.mxu0  ;;  %v2290_v1 = vpop.f32.mrf.mxu1  ;;  %v2260_v35 = vadd.f32 %v2259_v52, %v2241_v31 }
 0x153   : > { %v2272_v15 = vadd.f32 %v2271_v55, %v2253_v8 }
 0x155   : > { %v2291_v22 = vadd.f32 %v2290_v1, %v2272_v15 }
 0x157   : > { %v2309_v40 = vpop.f32.mrf.mxu2 }
 0x158   : > { %v2328_v45 = vpop.f32.mrf.mxu3  ;;  %v2310_v9 = vadd.f32 %v2309_v40, %v2291_v22  ;;  %v2462_v22 = vmul.f32 0.1, %v4787_v10 }
 0x15a   : > { %v2273_v46 = vpop.f32.mrf.mxu0  ;;  %v2292_v38 = vpop.f32.mrf.mxu1  ;;  %v2329_v50 = vadd.f32 %v2328_v45, %v2310_v9 }
 0x15b   : > { %v2274_v41 = vadd.f32 %v2273_v46, %v2255_v42 }
 0x15d   : > { %v2293_v51 = vadd.f32 %v2292_v38, %v2274_v41 }
 0x15f   : > { %v2311_v57 = vpop.f32.mrf.mxu2 }
 0x160   : > { %v2330_v0 = vpop.f32.mrf.mxu3  ;;  %v2312_v19 = vadd.f32 %v2311_v57, %v2293_v51 }
 0x162   : > { %v2276_v48 = vpop.f32.mrf.mxu0  ;;  %v2295_v61 = vpop.f32.mrf.mxu1  ;;  %v2331_v34 = vadd.f32 %v2330_v0, %v2312_v19 }
 0x163   : > { %v2277_v39 = vadd.f32 %v2276_v48, %v2258_v25 }
 0x165   : > { %v2296_v33 = vadd.f32 %v2295_v61, %v2277_v39 }
 0x167   : > { %v2314_v6 = vpop.f32.mrf.mxu2 }
 0x168   : > { %v2333_v23 = vpop.f32.mrf.mxu3  ;;  %v2315_v8 = vadd.f32 %v2314_v6, %v2296_v33 }
 0x16a   : > { %v2278_v63 = vpop.f32.mrf.mxu0  ;;  %v2297_v5 = vpop.f32.mrf.mxu1  ;;  %v2334_v54 = vadd.f32 %v2333_v23, %v2315_v8 }
 0x16b   : > { %v2279_v36 = vadd.f32 %v2278_v63, %v2260_v35  ;;  %v2460_v63 = vmul.f32 0.1, %v4785_v2 }
 0x16d   : > { %v2298_v3 = vadd.f32 %v2297_v5, %v2279_v36 }
 0x16f   : > { %v2316_v21 = vpop.f32.mrf.mxu2 }
 0x170   : > { %v2335_v58 = vpop.f32.mrf.mxu3  ;;  %v2317_v47 = vadd.f32 %v2316_v21, %v2298_v3 }
 0x172   : > { %v2347_v59 = vpop.f32.mrf.mxu0  ;;  %v2366_v24 = vpop.f32.mrf.mxu1  ;;  %v2336_v61 = vadd.f32 %v2335_v58, %v2317_v47 }
 0x173   : > { %v2348_v56 = vadd.f32 %v2347_v59, %v2329_v50 }
 0x175   : > { %v2367_v32 = vadd.f32 %v2366_v24, %v2348_v56  ;;  %v2468_v24 = vsel %vm2452_vm0, %v4785_v2, %v2460_v63  ;;  %v2466_v56 = vmul.f32 0.1, %v4792_v62 }
 0x177   : > { %v2385_v7 = vpop.f32.mrf.mxu2  ;;  %v2474_v8 = vsel %vm2458_vm6, %v4792_v62, %v2466_v56 }
 0x178   : > { %v2404_v29 = vpop.f32.mrf.mxu3  ;;  %v2386_v43 = vadd.f32 %v2385_v7, %v2367_v32 }
 0x17a   : > { %v2349_v11 = vpop.f32.mrf.mxu0  ;;  %v2368_v20 = vpop.f32.mrf.mxu1  ;;  %v2405_v1 = vadd.f32 %v2404_v29, %v2386_v43 }
 0x17b   : > { %v2350_v42 = vadd.f32 %v2349_v11, %v2331_v34 }
 0x17d   : > { %v2369_v57 = vadd.f32 %v2368_v20, %v2350_v42 }
 0x17f   : > { %v2387_v44 = vpop.f32.mrf.mxu2 }
 0x180   : > { %v2406_v14 = vpop.f32.mrf.mxu3  ;;  %v2388_v23 = vadd.f32 %v2387_v44, %v2369_v57 }
 0x182   : > { %v2352_v60 = vpop.f32.mrf.mxu0  ;;  %v2371_v30 = vpop.f32.mrf.mxu1  ;;  %v2407_v4 = vadd.f32 %v2406_v14, %v2388_v23  ;;  %v2472_v14 = vsel %vm2456_vm2, %v4789_v12, %v2464_v49 }
 0x183   : > { %v2353_v55 = vadd.f32 %v2352_v60, %v2334_v54  ;;  %v2470_v60 = vsel %vm2454_vm3, %v4787_v10, %v2462_v22 }
 0x185   : > { %v2372_v52 = vadd.f32 %v2371_v30, %v2353_v55 }
 0x187   : > { %v2390_v13 = vpop.f32.mrf.mxu2 }
 0x188   : > { %v2409_v27 = vpop.f32.mrf.mxu3  ;;  %v2391_v6 = vadd.f32 %v2390_v13, %v2372_v52 }
 0x18a   : > { %v2354_v37 = vpop.f32.mrf.mxu0  ;;  %v2373_v53 = vpop.f32.mrf.mxu1  ;;  %v2410_v59 = vadd.f32 %v2409_v27, %v2391_v6 }
 0x18b   : > { %v2355_v5 = vadd.f32 %v2354_v37, %v2336_v61 }
 0x18d   : > { %v2374_v29 = vadd.f32 %v2373_v53, %v2355_v5 }
 0x18f   : > { %v2392_v40 = vpop.f32.mrf.mxu2 }
 0x190   : > { %v2411_v45 = vpop.f32.mrf.mxu3  ;;  %v2393_v17 = vadd.f32 %v2392_v40, %v2374_v29 }
 0x192   : > { %v2423_v46 = vpop.f32.mrf.mxu0  ;;  %v2442_v38 = vpop.f32.mrf.mxu1  ;;  %v2412_v26 = vadd.f32 %v2411_v45, %v2393_v17 }
 0x193   : > { %v2424_v48 = vadd.f32 %v2423_v46, %v2405_v1 }
 0x195   : > { %v2443_v0 = vadd.f32 %v2442_v38, %v2424_v48 }
 0x197   : > { %vm2453_vm1 = vcmp.ge.f32.partialorder %v2443_v0, 0.0  ;;  %v2461_v21 = vmul.f32 0.1, %v2443_v0  ;;  %v2428_v28 = vpop.f32.mrf.mxu2 }
 0x198   : > { %v2447_v7 = vpop.f32.mrf.mxu3  ;;  %v2429_v11 = vadd.f32 %v2428_v28, %v2410_v59 }
 0x199   : > { %v2469_v58 = vsel %vm2453_vm1, %v2443_v0, %v2461_v21 }
 0x19a   : > { %v2476_v16 = vpack.c.bf16 %v2469_v58, %v2468_v24  ;;  %v2425_v20 = vpop.f32.mrf.mxu0  ;;  %v2448_v2 = vadd.f32 %v2447_v7, %v2429_v11  ;;  %v2444_v18 = vpop.f32.mrf.mxu1 }
 0x19b   : > { %v2426_v15 = vadd.f32 %v2425_v20, %v2407_v4 }
 0x19c   : > { %2480 = vst [vmem:[%s4801_s4] sm:$0xff] %v2476_v16  ;;  %vm2457_vm4 = vcmp.ge.f32.partialorder %v2448_v2, 0.0  ;;  %v2465_v9 = vmul.f32 0.1, %v2448_v2 }
 0x19d   : > { %v2445_v25 = vadd.f32 %v2444_v18, %v2426_v15 }
 0x19e   : > { %v2473_v39 = vsel %vm2457_vm4, %v2448_v2, %v2465_v9 }
 0x19f   : > { %vm2455_vm5 = vcmp.ge.f32.partialorder %v2445_v25, 0.0  ;;  %v2463_v44 = vmul.f32 0.1, %v2445_v25  ;;  %v2478_v30 = vpack.c.bf16 %v2473_v39, %v2472_v14  ;;  %v2430_v31 = vpop.f32.mrf.mxu2 }
 0x1a0   : > { %v2431_v33 = vadd.f32 %v2430_v31, %v2412_v26  ;;  %v2449_v51 = vpop.f32.mrf.mxu3 }
 0x1a1   : > { %v2471_v41 = vsel %vm2455_vm5, %v2445_v25, %v2463_v44  ;;  %2482 = vst [vmem:[%s4801_s4 + $0x10] sm:$0xff] %v2478_v30 }
 0x1a2   : > { %v2477_v50 = vpack.c.bf16 %v2471_v41, %v2470_v60  ;;  %v2450_v35 = vadd.f32 %v2449_v51, %v2431_v33 }
 0x1a4   : > { %2481 = vst [vmem:[%s4801_s4 + $0x8] sm:$0xff] %v2477_v50  ;;  %vm2459_vm7 = vcmp.ge.f32.partialorder %v2450_v35, 0.0  ;;  %v2467_v12 = vmul.f32 0.1, %v2450_v35 }
 0x1a6   : > { %v2475_v19 = vsel %vm2459_vm7, %v2450_v35, %v2467_v12 }
 0x1a7   : > { %v2479_v10 = vpack.c.bf16 %v2475_v19, %v2474_v8 }
 0x1a9   : > { %2483 = vst [vmem:[%s4801_s4 + $0x18] sm:$0xff] %v2479_v10 }
 0x1aa PF: > { %s13_s14 = sadd.s32 1, %s4031_s14   ;;  %s4829_s12 = smov %s4027_s13 }
 0x1ab   : > { %p10_p5 = scmp.ge.s32.totalorder %s13_s14, 7   ;;  %s4830_s13 = smov %s4832_s15 }
 0x1ad   :  { %12 = sbr.rel (!%p10_p5) target bundleno = 2 (0x2), region = 68 }

// kernel: discriminator_b_forward.10
= control target key start
LH: loop header
LB: loop body
LE: loop exit
PB: predicated region body
PF: predicated region fallthrough
CT: control target
= control target key end

     0   :  { %s1793_s12 = smov 0   ;;  %s1795_s13 = smov 0   ;;  %s1955_s0 = inlined_call_operand.vmem [shape: bf16[5,32,1152], index: 0, kind: input, shape index: {}]   ;;  %s1956_s1 = inlined_call_operand.vmem [shape: bf16[5,1152,128], index: 1, kind: input, shape index: {}]   ;;  %s1957_s2 = inlined_call_operand.vmem [shape: f32[5,1,128], index: 2, kind: input, shape index: {}]   ;;  %s1958_s3 = inlined_call_operand.vmem [shape: bf16[5,32,128], index: 3, kind: output, shape index: {}]  }
   0x1   :  { %s1797_s14 = smov 0  }
   0x2 LB: > { %s25_s15 = sadd.s32 1, %s1767_s13  ;;  %p1245_p0 = scmp.ge.s32.totalorder %s1771_s14, 1  ;;  %s1771_s14 = sphi %s1797_s14, %s13_s14   ;;  %s1767_s13 = sphi %s1795_s13, %s1960_s13   ;;  %s1763_s12 = sphi %s1793_s12, %s1959_s12  }
   0x3   : > { %p27_p1 = scmp.ge.s32.totalorder %s25_s15, 5  ;;  %p177_p2 = scmp.lt.s32.totalorder %s1771_s14, 6 }
   0x5   : > { %s1962_s15 = smov (%p27_p1, %s25_s15), 0  ;;  %p178_p3 = pnand %p1245_p0, %p177_p2 }
   0x6   : > { %p219_p4 = scmp.lt.s32.totalorder (!%p178_p3), %s1763_s12, 4 }
   0x7   : > { %181 = sbr.rel (%p178_p3) target bundleno = 255 (0xff), region = 32 }
   0xc   : > { %s1964_s12 = smov (!%p219_p4, %s1763_s12), 4 }
   0xd   : > { %s1723_s16 = smul.u32 576, %s1964_s12  ;;  %s236_s19 = scalar_lea.vmem %s1957_s2, %s1964_s12 }
   0xe   : > { %s1722_s23 = smul.u32 144, %s1964_s12  ;;  %s1612_s29 = sshll.u32 %s1964_s12, 4 }
   0xf   : > { %s1821_s22 = scalar_lea.vmem %s1956_s1, %s1723_s16  ;;  %s245_s5 = scalar_lea.vmem %s1958_s3, %s1612_s29 }
  0x10   : > { %v1638_v0 = vld [vmem:[%s1821_s22 + $0x38] sm:$0xff]  ;;  %v1637_v4 = vld [vmem:[%s1821_s22 + $0x30] sm:$0xff]  ;;  %v1636_v8 = vld [vmem:[%s1821_s22 + $0x28] sm:$0xff]  ;;  %s1853_s26 = scalar_lea.vmem %s1955_s0, %s1722_s23 }
  0x11   : > { %v1646_v1 = vld [vmem:[%s1821_s22 + $0x78] sm:$0xff]  ;;  %939 = vmatpush.bf16.msra.mxu0 %v1638_v0  ;;  %v1645_v5 = vld [vmem:[%s1821_s22 + $0x70] sm:$0xff]  ;;  %v1644_v9 = vld [vmem:[%s1821_s22 + $0x68] sm:$0xff] }
  0x12   : > { %v1654_v2 = vld [vmem:[%s1821_s22 + $0xb8] sm:$0xff]  ;;  %958 = vmatpush.bf16.msra.mxu1 %v1646_v1  ;;  %v1653_v6 = vld [vmem:[%s1821_s22 + $0xb0] sm:$0xff]  ;;  %v1652_v10 = vld [vmem:[%s1821_s22 + $0xa8] sm:$0xff] }
  0x13   : > { %v1662_v3 = vld [vmem:[%s1821_s22 + $0xf8] sm:$0xff]  ;;  %977 = vmatpush.bf16.msra.mxu2 %v1654_v2  ;;  %v1661_v7 = vld [vmem:[%s1821_s22 + $0xf0] sm:$0xff]  ;;  %v1660_v11 = vld [vmem:[%s1821_s22 + $0xe8] sm:$0xff] }
  0x14   : > { %996 = vmatpush.bf16.msra.mxu3 %v1662_v3  ;;  %v1635_v12 = vld [vmem:[%s1821_s22 + $0x20] sm:$0xff]  ;;  %v1634_v16 = vld [vmem:[%s1821_s22 + $0x18] sm:$0xff]  ;;  %v1633_v20 = vld [vmem:[%s1821_s22 + $0x10] sm:$0xff] }
  0x15   : > { %940 = vmatpush.bf16.msra.mxu0 %v1637_v4  ;;  %v1643_v13 = vld [vmem:[%s1821_s22 + $0x60] sm:$0xff]  ;;  %v1642_v17 = vld [vmem:[%s1821_s22 + $0x58] sm:$0xff]  ;;  %v1641_v21 = vld [vmem:[%s1821_s22 + $0x50] sm:$0xff] }
  0x16   : > { %959 = vmatpush.bf16.msra.mxu1 %v1645_v5  ;;  %v1651_v14 = vld [vmem:[%s1821_s22 + $0xa0] sm:$0xff]  ;;  %v1650_v18 = vld [vmem:[%s1821_s22 + $0x98] sm:$0xff]  ;;  %v1649_v22 = vld [vmem:[%s1821_s22 + $0x90] sm:$0xff] }
  0x17   : > { %978 = vmatpush.bf16.msra.mxu2 %v1653_v6  ;;  %v1659_v15 = vld [vmem:[%s1821_s22 + $0xe0] sm:$0xff]  ;;  %v1658_v19 = vld [vmem:[%s1821_s22 + $0xd8] sm:$0xff]  ;;  %v1657_v23 = vld [vmem:[%s1821_s22 + $0xd0] sm:$0xff] }
  0x18   : > { %997 = vmatpush.bf16.msra.mxu3 %v1661_v7  ;;  %v1632_v24 = vld [vmem:[%s1821_s22 + $0x8] sm:$0xff]  ;;  %v1631_v28 = vld [vmem:[%s1821_s22] sm:$0xff]  ;;  %v1262_v39 = vld [vmem:[%s1853_s26 + $0x2c] sm:$0xf0] }
  0x19   : > { %941 = vmatpush.bf16.msra.mxu0 %v1636_v8  ;;  %v1640_v25 = vld [vmem:[%s1821_s22 + $0x48] sm:$0xff]  ;;  %v1639_v29 = vld [vmem:[%s1821_s22 + $0x40] sm:$0xff]  ;;  %v1670_v40 = vld [vmem:[%s1821_s22 + $0x138] sm:$0xff] }
  0x1a   : > { %960 = vmatpush.bf16.msra.mxu1 %v1644_v9  ;;  %v1648_v26 = vld [vmem:[%s1821_s22 + $0x88] sm:$0xff]  ;;  %v1647_v30 = vld [vmem:[%s1821_s22 + $0x80] sm:$0xff]  ;;  %v1678_v41 = vld [vmem:[%s1821_s22 + $0x178] sm:$0xff] }
  0x1b   : > { %979 = vmatpush.bf16.msra.mxu2 %v1652_v10  ;;  %v1656_v27 = vld [vmem:[%s1821_s22 + $0xc8] sm:$0xff]  ;;  %v1655_v31 = vld [vmem:[%s1821_s22 + $0xc0] sm:$0xff]  ;;  %v1686_v46 = vld [vmem:[%s1821_s22 + $0x1b8] sm:$0xff] }
  0x1c   : > { %998 = vmatpush.bf16.msra.mxu3 %v1660_v11  ;;  %v1252_v32 = vld [vmem:[%s1853_s26] sm:$0xf]  ;;  %v1617_v33 = vld [vmem:[%s1853_s26 + $0x20] sm:$0xf0]  ;;  %v1254_v35 = vld [vmem:[%s1853_s26 + $0x24] sm:$0xf0] }
  0x1d   : > { %942 = vmatpush.bf16.msra.mxu0 %v1635_v12  ;;  %v1613_v34 = vld [vmem:[%s1853_s26 + $0x4] sm:$0xf]  ;;  %v1260_v36 = vld [vmem:[%s1853_s26 + $0x8] sm:$0xf]  ;;  %v1618_v37 = vld [vmem:[%s1853_s26 + $0x28] sm:$0xf0]  ;;  %v1253_v42 = vor.u32 %v1617_v33, %v1252_v32 }
  0x1e   : > { %961 = vmatpush.bf16.msra.mxu1 %v1643_v13  ;;  %v1614_v38 = vld [vmem:[%s1853_s26 + $0xc] sm:$0xf]  ;;  %v1257_v43 = vor.u32 %v1613_v34, %v1254_v35  ;;  %v1261_v44 = vor.u32 %v1618_v37, %v1260_v36  ;;  %v1694_v47 = vld [vmem:[%s1821_s22 + $0x1f8] sm:$0xff]  ;;  %v1669_v48 = vld [vmem:[%s1821_s22 + $0x130] sm:$0xff] }
  0x1f   : > { %980 = vmatpush.bf16.msra.mxu2 %v1651_v14  ;;  %v1265_v45 = vor.u32 %v1614_v38, %v1262_v39  ;;  %v1677_v49 = vld [vmem:[%s1821_s22 + $0x170] sm:$0xff]  ;;  %v1668_v52 = vld [vmem:[%s1821_s22 + $0x128] sm:$0xff]  ;;  %v1667_v56 = vld [vmem:[%s1821_s22 + $0x120] sm:$0xff] }
  0x20   : > { %999 = vmatpush.bf16.msra.mxu3 %v1659_v15  ;;  %v1685_v50 = vld [vmem:[%s1821_s22 + $0x1b0] sm:$0xff]  ;;  %v1676_v53 = vld [vmem:[%s1821_s22 + $0x168] sm:$0xff]  ;;  %v1675_v57 = vld [vmem:[%s1821_s22 + $0x160] sm:$0xff] }
  0x21   : > { %943 = vmatpush.bf16.msra.mxu0 %v1634_v16  ;;  %v1693_v51 = vld [vmem:[%s1821_s22 + $0x1f0] sm:$0xff]  ;;  %v1684_v54 = vld [vmem:[%s1821_s22 + $0x1a8] sm:$0xff]  ;;  %v1683_v58 = vld [vmem:[%s1821_s22 + $0x1a0] sm:$0xff] }
  0x22   : > { %962 = vmatpush.bf16.msra.mxu1 %v1642_v17  ;;  %v1692_v55 = vld [vmem:[%s1821_s22 + $0x1e8] sm:$0xff]  ;;  %v1691_v59 = vld [vmem:[%s1821_s22 + $0x1e0] sm:$0xff]  ;;  %v1290_v63 = vld [vmem:[%s1853_s26 + $0x6c] sm:$0xf0] }
  0x23   : > { %981 = vmatpush.bf16.msra.mxu2 %v1650_v18  ;;  %v1288_v60 = vld [vmem:[%s1853_s26 + $0x48] sm:$0xf]  ;;  %v1626_v61 = vld [vmem:[%s1853_s26 + $0x68] sm:$0xf0]  ;;  %v1296_v0 = vld [vmem:[%s1853_s26 + $0x50] sm:$0xf] }
  0x24   : > { %1000 = vmatpush.bf16.msra.mxu3 %v1658_v19  ;;  %v1622_v62 = vld [vmem:[%s1853_s26 + $0x4c] sm:$0xf]  ;;  %v1627_v1 = vld [vmem:[%s1853_s26 + $0x70] sm:$0xf0]  ;;  %v1298_v3 = vld [vmem:[%s1853_s26 + $0x74] sm:$0xf0]  ;;  %v1289_v6 = vor.u32 %v1626_v61, %v1288_v60 }
  0x25   : > { %944 = vmatpush.bf16.msra.mxu0 %v1633_v20  ;;  %v1623_v2 = vld [vmem:[%s1853_s26 + $0x54] sm:$0xf]  ;;  %v1666_v4 = vld [vmem:[%s1821_s22 + $0x118] sm:$0xff]  ;;  %v1293_v7 = vor.u32 %v1622_v62, %v1290_v63  ;;  %v1297_v8 = vor.u32 %v1627_v1, %v1296_v0  ;;  %v1664_v16 = vld [vmem:[%s1821_s22 + $0x108] sm:$0xff] }
  0x26   : > { %963 = vmatpush.bf16.msra.mxu1 %v1641_v21  ;;  %v1674_v5 = vld [vmem:[%s1821_s22 + $0x158] sm:$0xff]  ;;  %v1301_v9 = vor.u32 %v1623_v2, %v1298_v3  ;;  %v1665_v12 = vld [vmem:[%s1821_s22 + $0x110] sm:$0xff]  ;;  %v1672_v17 = vld [vmem:[%s1821_s22 + $0x148] sm:$0xff] }
  0x27   : > { %982 = vmatpush.bf16.msra.mxu2 %v1649_v22  ;;  %v1682_v10 = vld [vmem:[%s1821_s22 + $0x198] sm:$0xff]  ;;  %v1673_v13 = vld [vmem:[%s1821_s22 + $0x150] sm:$0xff]  ;;  %v1680_v18 = vld [vmem:[%s1821_s22 + $0x188] sm:$0xff] }
  0x28   : > { %1001 = vmatpush.bf16.msra.mxu3 %v1657_v23  ;;  %v1690_v11 = vld [vmem:[%s1821_s22 + $0x1d8] sm:$0xff]  ;;  %v1681_v14 = vld [vmem:[%s1821_s22 + $0x190] sm:$0xff]  ;;  %v1688_v19 = vld [vmem:[%s1821_s22 + $0x1c8] sm:$0xff] }
  0x29   : > { %945 = vmatpush.bf16.msra.mxu0 %v1632_v24  ;;  %v1689_v15 = vld [vmem:[%s1821_s22 + $0x1d0] sm:$0xff]  ;;  %v1663_v20 = vld [vmem:[%s1821_s22 + $0x100] sm:$0xff]  ;;  %v1700_v38 = vld [vmem:[%s1821_s22 + $0x228] sm:$0xff] }
  0x2a   : > { %964 = vmatpush.bf16.msra.mxu1 %v1640_v25  ;;  %v1671_v21 = vld [vmem:[%s1821_s22 + $0x140] sm:$0xff]  ;;  %v1268_v24 = vld [vmem:[%s1853_s26 + $0x10] sm:$0xf]  ;;  %v1619_v25 = vld [vmem:[%s1853_s26 + $0x30] sm:$0xf0] }
  0x2b   : > { %983 = vmatpush.bf16.msra.mxu2 %v1648_v26  ;;  %v1679_v22 = vld [vmem:[%s1821_s22 + $0x180] sm:$0xff]  ;;  %v1702_v26 = vld [vmem:[%s1821_s22 + $0x238] sm:$0xff]  ;;  %v1269_v33 = vor.u32 %v1619_v25, %v1268_v24  ;;  %v1701_v37 = vld [vmem:[%s1821_s22 + $0x230] sm:$0xff] }
  0x2c   : > { %1002 = vmatpush.bf16.msra.mxu3 %v1656_v27  ;;  %v1687_v23 = vld [vmem:[%s1821_s22 + $0x1c0] sm:$0xff]  ;;  %v1615_v27 = vld [vmem:[%s1853_s26 + $0x14] sm:$0xf] }
  0x2d   : > { %946 = vmatpush.bf16.msra.mxu0 %v1631_v28  ;;  %v1270_v28 = vld [vmem:[%s1853_s26 + $0x34] sm:$0xf0]  ;;  %v1278_v32 = vld [vmem:[%s1853_s26 + $0x3c] sm:$0xf0] }
  0x2e   : > { %965 = vmatpush.bf16.msra.mxu1 %v1639_v29  ;;  %v1276_v29 = vld [vmem:[%s1853_s26 + $0x18] sm:$0xf]  ;;  %v1273_v34 = vor.u32 %v1615_v27, %v1270_v28  ;;  %v1699_v39 = vld [vmem:[%s1821_s22 + $0x220] sm:$0xff] }
  0x2f   : > { %984 = vmatpush.bf16.msra.mxu2 %v1647_v30  ;;  %v1620_v30 = vld [vmem:[%s1853_s26 + $0x38] sm:$0xf0] }
  0x30   : > { %1003 = vmatpush.bf16.msra.mxu3 %v1655_v31  ;;  %947 = vmatmul.bf16.vlgmr.msra.gmra.mxu0 %v1253_v42  ;;  %v1616_v31 = vld [vmem:[%s1853_s26 + $0x1c] sm:$0xf]  ;;  %v1277_v35 = vor.u32 %v1620_v30, %v1276_v29 }
  0x31   : > { %1015 = vmatpush.bf16.msrb.mxu0 %v1670_v40  ;;  %966 = vmatmul.bf16.vlgmr.msra.gmra.mxu1 %v1257_v43  ;;  %v1281_v36 = vor.u32 %v1616_v31, %v1278_v32  ;;  %v1304_v40 = vld [vmem:[%s1853_s26 + $0x58] sm:$0xf]  ;;  %v1624_v42 = vld [vmem:[%s1853_s26 + $0x5c] sm:$0xf]  ;;  %v1306_v43 = vld [vmem:[%s1853_s26 + $0x7c] sm:$0xf0] }
  0x32   : > { %1034 = vmatpush.bf16.msrb.mxu1 %v1678_v41  ;;  %985 = vmatmul.bf16.vlgmr.msra.gmra.mxu2 %v1261_v44  ;;  %v1628_v41 = vld [vmem:[%s1853_s26 + $0x78] sm:$0xf0]  ;;  %v1312_v44 = vld [vmem:[%s1853_s26 + $0x60] sm:$0xf] }
  0x33   : > { %1004 = vmatmul.bf16.vlgmr.msra.gmra.mxu3 %v1265_v45  ;;  %1053 = vmatpush.bf16.msrb.mxu2 %v1686_v46  ;;  %v1629_v45 = vld [vmem:[%s1853_s26 + $0x80] sm:$0xf0] }
  0x34   : > { %1072 = vmatpush.bf16.msrb.mxu3 %v1694_v47  ;;  %v1625_v46 = vld [vmem:[%s1853_s26 + $0x64] sm:$0xf]  ;;  %v1314_v47 = vld [vmem:[%s1853_s26 + $0x84] sm:$0xf0] }
  0x35   : > { %1016 = vmatpush.bf16.msrb.mxu0 %v1669_v48  ;;  %v1698_v48 = vld [vmem:[%s1821_s22 + $0x218] sm:$0xff] }
  0x36   : > { %1035 = vmatpush.bf16.msrb.mxu1 %v1677_v49  ;;  %v1305_v49 = vor.u32 %v1628_v41, %v1304_v40 }
  0x37   : > { %1054 = vmatpush.bf16.msrb.mxu2 %v1685_v50  ;;  %v1309_v50 = vor.u32 %v1624_v42, %v1306_v43 }
  0x38   : > { %1073 = vmatpush.bf16.msrb.mxu3 %v1693_v51  ;;  %v1313_v51 = vor.u32 %v1629_v45, %v1312_v44 }
  0x39   : > { %1017 = vmatpush.bf16.msrb.mxu0 %v1668_v52  ;;  %v1317_v52 = vor.u32 %v1625_v46, %v1314_v47 }
  0x3a   : > { %1036 = vmatpush.bf16.msrb.mxu1 %v1676_v53  ;;  %v1697_v53 = vld [vmem:[%s1821_s22 + $0x210] sm:$0xff] }
  0x3b   : > { %1055 = vmatpush.bf16.msrb.mxu2 %v1684_v54  ;;  %v1696_v54 = vld [vmem:[%s1821_s22 + $0x208] sm:$0xff] }
  0x3c   : > { %1074 = vmatpush.bf16.msrb.mxu3 %v1692_v55  ;;  %v1695_v55 = vld [vmem:[%s1821_s22 + $0x200] sm:$0xff] }
  0x3d   : > { %1018 = vmatpush.bf16.msrb.mxu0 %v1667_v56  ;;  %v1284_v56 = vld [vmem:[%s1853_s26 + $0x20] sm:$0xf] }
  0x3e   : > { %1037 = vmatpush.bf16.msrb.mxu1 %v1675_v57  ;;  %v1621_v57 = vld [vmem:[%s1853_s26 + $0x40] sm:$0xf0] }
  0x3f   : > { %1056 = vmatpush.bf16.msrb.mxu2 %v1683_v58  ;;  %v1320_v58 = vld [vmem:[%s1853_s26 + $0x68] sm:$0xf]  ;;  %v1285_v60 = vor.u32 %v1621_v57, %v1284_v56 }
  0x40   : > { %1075 = vmatpush.bf16.msrb.mxu3 %v1691_v59  ;;  %952 = vmatmul.bf16.gmra.mxu0 %v1289_v6  ;;  %v1630_v59 = vld [vmem:[%s1853_s26 + $0x88] sm:$0xf0] }
  0x41   : > { %1019 = vmatpush.bf16.msrb.mxu0 %v1666_v4  ;;  %971 = vmatmul.bf16.gmra.mxu1 %v1293_v7  ;;  %v1321_v61 = vor.u32 %v1630_v59, %v1320_v58 }
  0x42   : > { %1038 = vmatpush.bf16.msrb.mxu1 %v1674_v5  ;;  %990 = vmatmul.bf16.gmra.mxu2 %v1297_v8 }
  0x43   : > { %1009 = vmatmul.bf16.gmra.mxu3 %v1301_v9  ;;  %1057 = vmatpush.bf16.msrb.mxu2 %v1682_v10 }
  0x44   : > { %1076 = vmatpush.bf16.msrb.mxu3 %v1690_v11 }
  0x45   : > { %1020 = vmatpush.bf16.msrb.mxu0 %v1665_v12 }
  0x46   : > { %1039 = vmatpush.bf16.msrb.mxu1 %v1673_v13 }
  0x47   : > { %1058 = vmatpush.bf16.msrb.mxu2 %v1681_v14 }
  0x48   : > { %1077 = vmatpush.bf16.msrb.mxu3 %v1689_v15 }
  0x49   : > { %1021 = vmatpush.bf16.msrb.mxu0 %v1664_v16 }
  0x4a   : > { %1040 = vmatpush.bf16.msrb.mxu1 %v1672_v17 }
  0x4b   : > { %1059 = vmatpush.bf16.msrb.mxu2 %v1680_v18 }
  0x4c   : > { %1078 = vmatpush.bf16.msrb.mxu3 %v1688_v19 }
  0x4d   : > { %1022 = vmatpush.bf16.msrb.mxu0 %v1663_v20  ;;  %v1748_v20 = vld [vmem:[%s236_s19] ss:$0 sm:$0xff] }
  0x4e   : > { %1041 = vmatpush.bf16.msrb.mxu1 %v1671_v21 }
  0x4f   : > { %1060 = vmatpush.bf16.msrb.mxu2 %v1679_v22 }
  0x50   : > { %1079 = vmatpush.bf16.msrb.mxu3 %v1687_v23  ;;  %1023 = vmatmul.bf16.vlgmr.msrb.gmra.mxu0 %v1269_v33 }
  0x51   : > { %1091 = vmatpush.bf16.msra.mxu0 %v1702_v26  ;;  %1042 = vmatmul.bf16.vlgmr.msrb.gmra.mxu1 %v1273_v34 }
  0x52   : > { %1714 = vmatpush.bf16.msra.mxu1 %v1702_v26  ;;  %1061 = vmatmul.bf16.vlgmr.msrb.gmra.mxu2 %v1277_v35 }
  0x53   : > { %1080 = vmatmul.bf16.vlgmr.msrb.gmra.mxu3 %v1281_v36 }
  0x55   : > { %1092 = vmatpush.bf16.msra.mxu0 %v1701_v37 }
  0x56   : > { %1715 = vmatpush.bf16.msra.mxu1 %v1701_v37 }
  0x59   : > { %1093 = vmatpush.bf16.msra.mxu0 %v1700_v38 }
  0x5a   : > { %1716 = vmatpush.bf16.msra.mxu1 %v1700_v38 }
  0x5d   : > { %1094 = vmatpush.bf16.msra.mxu0 %v1699_v39 }
  0x5e   : > { %1717 = vmatpush.bf16.msra.mxu1 %v1699_v39 }
  0x60   : > { %1028 = vmatmul.bf16.gmra.mxu0 %v1305_v49 }
  0x61   : > { %1095 = vmatpush.bf16.msra.mxu0 %v1698_v48  ;;  %1047 = vmatmul.bf16.gmra.mxu1 %v1309_v50 }
  0x62   : > { %1718 = vmatpush.bf16.msra.mxu1 %v1698_v48  ;;  %1066 = vmatmul.bf16.gmra.mxu2 %v1313_v51 }
  0x63   : > { %1085 = vmatmul.bf16.gmra.mxu3 %v1317_v52 }
  0x65   : > { %1096 = vmatpush.bf16.msra.mxu0 %v1697_v53 }
  0x66   : > { %1719 = vmatpush.bf16.msra.mxu1 %v1697_v53 }
  0x69   : > { %1097 = vmatpush.bf16.msra.mxu0 %v1696_v54 }
  0x6a   : > { %1720 = vmatpush.bf16.msra.mxu1 %v1696_v54 }
  0x6d   : > { %1098 = vmatpush.bf16.msra.mxu0 %v1695_v55 }
  0x6e   : > { %1721 = vmatpush.bf16.msra.mxu1 %v1695_v55 }
  0x70   : > { %1099 = vmatmul.bf16.vlgmr.msra.gmra.mxu0 %v1285_v60 }
  0x71   : > { %1104 = vmatmul.bf16.vlgmr.msra.gmra.mxu1 %v1321_v61 }
  0xad   : > { %v948_v62 = vpop.f32.mrf.mxu0 }
  0xae   : > { %v967_v63 = vpop.f32.mrf.mxu1  ;;  %v949_v21 = vadd.f32 %v1748_v20, %v948_v62 }
  0xb0   : > { %v968_v26 = vadd.f32 %v967_v63, %v949_v21 }
  0xb5   : > { %v986_v0 = vpop.f32.mrf.mxu2  ;;  %v950_v2 = vpop.f32.mrf.mxu0 }
  0xb6   : > { %v1005_v1 = vpop.f32.mrf.mxu3  ;;  %v969_v3 = vpop.f32.mrf.mxu1  ;;  %v951_v27 = vadd.f32 %v1748_v20, %v950_v2  ;;  %v987_v31 = vadd.f32 %v986_v0, %v968_v26 }
  0xb8   : > { %v970_v33 = vadd.f32 %v969_v3, %v951_v27  ;;  %v1006_v35 = vadd.f32 %v1005_v1, %v987_v31 }
  0xbd   : > { %v988_v4 = vpop.f32.mrf.mxu2  ;;  %v953_v6 = vpop.f32.mrf.mxu0 }
  0xbe   : > { %v1007_v5 = vpop.f32.mrf.mxu3  ;;  %v972_v7 = vpop.f32.mrf.mxu1  ;;  %v954_v22 = vadd.f32 %v1748_v20, %v953_v6  ;;  %v989_v36 = vadd.f32 %v988_v4, %v970_v33 }
  0xc0   : > { %v973_v28 = vadd.f32 %v972_v7, %v954_v22  ;;  %v1008_v44 = vadd.f32 %v1007_v5, %v989_v36 }
  0xc5   : > { %v991_v8 = vpop.f32.mrf.mxu2  ;;  %v955_v10 = vpop.f32.mrf.mxu0 }
  0xc6   : > { %v1010_v9 = vpop.f32.mrf.mxu3  ;;  %v974_v11 = vpop.f32.mrf.mxu1  ;;  %v956_v29 = vadd.f32 %v1748_v20, %v955_v10  ;;  %v992_v32 = vadd.f32 %v991_v8, %v973_v28 }
  0xc8   : > { %v975_v34 = vadd.f32 %v974_v11, %v956_v29  ;;  %v1011_v37 = vadd.f32 %v1010_v9, %v992_v32 }
  0xcd   : > { %v993_v12 = vpop.f32.mrf.mxu2  ;;  %v1024_v14 = vpop.f32.mrf.mxu0 }
  0xce   : > { %v1012_v13 = vpop.f32.mrf.mxu3  ;;  %v1043_v15 = vpop.f32.mrf.mxu1  ;;  %v994_v38 = vadd.f32 %v993_v12, %v975_v34  ;;  %v1025_v42 = vadd.f32 %v1024_v14, %v1006_v35 }
  0xd0   : > { %v1013_v45 = vadd.f32 %v1012_v13, %v994_v38  ;;  %v1044_v47 = vadd.f32 %v1043_v15, %v1025_v42 }
  0xd5   : > { %v1062_v16 = vpop.f32.mrf.mxu2  ;;  %v1026_v18 = vpop.f32.mrf.mxu0 }
  0xd6   : > { %v1081_v17 = vpop.f32.mrf.mxu3  ;;  %v1045_v19 = vpop.f32.mrf.mxu1  ;;  %v1027_v48 = vadd.f32 %v1026_v18, %v1008_v44  ;;  %v1063_v51 = vadd.f32 %v1062_v16, %v1044_v47 }
  0xd8   : > { %v1046_v56 = vadd.f32 %v1045_v19, %v1027_v48  ;;  %v1082_v58 = vadd.f32 %v1081_v17, %v1063_v51 }
  0xdd   : > { %v1064_v23 = vpop.f32.mrf.mxu2  ;;  %v1029_v24 = vpop.f32.mrf.mxu0 }
  0xde   : > { %v1048_v25 = vpop.f32.mrf.mxu1  ;;  %v1083_v30 = vpop.f32.mrf.mxu3  ;;  %v1030_v43 = vadd.f32 %v1029_v24, %v1011_v37  ;;  %v1065_v59 = vadd.f32 %v1064_v23, %v1046_v56 }
  0xe0   : > { %v1049_v49 = vadd.f32 %v1048_v25, %v1030_v43  ;;  %v1084_v1 = vadd.f32 %v1083_v30, %v1065_v59 }
  0xe5   : > { %v1067_v39 = vpop.f32.mrf.mxu2  ;;  %v1031_v40 = vpop.f32.mrf.mxu0 }
  0xe6   : > { %v1050_v41 = vpop.f32.mrf.mxu1  ;;  %v1086_v46 = vpop.f32.mrf.mxu3  ;;  %v1032_v50 = vadd.f32 %v1031_v40, %v1013_v45  ;;  %v1068_v52 = vadd.f32 %v1067_v39, %v1049_v49 }
  0xe8   : > { %v1051_v57 = vadd.f32 %v1050_v41, %v1032_v50  ;;  %v1087_v60 = vadd.f32 %v1086_v46, %v1068_v52 }
  0xed   : > { %v1069_v53 = vpop.f32.mrf.mxu2  ;;  %v1100_v54 = vpop.f32.mrf.mxu0 }
  0xee   : > { %v1105_v55 = vpop.f32.mrf.mxu1  ;;  %v1070_v61 = vadd.f32 %v1069_v53, %v1051_v57  ;;  %v1101_v62 = vadd.f32 %v1100_v54, %v1082_v58  ;;  %v1088_v0 = vpop.f32.mrf.mxu3 }
  0xef   : > { %v1106_v63 = vadd.f32 %v1105_v55, %v1087_v60 }
  0xf0   : > { %v1089_v2 = vadd.f32 %v1088_v0, %v1070_v61  ;;  %v1114_v5 = vmul.f32 0.1, %v1101_v62  ;;  %vm1110_vm0 = vcmp.ge.f32.partialorder %v1101_v62, 0.0 }
  0xf1   : > { %v1116_v6 = vmul.f32 0.1, %v1106_v63  ;;  %vm1112_vm1 = vcmp.ge.f32.partialorder %v1106_v63, 0.0 }
  0xf2   : > { %v1118_v11 = vsel %vm1110_vm0, %v1101_v62, %v1114_v5 }
  0xf3   : > { %v1120_v12 = vsel %vm1112_vm1, %v1106_v63, %v1116_v6 }
  0xf5   : > { %v1102_v3 = vpop.f32.mrf.mxu0 }
  0xf6   : > { %v1107_v4 = vpop.f32.mrf.mxu1  ;;  %v1103_v7 = vadd.f32 %v1102_v3, %v1084_v1 }
  0xf7   : > { %v1108_v8 = vadd.f32 %v1107_v4, %v1089_v2 }
  0xf8   : > { %vm1111_vm2 = vcmp.ge.f32.partialorder %v1103_v7, 0.0  ;;  %v1115_v9 = vmul.f32 0.1, %v1103_v7 }
  0xf9   : > { %vm1113_vm3 = vcmp.ge.f32.partialorder %v1108_v8, 0.0  ;;  %v1117_v10 = vmul.f32 0.1, %v1108_v8 }
  0xfa   : > { %v1119_v13 = vsel %vm1111_vm2, %v1103_v7, %v1115_v9 }
  0xfb   : > { %v1121_v14 = vsel %vm1113_vm3, %v1108_v8, %v1117_v10  ;;  %v1706_v15 = vpack.c.bf16 %v1119_v13, %v1118_v11 }
  0xfc   : > { %v1711_v16 = vpack.c.bf16 %v1121_v14, %v1120_v12 }
  0xfd   : > { %1707 = vst [vmem:[%s245_s5] sm:$0xff] %v1706_v15  }
  0xfe   : > { %1713 = vst [vmem:[%s245_s5 + $0x8] sm:$0xff] %v1711_v16  }
  0xff PF: > { %s13_s14 = sadd.s32 1, %s1771_s14   ;;  %s1959_s12 = smov %s1767_s13 }
 0x100   : > { %p10_p5 = scmp.ge.s32.totalorder %s13_s14, 7   ;;  %s1960_s13 = smov %s1962_s15 }
 0x102   :  { %12 = sbr.rel (!%p10_p5) target bundleno = 2 (0x2), region = 68 }

// kernel: discriminator_b_forward.12
= control target key start
LH: loop header
LB: loop body
LE: loop exit
PB: predicated region body
PF: predicated region fallthrough
CT: control target
= control target key end

     0   :  { %s1058_s12 = smov 0   ;;  %s1060_s13 = smov 0   ;;  %s1160_s0 = inlined_call_operand.vmem [shape: bf16[5,32,512], index: 0, kind: input, shape index: {}]   ;;  %s1161_s1 = inlined_call_operand.vmem [shape: bf16[5,512,128], index: 1, kind: input, shape index: {}]   ;;  %s1162_s2 = inlined_call_operand.vmem [shape: f32[5,1,128], index: 2, kind: input, shape index: {}]   ;;  %s1163_s3 = inlined_call_operand.vmem [shape: bf16[5,32,128], index: 3, kind: output, shape index: {}]  }
   0x1   :  { %s1062_s14 = smov 0  }
   0x2 LB: > { %s25_s15 = sadd.s32 1, %s1032_s13  ;;  %p766_p0 = scmp.ge.s32.totalorder %s1036_s14, 1  ;;  %s1036_s14 = sphi %s1062_s14, %s13_s14   ;;  %s1032_s13 = sphi %s1060_s13, %s1165_s13   ;;  %s1028_s12 = sphi %s1058_s12, %s1164_s12  }
   0x3   : > { %p27_p1 = scmp.ge.s32.totalorder %s25_s15, 5  ;;  %p177_p2 = scmp.lt.s32.totalorder %s1036_s14, 6 }
   0x5   : > { %s1167_s15 = smov (%p27_p1, %s25_s15), 0  ;;  %p178_p3 = pnand %p766_p0, %p177_p2 }
   0x6   : > { %p219_p4 = scmp.lt.s32.totalorder (!%p178_p3), %s1028_s12, 4 }
   0x7   : > { %181 = sbr.rel (%p178_p3) target bundleno = 215 (0xd7), region = 32 }
   0xc   : > { %s1169_s12 = smov (!%p219_p4, %s1028_s12), 4 }
   0xd   : > { %s936_s16 = sshll.u32 %s1169_s12, 8  ;;  %s236_s22 = scalar_lea.vmem %s1162_s2, %s1169_s12 }
   0xe   : > { %s1082_s19 = scalar_lea.vmem %s1161_s1, %s936_s16  ;;  %s935_s23 = sshll.u32 %s1169_s12, 6  ;;  %v1013_v56 = vld [vmem:[%s236_s22] ss:$0 sm:$0xff] }
   0xf   : > { %v953_v0 = vld [vmem:[%s1082_s19 + $0x38] sm:$0xff]  ;;  %v952_v4 = vld [vmem:[%s1082_s19 + $0x30] sm:$0xff]  ;;  %v951_v8 = vld [vmem:[%s1082_s19 + $0x28] sm:$0xff]  ;;  %s1118_s26 = scalar_lea.vmem %s1160_s0, %s935_s23  ;;  %s937_s29 = sshll.u32 %s1169_s12, 4 }
  0x10   : > { %v961_v1 = vld [vmem:[%s1082_s19 + $0x78] sm:$0xff]  ;;  %555 = vmatpush.bf16.msra.mxu0 %v953_v0  ;;  %v960_v5 = vld [vmem:[%s1082_s19 + $0x70] sm:$0xff]  ;;  %v959_v9 = vld [vmem:[%s1082_s19 + $0x68] sm:$0xff]  ;;  %s245_s5 = scalar_lea.vmem %s1163_s3, %s937_s29 }
  0x11   : > { %v969_v2 = vld [vmem:[%s1082_s19 + $0xb8] sm:$0xff]  ;;  %574 = vmatpush.bf16.msra.mxu1 %v961_v1  ;;  %v968_v6 = vld [vmem:[%s1082_s19 + $0xb0] sm:$0xff]  ;;  %v967_v10 = vld [vmem:[%s1082_s19 + $0xa8] sm:$0xff] }
  0x12   : > { %v977_v3 = vld [vmem:[%s1082_s19 + $0xf8] sm:$0xff]  ;;  %593 = vmatpush.bf16.msra.mxu2 %v969_v2  ;;  %v976_v7 = vld [vmem:[%s1082_s19 + $0xf0] sm:$0xff]  ;;  %v975_v11 = vld [vmem:[%s1082_s19 + $0xe8] sm:$0xff] }
  0x13   : > { %612 = vmatpush.bf16.msra.mxu3 %v977_v3  ;;  %v950_v12 = vld [vmem:[%s1082_s19 + $0x20] sm:$0xff]  ;;  %v949_v16 = vld [vmem:[%s1082_s19 + $0x18] sm:$0xff]  ;;  %v948_v20 = vld [vmem:[%s1082_s19 + $0x10] sm:$0xff] }
  0x14   : > { %556 = vmatpush.bf16.msra.mxu0 %v952_v4  ;;  %v958_v13 = vld [vmem:[%s1082_s19 + $0x60] sm:$0xff]  ;;  %v957_v17 = vld [vmem:[%s1082_s19 + $0x58] sm:$0xff]  ;;  %v956_v21 = vld [vmem:[%s1082_s19 + $0x50] sm:$0xff] }
  0x15   : > { %575 = vmatpush.bf16.msra.mxu1 %v960_v5  ;;  %v966_v14 = vld [vmem:[%s1082_s19 + $0xa0] sm:$0xff]  ;;  %v965_v18 = vld [vmem:[%s1082_s19 + $0x98] sm:$0xff]  ;;  %v964_v22 = vld [vmem:[%s1082_s19 + $0x90] sm:$0xff] }
  0x16   : > { %594 = vmatpush.bf16.msra.mxu2 %v968_v6  ;;  %v974_v15 = vld [vmem:[%s1082_s19 + $0xe0] sm:$0xff]  ;;  %v973_v19 = vld [vmem:[%s1082_s19 + $0xd8] sm:$0xff]  ;;  %v972_v23 = vld [vmem:[%s1082_s19 + $0xd0] sm:$0xff] }
  0x17   : > { %613 = vmatpush.bf16.msra.mxu3 %v976_v7  ;;  %v947_v24 = vld [vmem:[%s1082_s19 + $0x8] sm:$0xff]  ;;  %v946_v28 = vld [vmem:[%s1082_s19] sm:$0xff]  ;;  %v940_v33 = vld [vmem:[%s1118_s26 + $0xc] sm:$0xf0] }
  0x18   : > { %557 = vmatpush.bf16.msra.mxu0 %v951_v8  ;;  %v955_v25 = vld [vmem:[%s1082_s19 + $0x48] sm:$0xff]  ;;  %v954_v29 = vld [vmem:[%s1082_s19 + $0x40] sm:$0xff]  ;;  %v777_v35 = vld [vmem:[%s1118_s26 + $0x10] sm:$0xf0] }
  0x19   : > { %576 = vmatpush.bf16.msra.mxu1 %v959_v9  ;;  %v963_v26 = vld [vmem:[%s1082_s19 + $0x88] sm:$0xff]  ;;  %v962_v30 = vld [vmem:[%s1082_s19 + $0x80] sm:$0xff]  ;;  %v941_v37 = vld [vmem:[%s1118_s26 + $0x14] sm:$0xf0] }
  0x1a   : > { %595 = vmatpush.bf16.msra.mxu2 %v967_v10  ;;  %v971_v27 = vld [vmem:[%s1082_s19 + $0xc8] sm:$0xff]  ;;  %v970_v31 = vld [vmem:[%s1082_s19 + $0xc0] sm:$0xff]  ;;  %v785_v39 = vld [vmem:[%s1118_s26 + $0x18] sm:$0xf0] }
  0x1b   : > { %614 = vmatpush.bf16.msra.mxu3 %v975_v11  ;;  %v775_v32 = vld [vmem:[%s1118_s26] sm:$0xf]  ;;  %v938_v34 = vld [vmem:[%s1118_s26 + $0x4] sm:$0xf]  ;;  %v783_v36 = vld [vmem:[%s1118_s26 + $0x8] sm:$0xf] }
  0x1c   : > { %558 = vmatpush.bf16.msra.mxu0 %v950_v12  ;;  %v939_v38 = vld [vmem:[%s1118_s26 + $0xc] sm:$0xf]  ;;  %v776_v40 = vor.u32 %v940_v33, %v775_v32  ;;  %v780_v41 = vor.u32 %v938_v34, %v777_v35  ;;  %v784_v42 = vor.u32 %v941_v37, %v783_v36  ;;  %v791_v44 = vld [vmem:[%s1118_s26 + $0x20] sm:$0xf]  ;;  %v944_v45 = vld [vmem:[%s1118_s26 + $0x2c] sm:$0xf0] }
  0x1d   : > { %577 = vmatpush.bf16.msra.mxu1 %v958_v13  ;;  %v788_v43 = vor.u32 %v939_v38, %v785_v39  ;;  %v942_v46 = vld [vmem:[%s1118_s26 + $0x24] sm:$0xf]  ;;  %v793_v47 = vld [vmem:[%s1118_s26 + $0x30] sm:$0xf0]  ;;  %v799_v48 = vld [vmem:[%s1118_s26 + $0x28] sm:$0xf]  ;;  %v792_v52 = vor.u32 %v944_v45, %v791_v44 }
  0x1e   : > { %596 = vmatpush.bf16.msra.mxu2 %v966_v14  ;;  %v945_v49 = vld [vmem:[%s1118_s26 + $0x34] sm:$0xf0]  ;;  %v943_v50 = vld [vmem:[%s1118_s26 + $0x2c] sm:$0xf]  ;;  %v801_v51 = vld [vmem:[%s1118_s26 + $0x38] sm:$0xf0]  ;;  %v796_v53 = vor.u32 %v942_v46, %v793_v47 }
  0x1f   : > { %615 = vmatpush.bf16.msra.mxu3 %v974_v15  ;;  %v800_v54 = vor.u32 %v945_v49, %v799_v48  ;;  %v804_v55 = vor.u32 %v943_v50, %v801_v51 }
  0x20   : > { %559 = vmatpush.bf16.msra.mxu0 %v949_v16 }
  0x21   : > { %578 = vmatpush.bf16.msra.mxu1 %v957_v17 }
  0x22   : > { %597 = vmatpush.bf16.msra.mxu2 %v965_v18 }
  0x23   : > { %616 = vmatpush.bf16.msra.mxu3 %v973_v19 }
  0x24   : > { %560 = vmatpush.bf16.msra.mxu0 %v948_v20 }
  0x25   : > { %579 = vmatpush.bf16.msra.mxu1 %v956_v21 }
  0x26   : > { %598 = vmatpush.bf16.msra.mxu2 %v964_v22 }
  0x27   : > { %617 = vmatpush.bf16.msra.mxu3 %v972_v23 }
  0x28   : > { %561 = vmatpush.bf16.msra.mxu0 %v947_v24 }
  0x29   : > { %580 = vmatpush.bf16.msra.mxu1 %v955_v25 }
  0x2a   : > { %599 = vmatpush.bf16.msra.mxu2 %v963_v26 }
  0x2b   : > { %618 = vmatpush.bf16.msra.mxu3 %v971_v27 }
  0x2c   : > { %562 = vmatpush.bf16.msra.mxu0 %v946_v28 }
  0x2d   : > { %581 = vmatpush.bf16.msra.mxu1 %v954_v29 }
  0x2e   : > { %600 = vmatpush.bf16.msra.mxu2 %v962_v30 }
  0x2f   : > { %619 = vmatpush.bf16.msra.mxu3 %v970_v31  ;;  %563 = vmatmul.bf16.vlgmr.msra.gmra.mxu0 %v776_v40 }
  0x30   : > { %582 = vmatmul.bf16.vlgmr.msra.gmra.mxu1 %v780_v41 }
  0x31   : > { %601 = vmatmul.bf16.vlgmr.msra.gmra.mxu2 %v784_v42 }
  0x32   : > { %620 = vmatmul.bf16.vlgmr.msra.gmra.mxu3 %v788_v43 }
  0x3f   : > { %568 = vmatmul.bf16.gmra.mxu0 %v792_v52 }
  0x40   : > { %587 = vmatmul.bf16.gmra.mxu1 %v796_v53 }
  0x41   : > { %606 = vmatmul.bf16.gmra.mxu2 %v800_v54 }
  0x42   : > { %625 = vmatmul.bf16.gmra.mxu3 %v804_v55 }
  0xac   : > { %v564_v57 = vpop.f32.mrf.mxu0 }
  0xad   : > { %v583_v58 = vpop.f32.mrf.mxu1  ;;  %v565_v59 = vadd.f32 %v1013_v56, %v564_v57 }
  0xaf   : > { %v584_v60 = vadd.f32 %v583_v58, %v565_v59 }
  0xb4   : > { %v602_v61 = vpop.f32.mrf.mxu2  ;;  %v566_v63 = vpop.f32.mrf.mxu0 }
  0xb5   : > { %v621_v62 = vpop.f32.mrf.mxu3  ;;  %v585_v0 = vpop.f32.mrf.mxu1  ;;  %v603_v1 = vadd.f32 %v602_v61, %v584_v60  ;;  %v567_v2 = vadd.f32 %v1013_v56, %v566_v63 }
  0xb7   : > { %v622_v3 = vadd.f32 %v621_v62, %v603_v1  ;;  %v586_v4 = vadd.f32 %v585_v0, %v567_v2 }
  0xb9   : > { %v635_v9 = vmul.f32 0.1, %v622_v3  ;;  %vm631_vm0 = vcmp.ge.f32.partialorder %v622_v3, 0.0 }
  0xbb   : > { %v639_v14 = vsel %vm631_vm0, %v622_v3, %v635_v9 }
  0xbc   : > { %v604_v5 = vpop.f32.mrf.mxu2  ;;  %v569_v8 = vpop.f32.mrf.mxu0 }
  0xbd   : > { %v623_v6 = vpop.f32.mrf.mxu3  ;;  %v605_v7 = vadd.f32 %v604_v5, %v586_v4  ;;  %v570_v11 = vadd.f32 %v1013_v56, %v569_v8  ;;  %v588_v12 = vpop.f32.mrf.mxu1 }
  0xbf   : > { %v624_v10 = vadd.f32 %v623_v6, %v605_v7  ;;  %v589_v16 = vadd.f32 %v588_v12, %v570_v11 }
  0xc1   : > { %vm632_vm1 = vcmp.ge.f32.partialorder %v624_v10, 0.0  ;;  %v636_v13 = vmul.f32 0.1, %v624_v10 }
  0xc3   : > { %v640_v15 = vsel %vm632_vm1, %v624_v10, %v636_v13 }
  0xc4   : > { %v981_v17 = vpack.c.bf16 %v640_v15, %v639_v14  ;;  %v607_v18 = vpop.f32.mrf.mxu2  ;;  %v571_v20 = vpop.f32.mrf.mxu0 }
  0xc5   : > { %v626_v19 = vpop.f32.mrf.mxu3  ;;  %v608_v21 = vadd.f32 %v607_v18, %v589_v16  ;;  %v572_v22 = vadd.f32 %v1013_v56, %v571_v20  ;;  %v590_v23 = vpop.f32.mrf.mxu1 }
  0xc6   : > { %982 = vst [vmem:[%s245_s5] sm:$0xff] %v981_v17  }
  0xc7   : > { %v627_v24 = vadd.f32 %v626_v19, %v608_v21  ;;  %v591_v25 = vadd.f32 %v590_v23, %v572_v22 }
  0xc9   : > { %v637_v29 = vmul.f32 0.1, %v627_v24  ;;  %vm633_vm2 = vcmp.ge.f32.partialorder %v627_v24, 0.0 }
  0xcb   : > { %v641_v32 = vsel %vm633_vm2, %v627_v24, %v637_v29 }
  0xcc   : > { %v609_v26 = vpop.f32.mrf.mxu2 }
  0xcd   : > { %v610_v27 = vadd.f32 %v609_v26, %v591_v25  ;;  %v628_v28 = vpop.f32.mrf.mxu3 }
  0xcf   : > { %v629_v30 = vadd.f32 %v628_v28, %v610_v27 }
  0xd1   : > { %vm634_vm3 = vcmp.ge.f32.partialorder %v629_v30, 0.0  ;;  %v638_v31 = vmul.f32 0.1, %v629_v30 }
  0xd3   : > { %v642_v33 = vsel %vm634_vm3, %v629_v30, %v638_v31 }
  0xd4   : > { %v986_v34 = vpack.c.bf16 %v642_v33, %v641_v32 }
  0xd6   : > { %988 = vst [vmem:[%s245_s5 + $0x8] sm:$0xff] %v986_v34  }
  0xd7 PF: > { %s13_s14 = sadd.s32 1, %s1036_s14   ;;  %s1164_s12 = smov %s1032_s13 }
  0xd8   : > { %p10_p5 = scmp.ge.s32.totalorder %s13_s14, 7   ;;  %s1165_s13 = smov %s1167_s15 }
  0xda   :  { %12 = sbr.rel (!%p10_p5) target bundleno = 2 (0x2), region = 68 }

// kernel: discriminator_b_forward.13
= control target key start
LH: loop header
LB: loop body
LE: loop exit
PB: predicated region body
PF: predicated region fallthrough
CT: control target
= control target key end

     0   :  { %s1341_s1 = inlined_call_operand.vmem [shape: bf16[1,896,128], index: 1, kind: input, shape index: {}]   ;;  %s1342_s2 = inlined_call_operand.vmem [shape: f32[1,1,128], index: 2, kind: input, shape index: {}]   ;;  %s1343_s0 = inlined_call_operand.vmem [shape: bf16[1,32,896], index: 0, kind: input, shape index: {}]   ;;  %s1344_s3 = inlined_call_operand.vmem [shape: f32[1,32,128], index: 3, kind: output, shape index: {}]  }
   0x1   :  { %v996_v0 = vld [vmem:[%s1341_s1 + $0x38] sm:$0xff]  ;;  %v995_v4 = vld [vmem:[%s1341_s1 + $0x30] sm:$0xff]  ;;  %v994_v8 = vld [vmem:[%s1341_s1 + $0x28] sm:$0xff] }
   0x2   :  { %v1004_v1 = vld [vmem:[%s1341_s1 + $0x78] sm:$0xff]  ;;  %554 = vmatpush.bf16.msra.mxu0 %v996_v0  ;;  %v1003_v5 = vld [vmem:[%s1341_s1 + $0x70] sm:$0xff]  ;;  %v1002_v9 = vld [vmem:[%s1341_s1 + $0x68] sm:$0xff] }
   0x3   :  { %v1012_v2 = vld [vmem:[%s1341_s1 + $0xb8] sm:$0xff]  ;;  %573 = vmatpush.bf16.msra.mxu1 %v1004_v1  ;;  %v1011_v6 = vld [vmem:[%s1341_s1 + $0xb0] sm:$0xff]  ;;  %v1010_v10 = vld [vmem:[%s1341_s1 + $0xa8] sm:$0xff] }
   0x4   :  { %v1020_v3 = vld [vmem:[%s1341_s1 + $0xf8] sm:$0xff]  ;;  %592 = vmatpush.bf16.msra.mxu2 %v1012_v2  ;;  %v1019_v7 = vld [vmem:[%s1341_s1 + $0xf0] sm:$0xff]  ;;  %v1018_v11 = vld [vmem:[%s1341_s1 + $0xe8] sm:$0xff] }
   0x5   :  { %611 = vmatpush.bf16.msra.mxu3 %v1020_v3  ;;  %v993_v12 = vld [vmem:[%s1341_s1 + $0x20] sm:$0xff]  ;;  %v992_v16 = vld [vmem:[%s1341_s1 + $0x18] sm:$0xff]  ;;  %v991_v20 = vld [vmem:[%s1341_s1 + $0x10] sm:$0xff] }
   0x6   :  { %555 = vmatpush.bf16.msra.mxu0 %v995_v4  ;;  %v1001_v13 = vld [vmem:[%s1341_s1 + $0x60] sm:$0xff]  ;;  %v1000_v17 = vld [vmem:[%s1341_s1 + $0x58] sm:$0xff]  ;;  %v999_v21 = vld [vmem:[%s1341_s1 + $0x50] sm:$0xff] }
   0x7   :  { %574 = vmatpush.bf16.msra.mxu1 %v1003_v5  ;;  %v1009_v14 = vld [vmem:[%s1341_s1 + $0xa0] sm:$0xff]  ;;  %v1008_v18 = vld [vmem:[%s1341_s1 + $0x98] sm:$0xff]  ;;  %v1007_v22 = vld [vmem:[%s1341_s1 + $0x90] sm:$0xff] }
   0x8   :  { %593 = vmatpush.bf16.msra.mxu2 %v1011_v6  ;;  %v1017_v15 = vld [vmem:[%s1341_s1 + $0xe0] sm:$0xff]  ;;  %v1016_v19 = vld [vmem:[%s1341_s1 + $0xd8] sm:$0xff]  ;;  %v1015_v23 = vld [vmem:[%s1341_s1 + $0xd0] sm:$0xff] }
   0x9   :  { %612 = vmatpush.bf16.msra.mxu3 %v1019_v7  ;;  %v990_v24 = vld [vmem:[%s1341_s1 + $0x8] sm:$0xff]  ;;  %v989_v28 = vld [vmem:[%s1341_s1] sm:$0xff]  ;;  %v978_v33 = vld [vmem:[%s1343_s0 + $0x18] sm:$0xf0] }
   0xa   :  { %556 = vmatpush.bf16.msra.mxu0 %v994_v8  ;;  %v998_v25 = vld [vmem:[%s1341_s1 + $0x48] sm:$0xff]  ;;  %v997_v29 = vld [vmem:[%s1341_s1 + $0x40] sm:$0xff]  ;;  %v1044_v40 = vld [vmem:[%s1341_s1 + $0x1b8] sm:$0xff] }
   0xb   :  { %575 = vmatpush.bf16.msra.mxu1 %v1002_v9  ;;  %v1006_v26 = vld [vmem:[%s1341_s1 + $0x88] sm:$0xff]  ;;  %v1005_v30 = vld [vmem:[%s1341_s1 + $0x80] sm:$0xff]  ;;  %v1028_v41 = vld [vmem:[%s1341_s1 + $0x138] sm:$0xff] }
   0xc   :  { %594 = vmatpush.bf16.msra.mxu2 %v1010_v10  ;;  %v1014_v27 = vld [vmem:[%s1341_s1 + $0xc8] sm:$0xff]  ;;  %v1013_v31 = vld [vmem:[%s1341_s1 + $0xc0] sm:$0xff]  ;;  %v1036_v46 = vld [vmem:[%s1341_s1 + $0x178] sm:$0xff] }
   0xd   :  { %613 = vmatpush.bf16.msra.mxu3 %v1018_v11  ;;  %v697_v32 = vld [vmem:[%s1343_s0] sm:$0xf]  ;;  %v975_v34 = vld [vmem:[%s1343_s0 + $0x4] sm:$0xf]  ;;  %v705_v36 = vld [vmem:[%s1343_s0 + $0x8] sm:$0xf] }
   0xe   :  { %557 = vmatpush.bf16.msra.mxu0 %v993_v12  ;;  %v699_v35 = vld [vmem:[%s1343_s0 + $0x1c] sm:$0xf0]  ;;  %v979_v37 = vld [vmem:[%s1343_s0 + $0x20] sm:$0xf0]  ;;  %v976_v38 = vld [vmem:[%s1343_s0 + $0xc] sm:$0xf]  ;;  %v698_v42 = vor.u32 %v978_v33, %v697_v32 }
   0xf   :  { %576 = vmatpush.bf16.msra.mxu1 %v1001_v13  ;;  %v707_v39 = vld [vmem:[%s1343_s0 + $0x24] sm:$0xf0]  ;;  %v702_v43 = vor.u32 %v975_v34, %v699_v35  ;;  %v706_v44 = vor.u32 %v979_v37, %v705_v36  ;;  %v1043_v47 = vld [vmem:[%s1341_s1 + $0x1b0] sm:$0xff]  ;;  %v1041_v53 = vld [vmem:[%s1341_s1 + $0x1a0] sm:$0xff] }
  0x10   :  { %595 = vmatpush.bf16.msra.mxu2 %v1009_v14  ;;  %v710_v45 = vor.u32 %v976_v38, %v707_v39  ;;  %v1027_v48 = vld [vmem:[%s1341_s1 + $0x130] sm:$0xff]  ;;  %v1042_v50 = vld [vmem:[%s1341_s1 + $0x1a8] sm:$0xff]  ;;  %v1025_v54 = vld [vmem:[%s1341_s1 + $0x120] sm:$0xff] }
  0x11   :  { %614 = vmatpush.bf16.msra.mxu3 %v1017_v15  ;;  %v1035_v49 = vld [vmem:[%s1341_s1 + $0x170] sm:$0xff]  ;;  %v1026_v51 = vld [vmem:[%s1341_s1 + $0x128] sm:$0xff]  ;;  %v1033_v55 = vld [vmem:[%s1341_s1 + $0x160] sm:$0xff] }
  0x12   :  { %558 = vmatpush.bf16.msra.mxu0 %v992_v16  ;;  %v1034_v52 = vld [vmem:[%s1341_s1 + $0x168] sm:$0xff]  ;;  %v725_v56 = vld [vmem:[%s1343_s0 + $0x38] sm:$0xf]  ;;  %v985_v57 = vld [vmem:[%s1343_s0 + $0x50] sm:$0xf0] }
  0x13   :  { %577 = vmatpush.bf16.msra.mxu1 %v1000_v17  ;;  %v982_v58 = vld [vmem:[%s1343_s0 + $0x3c] sm:$0xf]  ;;  %v727_v59 = vld [vmem:[%s1343_s0 + $0x54] sm:$0xf0]  ;;  %v733_v60 = vld [vmem:[%s1343_s0 + $0x40] sm:$0xf]  ;;  %v726_v2 = vor.u32 %v985_v57, %v725_v56 }
  0x14   :  { %596 = vmatpush.bf16.msra.mxu2 %v1008_v18  ;;  %v986_v61 = vld [vmem:[%s1343_s0 + $0x58] sm:$0xf0]  ;;  %v983_v62 = vld [vmem:[%s1343_s0 + $0x44] sm:$0xf]  ;;  %v735_v63 = vld [vmem:[%s1343_s0 + $0x5c] sm:$0xf0]  ;;  %v730_v3 = vor.u32 %v982_v58, %v727_v59 }
  0x15   :  { %615 = vmatpush.bf16.msra.mxu3 %v1016_v19  ;;  %v1040_v0 = vld [vmem:[%s1341_s1 + $0x198] sm:$0xff]  ;;  %v734_v4 = vor.u32 %v986_v61, %v733_v60  ;;  %v738_v5 = vor.u32 %v983_v62, %v735_v63  ;;  %v1039_v7 = vld [vmem:[%s1341_s1 + $0x190] sm:$0xff]  ;;  %v1038_v10 = vld [vmem:[%s1341_s1 + $0x188] sm:$0xff] }
  0x16   :  { %559 = vmatpush.bf16.msra.mxu0 %v991_v20  ;;  %v1024_v1 = vld [vmem:[%s1341_s1 + $0x118] sm:$0xff]  ;;  %v1023_v8 = vld [vmem:[%s1341_s1 + $0x110] sm:$0xff]  ;;  %v1022_v11 = vld [vmem:[%s1341_s1 + $0x108] sm:$0xff] }
  0x17   :  { %578 = vmatpush.bf16.msra.mxu1 %v999_v21  ;;  %v1032_v6 = vld [vmem:[%s1341_s1 + $0x158] sm:$0xff]  ;;  %v1031_v9 = vld [vmem:[%s1341_s1 + $0x150] sm:$0xff]  ;;  %v1030_v12 = vld [vmem:[%s1341_s1 + $0x148] sm:$0xff] }
  0x18   :  { %597 = vmatpush.bf16.msra.mxu2 %v1007_v22  ;;  %v1037_v13 = vld [vmem:[%s1341_s1 + $0x180] sm:$0xff]  ;;  %v713_v16 = vld [vmem:[%s1343_s0 + $0x10] sm:$0xf]  ;;  %v980_v17 = vld [vmem:[%s1343_s0 + $0x28] sm:$0xf0] }
  0x19   :  { %616 = vmatpush.bf16.msra.mxu3 %v1015_v23  ;;  %v1021_v14 = vld [vmem:[%s1341_s1 + $0x100] sm:$0xff]  ;;  %v741_v18 = vld [vmem:[%s1343_s0 + $0x48] sm:$0xf]  ;;  %v977_v20 = vld [vmem:[%s1343_s0 + $0x14] sm:$0xf] }
  0x1a   :  { %560 = vmatpush.bf16.msra.mxu0 %v990_v24  ;;  %v1029_v15 = vld [vmem:[%s1341_s1 + $0x140] sm:$0xff]  ;;  %v715_v21 = vld [vmem:[%s1343_s0 + $0x2c] sm:$0xf0]  ;;  %v721_v22 = vld [vmem:[%s1343_s0 + $0x18] sm:$0xf]  ;;  %v714_v24 = vor.u32 %v980_v17, %v713_v16 }
  0x1b   :  { %579 = vmatpush.bf16.msra.mxu1 %v998_v25  ;;  %v987_v19 = vld [vmem:[%s1343_s0 + $0x60] sm:$0xf0]  ;;  %v981_v23 = vld [vmem:[%s1343_s0 + $0x30] sm:$0xf0] }
  0x1c   :  { %598 = vmatpush.bf16.msra.mxu2 %v1006_v26  ;;  %v742_v25 = vor.u32 %v987_v19, %v741_v18  ;;  %v718_v26 = vor.u32 %v977_v20, %v715_v21 }
  0x1d   :  { %617 = vmatpush.bf16.msra.mxu3 %v1014_v27  ;;  %v722_v27 = vor.u32 %v981_v23, %v721_v22 }
  0x1e   :  { %561 = vmatpush.bf16.msra.mxu0 %v989_v28  ;;  %v984_v28 = vld [vmem:[%s1343_s0 + $0x4c] sm:$0xf] }
  0x1f   :  { %580 = vmatpush.bf16.msra.mxu1 %v997_v29  ;;  %v743_v29 = vld [vmem:[%s1343_s0 + $0x64] sm:$0xf0] }
  0x20   :  { %599 = vmatpush.bf16.msra.mxu2 %v1005_v30  ;;  %v749_v30 = vld [vmem:[%s1343_s0 + $0x50] sm:$0xf]  ;;  %v746_v32 = vor.u32 %v984_v28, %v743_v29 }
  0x21   :  { %618 = vmatpush.bf16.msra.mxu3 %v1013_v31  ;;  %562 = vmatmul.bf16.vlgmr.msra.gmra.mxu0 %v698_v42  ;;  %v988_v31 = vld [vmem:[%s1343_s0 + $0x68] sm:$0xf0] }
  0x22   :  { %630 = vmatpush.bf16.msrb.mxu0 %v1028_v41  ;;  %581 = vmatmul.bf16.vlgmr.msra.gmra.mxu1 %v702_v43  ;;  %v750_v33 = vor.u32 %v988_v31, %v749_v30  ;;  %v1053_v43 = vld [vmem:[%s1342_s2] ss:$0 sm:$0xff] }
  0x23   :  { %600 = vmatmul.bf16.vlgmr.msra.gmra.mxu2 %v706_v44  ;;  %649 = vmatpush.bf16.msrb.mxu1 %v1036_v46 }
  0x24   :  { %668 = vmatpush.bf16.msrb.mxu2 %v1044_v40  ;;  %619 = vmatmul.bf16.vlgmr.msra.gmra.mxu3 %v710_v45 }
  0x25   :  { %1045 = vmatpush.bf16.msrb.mxu3 %v1028_v41 }
  0x26   :  { %631 = vmatpush.bf16.msrb.mxu0 %v1027_v48 }
  0x27   :  { %650 = vmatpush.bf16.msrb.mxu1 %v1035_v49 }
  0x28   :  { %669 = vmatpush.bf16.msrb.mxu2 %v1043_v47 }
  0x29   :  { %1046 = vmatpush.bf16.msrb.mxu3 %v1027_v48 }
  0x2a   :  { %632 = vmatpush.bf16.msrb.mxu0 %v1026_v51 }
  0x2b   :  { %651 = vmatpush.bf16.msrb.mxu1 %v1034_v52 }
  0x2c   :  { %670 = vmatpush.bf16.msrb.mxu2 %v1042_v50 }
  0x2d   :  { %1047 = vmatpush.bf16.msrb.mxu3 %v1026_v51 }
  0x2e   :  { %633 = vmatpush.bf16.msrb.mxu0 %v1025_v54 }
  0x2f   :  { %652 = vmatpush.bf16.msrb.mxu1 %v1033_v55 }
  0x30   :  { %671 = vmatpush.bf16.msrb.mxu2 %v1041_v53 }
  0x31   :  { %1048 = vmatpush.bf16.msrb.mxu3 %v1025_v54  ;;  %567 = vmatmul.bf16.gmra.mxu0 %v726_v2 }
  0x32   :  { %634 = vmatpush.bf16.msrb.mxu0 %v1024_v1  ;;  %586 = vmatmul.bf16.gmra.mxu1 %v730_v3 }
  0x33   :  { %605 = vmatmul.bf16.gmra.mxu2 %v734_v4  ;;  %653 = vmatpush.bf16.msrb.mxu1 %v1032_v6 }
  0x34   :  { %672 = vmatpush.bf16.msrb.mxu2 %v1040_v0  ;;  %624 = vmatmul.bf16.gmra.mxu3 %v738_v5 }
  0x35   :  { %1049 = vmatpush.bf16.msrb.mxu3 %v1024_v1 }
  0x36   :  { %635 = vmatpush.bf16.msrb.mxu0 %v1023_v8 }
  0x37   :  { %654 = vmatpush.bf16.msrb.mxu1 %v1031_v9 }
  0x38   :  { %673 = vmatpush.bf16.msrb.mxu2 %v1039_v7 }
  0x39   :  { %1050 = vmatpush.bf16.msrb.mxu3 %v1023_v8 }
  0x3a   :  { %636 = vmatpush.bf16.msrb.mxu0 %v1022_v11 }
  0x3b   :  { %655 = vmatpush.bf16.msrb.mxu1 %v1030_v12 }
  0x3c   :  { %674 = vmatpush.bf16.msrb.mxu2 %v1038_v10 }
  0x3d   :  { %1051 = vmatpush.bf16.msrb.mxu3 %v1022_v11 }
  0x3e   :  { %637 = vmatpush.bf16.msrb.mxu0 %v1021_v14 }
  0x3f   :  { %656 = vmatpush.bf16.msrb.mxu1 %v1029_v15 }
  0x40   :  { %675 = vmatpush.bf16.msrb.mxu2 %v1037_v13 }
  0x41   :  { %1052 = vmatpush.bf16.msrb.mxu3 %v1021_v14  ;;  %638 = vmatmul.bf16.vlgmr.msrb.gmra.mxu0 %v714_v24 }
  0x42   :  { %657 = vmatmul.bf16.vlgmr.msrb.gmra.mxu1 %v718_v26 }
  0x43   :  { %676 = vmatmul.bf16.vlgmr.msrb.gmra.mxu2 %v722_v27 }
  0x44   :  { %643 = vmatmul.bf16.vlgmr.msrb.gmra.mxu3 %v742_v25 }
  0x52   :  { %662 = vmatmul.bf16.gmra.mxu1 %v746_v32 }
  0x53   :  { %681 = vmatmul.bf16.gmra.mxu2 %v750_v33 }
  0x9e   :  { %v563_v34 = vpop.f32.mrf.mxu0 }
  0x9f   :  { %v582_v35 = vpop.f32.mrf.mxu1  ;;  %v564_v45 = vadd.f32 %v1053_v43, %v563_v34 }
  0xa1   :  { %v583_v49 = vadd.f32 %v582_v35, %v564_v45 }
  0xa6   :  { %v601_v36 = vpop.f32.mrf.mxu2  ;;  %v565_v38 = vpop.f32.mrf.mxu0 }
  0xa7   :  { %v620_v37 = vpop.f32.mrf.mxu3  ;;  %v584_v39 = vpop.f32.mrf.mxu1  ;;  %v602_v51 = vadd.f32 %v601_v36, %v583_v49  ;;  %v566_v52 = vadd.f32 %v1053_v43, %v565_v38 }
  0xa9   :  { %v621_v55 = vadd.f32 %v620_v37, %v602_v51  ;;  %v585_v57 = vadd.f32 %v584_v39, %v566_v52 }
  0xae   :  { %v603_v40 = vpop.f32.mrf.mxu2  ;;  %v568_v41 = vpop.f32.mrf.mxu0 }
  0xaf   :  { %v587_v42 = vpop.f32.mrf.mxu1  ;;  %v622_v44 = vpop.f32.mrf.mxu3  ;;  %v604_v59 = vadd.f32 %v603_v40, %v585_v57  ;;  %v569_v61 = vadd.f32 %v1053_v43, %v568_v41 }
  0xb1   :  { %v623_v1 = vadd.f32 %v622_v44, %v604_v59  ;;  %v588_v4 = vadd.f32 %v587_v42, %v569_v61 }
  0xb6   :  { %v606_v46 = vpop.f32.mrf.mxu2  ;;  %v570_v47 = vpop.f32.mrf.mxu0 }
  0xb7   :  { %v589_v48 = vpop.f32.mrf.mxu1  ;;  %v625_v50 = vpop.f32.mrf.mxu3  ;;  %v607_v6 = vadd.f32 %v606_v46, %v588_v4  ;;  %v571_v10 = vadd.f32 %v1053_v43, %v570_v47 }
  0xb9   :  { %v626_v13 = vadd.f32 %v625_v50, %v607_v6  ;;  %v590_v14 = vadd.f32 %v589_v48, %v571_v10 }
  0xbe   :  { %v608_v53 = vpop.f32.mrf.mxu2  ;;  %v639_v54 = vpop.f32.mrf.mxu0 }
  0xbf   :  { %v658_v56 = vpop.f32.mrf.mxu1  ;;  %v640_v58 = vadd.f32 %v639_v54, %v621_v55  ;;  %v627_v60 = vpop.f32.mrf.mxu3  ;;  %v609_v16 = vadd.f32 %v608_v53, %v590_v14 }
  0xc1   :  { %v659_v62 = vadd.f32 %v658_v56, %v640_v58  ;;  %v628_v21 = vadd.f32 %v627_v60, %v609_v16 }
  0xc6   :  { %v677_v63 = vpop.f32.mrf.mxu2  ;;  %v641_v0 = vpop.f32.mrf.mxu0 }
  0xc7   :  { %v678_v2 = vadd.f32 %v677_v63, %v659_v62  ;;  %v660_v3 = vpop.f32.mrf.mxu1  ;;  %v642_v5 = vadd.f32 %v641_v0, %v623_v1  ;;  %v644_v8 = vpop.f32.mrf.mxu3 }
  0xc8   :  { %v645_v15 = vadd.f32 %v644_v8, %v626_v13 }
  0xc9   :  { %687 = vst [vmem:[%s1344_s3] sm:$0xff] %v678_v2  ;;  %v661_v7 = vadd.f32 %v660_v3, %v642_v5 }
  0xce   :  { %v679_v9 = vpop.f32.mrf.mxu2 }
  0xcf   :  { %v680_v11 = vadd.f32 %v679_v9, %v661_v7  ;;  %v663_v12 = vpop.f32.mrf.mxu1  ;;  %v646_v20 = vpop.f32.mrf.mxu3 }
  0xd0   :  { %v664_v17 = vadd.f32 %v663_v12, %v645_v15  ;;  %v647_v23 = vadd.f32 %v646_v20, %v628_v21 }
  0xd1   :  { %688 = vst [vmem:[%s1344_s3 + $0x8] sm:$0xff] %v680_v11 }
  0xd6   :  { %v682_v18 = vpop.f32.mrf.mxu2 }
  0xd7   :  { %v683_v19 = vadd.f32 %v682_v18, %v664_v17  ;;  %v665_v22 = vpop.f32.mrf.mxu1 }
  0xd8   :  { %v666_v24 = vadd.f32 %v665_v22, %v647_v23 }
  0xd9   :  { %689 = vst [vmem:[%s1344_s3 + $0x10] sm:$0xff] %v683_v19 }
  0xde   :  { %v684_v25 = vpop.f32.mrf.mxu2 }
  0xdf   :  { %v685_v26 = vadd.f32 %v684_v25, %v666_v24 }
  0xe1   :  { %690 = vst [vmem:[%s1344_s3 + $0x18] sm:$0xff] %v685_v26 }

// kernel: squeeze.55
= control target key start
LH: loop header
LB: loop body
LE: loop exit
PB: predicated region body
PF: predicated region fallthrough
CT: control target
= control target key end

     0   :  { %s7_s6 = smov 3  ;;  %s21_s9 = smov 3  ;;  %vm4_vm0 = vcmask 80896   ;;  %vm11_vm1 = vcmask 736896   ;;  %vm18_vm2 = vcmask 654896   ;;  %vm25_vm3 = vcmask 572896   ;;  %s132_s0 = inlined_call_operand.vmem [shape: f32[2,9,10], index: 0, kind: input, shape index: {}]   ;;  %s133_s1 = inlined_call_operand.vmem [shape: f32[2,90], index: 1, kind: output, shape index: {}]  }
   0x1   :  { %v68_v0 = vld [vmem:[%s132_s0 + $0x8] ss:$16 sm:%s7_s6]   ;;  %s84_s10 = smov 80   ;;  %v70_v1 = vld [vmem:[%s132_s0 + $0x6] ss:$16 sm:%s21_s9]   ;;  %s85_s13 = smov 60  }
   0x2   :  { %9 = vrot.lane.b32.xlu0 %v68_v0, %s84_s10  ;;  %23 = vrot.lane.b32.xlu1 %v70_v1, %s85_s13  ;;  %s14_s14 = smov 3  ;;  %s28_s15 = smov 3  ;;  %vm32_vm4 = vcmask 490896   ;;  %vm39_vm5 = vcmask 408896   ;;  %vm46_vm6 = vcmask 326896   ;;  %vm53_vm7 = vcmask 244896  }
   0x3   :  { %s35_s16 = smov 3  ;;  %v69_v2 = vld [vmem:[%s132_s0 + $0x7] ss:$16 sm:%s14_s14]   ;;  %v71_v4 = vld [vmem:[%s132_s0 + $0x5] ss:$16 sm:%s28_s15]   ;;  %s86_s23 = smov 40  }
   0x4   :  { %v72_v3 = vld [vmem:[%s132_s0 + $0x4] ss:$16 sm:%s35_s16]   ;;  %s87_s24 = smov 70   ;;  %s42_s25 = smov 3  ;;  %vm60_vm8 = vcmask 162896  }
   0x5   :  { %37 = vrot.lane.b32.xlu2 %v72_v3, %s86_s23  ;;  %s88_s26 = smov 50   ;;  %s49_s27 = smov 3  ;;  %v73_v5 = vld [vmem:[%s132_s0 + $0x3] ss:$16 sm:%s42_s25]  }
   0x6   :  { %s56_s28 = smov 3  ;;  %v74_v6 = vld [vmem:[%s132_s0 + $0x2] ss:$16 sm:%s49_s27]   ;;  %s89_s6 = smov 30  }
   0x7   :  { %v75_v7 = vld [vmem:[%s132_s0 + $0x1] ss:$16 sm:%s56_s28]   ;;  %s90_s7 = smov 20   ;;  %s91_s8 = smov 10  }
   0x8   :  { %s2_s9 = smov 3 }
   0x9   :  { %v3_v8 = vld [vmem:[%s132_s0] ss:$16 sm:%s2_s9]  }
   0xa   :  { %16 = vrot.lane.b32.xlu0 %v69_v2, %s87_s24  ;;  %30 = vrot.lane.b32.xlu1 %v71_v4, %s88_s26  ;;  %5 = vst.msk [vmem:[#allocation0] sm:$0x3] %vm4_vm0, %v3_v8  }
   0xd   :  { %44 = vrot.lane.b32.xlu2 %v73_v5, %s89_s6 }
  0x12   :  { %51 = vrot.lane.b32.xlu0 %v74_v6, %s90_s7  ;;  %58 = vrot.lane.b32.xlu1 %v75_v7, %s91_s8 }
  0x5f   :  { %v38_v9 = vpop.permute.xlu2 %37  }
  0x67   :  { %v45_v10 = vpop.permute.xlu2 %44  }
  0x74   :  { %v10_v11 = vpop.permute.xlu0 %9   ;;  %v24_v12 = vpop.permute.xlu1 %23  }
  0x75   :  { %12 = vst.msk [vmem:[#allocation0] sm:$0x3] %vm11_vm1, %v10_v11  }
  0x7c   :  { %v17_v13 = vpop.permute.xlu0 %16   ;;  %v31_v14 = vpop.permute.xlu1 %30  }
  0x7d   :  { %19 = vst.msk [vmem:[#allocation0] sm:$0x3] %vm18_vm2, %v17_v13  }
  0x7e   :  { %26 = vst.msk [vmem:[#allocation0] sm:$0x3] %vm25_vm3, %v24_v12  }
  0x7f   :  { %33 = vst.msk [vmem:[#allocation0] sm:$0x3] %vm32_vm4, %v31_v14  }
  0x80   :  { %40 = vst.msk [vmem:[#allocation0] sm:$0x3] %vm39_vm5, %v38_v9  }
  0x81   :  { %47 = vst.msk [vmem:[#allocation0] sm:$0x3] %vm46_vm6, %v45_v10  }
  0x84   :  { %v52_v15 = vpop.permute.xlu0 %51   ;;  %v59_v16 = vpop.permute.xlu1 %58  }
  0x85   :  { %54 = vst.msk [vmem:[#allocation0] sm:$0x3] %vm53_vm7, %v52_v15  }
  0x86   :  { %61 = vst.msk [vmem:[#allocation0] sm:$0x3] %vm60_vm8, %v59_v16  }
  0x8d   :  { %v64_v17 = vld [vmem:[#allocation0] sm:$0x3] }
  0x8e   :  { %67 = vst [vmem:[%s133_s1] sm:$0x3] %v64_v17 }

</bundles_post_ra>
